<compile_context>
chip_gen: v7x
topology: tpu7x:2x2x1
jax: 0.10.0
libtpu: 0.0.40
codegen_flags: <defaults>
</compile_context>

<pallas_src>
import math
import numpy as np

import jax
import jax.numpy as jnp
from jax.experimental import pallas as pl
from jax.experimental.pallas import tpu as pltpu

# Full-precision matmuls so the Pallas kernel and the pure-JAX reference agree.
jax.config.update("jax_default_matmul_precision", "highest")

# ----------------------------- model config (small) -----------------------------
NUM_SEGMENTS = 8        # T (num_clips)
NUM_CLASSES = 4         # number of classes / parallel streams
NUM_FEATURES = 16       # F (feature_dim == conv channels)
HIDDEN_DIM = 32         # H
NUM_LAYERS = 1
BATCH = 2               # B
SPATIAL = 4             # h  -> chw = F * h * h


# ============================ fused Pallas kernel ============================

def _swap01(x):
    """(A, B, H) -> (B, A, H) using only basic slices + leading-axis stack."""
    return jnp.stack([x[:, i, :] for i in range(x.shape[1])], axis=0)


def _layernorm(x, g, b):
    m = jnp.mean(x, axis=-1, keepdims=True)
    v = jnp.mean(jnp.square(x - m), axis=-1, keepdims=True)
    return (x - m) * jax.lax.rsqrt(v + 1e-5) * g + b


def _fused_forward_kernel(x_ref, pe_ref, few_ref, feb_ref,
                          wqkv_ref, wo_ref, wf1_ref, wf2_ref,
                          bqkv_ref, bo_ref, bf1_ref, bf2_ref, ln_ref,
                          alpha_ref, clsw_ref, clsb_ref, out_ref):
    T, C, H = NUM_SEGMENTS, NUM_CLASSES, HIDDEN_DIM
    scale = 1.0 / math.sqrt(H)

    # ---- AdaptiveAvgPool2d(1) + Flatten + PositionalEncoding --------------------
    pooled = jnp.mean(x_ref[0], axis=-1) + pe_ref[...]            # (T, F)

    # ---- per-class feature expansion: one lane-dense (T, C*H = 128) matmul ------
    y = jnp.dot(pooled, few_ref[...], preferred_element_type=jnp.float32)
    y = jnp.maximum(y + feb_ref[...], 0.0)                        # (T, C*H)

    # working layout: 2-D (C*T, H), rows ordered (class, time): row = c*T + t
    feats = jnp.concatenate([y[:, c * H:(c + 1) * H] for c in range(C)], axis=0)

    def attention(qkv3):
        # qkv3: (G, n, 3H); softmax attention over n within each of the G slabs.
        q = qkv3[:, :, 0:H]
        k = qkv3[:, :, H:2 * H]
        v = qkv3[:, :, 2 * H:3 * H]
        s = jnp.einsum("gnh,gmh->gnm", q, k,
                       preferred_element_type=jnp.float32) * scale
        s = s - jnp.max(s, axis=-1, keepdims=True)
        p = jnp.exp(s)
        p = p * pl.reciprocal(jnp.sum(p, axis=-1, keepdims=True), approx=True)
        return jnp.einsum("gnm,gmh->gnh", p, v,
                          preferred_element_type=jnp.float32)

    def encoder_tail(x2, attn2, l, s):
        # out-proj + ReLU, residual + LN, FFN, residual + LN -- all slabs batched 2-D.
        o = jnp.dot(attn2, wo_ref[l, s], preferred_element_type=jnp.float32)
        o = jnp.maximum(o + bo_ref[l, s], 0.0)
        ln = ln_ref[l, s]
        src = _layernorm(x2 + o, ln[0:1], ln[1:2])
        ff = jnp.dot(src, wf1_ref[l, s], preferred_element_type=jnp.float32)
        ff = jnp.maximum(ff + bf1_ref[l, s], 0.0)
        ff = jnp.dot(ff, wf2_ref[l, s], preferred_element_type=jnp.float32) + bf2_ref[l, s]
        return _layernorm(src + ff, ln[2:3], ln[3:4])

    for l in range(NUM_LAYERS):
        # encoder stack 1: attention over time, per class (slabs = classes)
        qkv1 = jnp.dot(feats, wqkv_ref[l, 0],
                       preferred_element_type=jnp.float32) + bqkv_ref[l, 0]
        a1 = attention(qkv1.reshape(C, T, 3 * H)).reshape(C * T, H)
        o1 = encoder_tail(feats, a1, l, 0)

        # encoder stack 2: attention over classes, per time step (slabs = times)
        qkv2 = jnp.dot(feats, wqkv_ref[l, 1],
                       preferred_element_type=jnp.float32) + bqkv_ref[l, 1]
        a2 = attention(_swap01(qkv2.reshape(C, T, 3 * H)))        # (T, C, H)
        a2 = _swap01(a2).reshape(C * T, H)                        # back to (c, t) order
        o2 = encoder_tail(feats, a2, l, 1)

        a = 1.0 / (1.0 + jnp.exp(-alpha_ref[l:l + 1]))            # sigmoid, (1, 1)
        feats = a * o1 + (1.0 - a) * o2

    # ---- per-class Linear(H, 1) classifiers + max over time ---------------------
    f3 = feats.reshape(C, T, H)
    logits = jnp.sum(f3 * clsw_ref[...][:, None, :], axis=-1) + clsb_ref[...]   # (C, T)
    out_ref[0] = jnp.max(logits, axis=-1, keepdims=True).astype(out_ref.dtype)  # (C, 1)


# ============================ wrapper ============================

def _pack_encoder_params(params):
    L = NUM_LAYERS

    def per(fn):
        return jnp.stack([jnp.stack([fn(i, st) for st in (1, 2)]) for i in range(L)])

    wqkv = per(lambda i, st: jnp.concatenate(
        [params[f"enc{st}_w"][i][j] for j in range(3)], axis=1))             # (L,2,H,3H)
    wo = per(lambda i, st: params[f"enc{st}_w"][i][3])                       # (L,2,H,H)
    wf1 = per(lambda i, st: params[f"enc{st}_w"][i][4])
    wf2 = per(lambda i, st: params[f"enc{st}_w"][i][5])
    bqkv = per(lambda i, st: jnp.concatenate(
        [params[f"enc{st}_b"][i][j] for j in range(3)])[None, :])            # (L,2,1,3H)
    bo = per(lambda i, st: params[f"enc{st}_b"][i][3][None, :])
    bf1 = per(lambda i, st: params[f"enc{st}_b"][i][4][None, :])
    bf2 = per(lambda i, st: params[f"enc{st}_b"][i][5][None, :])
    ln = per(lambda i, st: params[f"enc{st}_ln"][i])                         # (L,2,4,H)
    return wqkv, wo, wf1, wf2, bqkv, bo, bf1, bf2, ln


def video_transformer_forward(features, params):
    nt, chw = features.shape
    Fd, T, C, H, L = NUM_FEATURES, NUM_SEGMENTS, NUM_CLASSES, HIDDEN_DIM, NUM_LAYERS
    S2 = chw // Fd
    B = nt // T

    x4 = features.reshape(B, T, Fd, S2)

    # one-time repack of the weights into the fused-kernel layout (tiny XLA ops)
    fe_w2 = jnp.transpose(params["fe_w"], (1, 0, 2)).reshape(Fd, C * H)      # (F, C*H)
    fe_b2 = params["fe_b"].reshape(1, C * H)
    wqkv, wo, wf1, wf2, bqkv, bo, bf1, bf2, ln = _pack_encoder_params(params)
    alpha = params["alpha"].reshape(L, 1)
    cls_b = params["cls_b"].reshape(C, 1)

    const2 = lambda b: (0, 0)
    const4 = lambda b: (0, 0, 0, 0)

    out = pl.pallas_call(
        _fused_forward_kernel,
        out_shape=jax.ShapeDtypeStruct((B, C, 1), jnp.float32),
        grid=(B,),
        in_specs=[
            pl.BlockSpec((1, T, Fd, S2), lambda b: (b, 0, 0, 0)),   # conv features (per batch)
            pl.BlockSpec((T, Fd), const2),                          # positional encoding
            pl.BlockSpec((Fd, C * H), const2),                      # fused feature-expand W
            pl.BlockSpec((1, C * H), const2),                       # fused feature-expand b
            pl.BlockSpec((L, 2, H, 3 * H), const4),                 # fused QKV weights
            pl.BlockSpec((L, 2, H, H), const4),                     # attention out-proj W
            pl.BlockSpec((L, 2, H, H), const4),                     # FFN W1
            pl.BlockSpec((L, 2, H, H), const4),                     # FFN W2
            pl.BlockSpec((L, 2, 1, 3 * H), const4),                 # fused QKV bias
            pl.BlockSpec((L, 2, 1, H), const4),                     # out-proj bias
            pl.BlockSpec((L, 2, 1, H), const4),                     # FFN b1
            pl.BlockSpec((L, 2, 1, H), const4),                     # FFN b2
            pl.BlockSpec((L, 2, 4, H), const4),                     # layernorm gamma/beta
            pl.BlockSpec((L, 1), const2),                           # alpha logits
            pl.BlockSpec((C, H), const2),                           # classifier W
            pl.BlockSpec((C, 1), const2),                           # classifier b
        ],
        out_specs=pl.BlockSpec((1, C, 1), lambda b: (b, 0, 0)),
        compiler_params=pltpu.CompilerParams(dimension_semantics=("parallel",)),
    )(x4, params["pe"], fe_w2, fe_b2, wqkv, wo, wf1, wf2,
      bqkv, bo, bf1, bf2, ln, alpha, params["cls_w"], cls_b)

    return out.reshape(B, C)


# ============================ parameters (deterministic) ============================

def init_params(key):
    f, h, c, t, nl = NUM_FEATURES, HIDDEN_DIM, NUM_CLASSES, NUM_SEGMENTS, NUM_LAYERS
    keys = iter(jax.random.split(key, 128))

    def lin(k, fan_in, shape):
        return jax.random.normal(k, shape, jnp.float32) / np.sqrt(fan_in)

    params = {}
    # sinusoidal positional encoding (max_len = num_clips, d_model = feature_dim)
    pos = np.arange(t, dtype=np.float32)[:, None]
    div = np.exp(np.arange(0, f, 2, dtype=np.float32) * (-math.log(10000.0) / f))
    pe = np.zeros((t, f), np.float32)
    pe[:, 0::2] = np.sin(pos * div)
    pe[:, 1::2] = np.cos(pos * div)
    params["pe"] = jnp.asarray(pe)

    params["fe_w"] = lin(next(keys), f, (c, f, h))
    params["fe_b"] = lin(next(keys), f, (c, 1, h))

    def enc_params():
        w = jnp.stack([lin(next(keys), h, (h, h)) for _ in range(6)])  # q,k,v,out,ff1,ff2
        bias = jnp.stack([lin(next(keys), h, (h,)) for _ in range(6)])
        ln = jnp.concatenate([jnp.ones((1, h)), jnp.zeros((1, h)),
                              jnp.ones((1, h)), jnp.zeros((1, h))], axis=0)
        return w.astype(jnp.float32), bias.astype(jnp.float32), ln.astype(jnp.float32)

    for name in ("enc1", "enc2"):
        params[name + "_w"], params[name + "_b"], params[name + "_ln"] = [], [], []
    for _ in range(nl):
        for name in ("enc1", "enc2"):
            w, bias, ln = enc_params()
            params[name + "_w"].append(w)
            params[name + "_b"].append(bias)
            params[name + "_ln"].append(ln)

    params["cls_w"] = lin(next(keys), h, (c, h))
    params["cls_b"] = lin(next(keys), h, (1, c))
    params["alpha"] = jnp.zeros((nl,), jnp.float32)
    return params


# ============================ pure-JAX reference ============================

def _ref_encoder_layer(x, w, bias, ln):
    # x: (bs, n, cc, H); attention over n (per cc), identical to the PyTorch layer.
    h = x.shape[-1]
    q = (x @ w[0] + bias[0]).transpose(0, 2, 1, 3)
    k = (x @ w[1] + bias[1]).transpose(0, 2, 1, 3)
    v = (x @ w[2] + bias[2]).transpose(0, 2, 1, 3)
    s = jnp.einsum("bcnh,bcmh->bcnm", q, k) / math.sqrt(h)
    p = jax.nn.softmax(s, axis=-1)
    attn = jnp.einsum("bcnm,bcmh->bcnh", p, v)
    o = jax.nn.relu(attn @ w[3] + bias[3]).transpose(0, 2, 1, 3)

    def ln_fn(tt, g, b):
        m = tt.mean(-1, keepdims=True)
        var = ((tt - m) ** 2).mean(-1, keepdims=True)
        return (tt - m) / jnp.sqrt(var + 1e-5) * g + b

    src = ln_fn(x + o, ln[0], ln[1])
    ff = jax.nn.relu(src @ w[4] + bias[4]) @ w[5] + bias[5]
    return ln_fn(src + ff, ln[2], ln[3])


def reference_forward(features, params):
    nt, chw = features.shape
    f, t, c, h_dim = NUM_FEATURES, NUM_SEGMENTS, NUM_CLASSES, HIDDEN_DIM
    hh = int(round(math.sqrt(chw / f)))
    pooled = features.reshape(nt, f, hh * hh).mean(-1)
    b = nt // t
    x = pooled.reshape(b, t, f) + params["pe"][None]
    feats = jnp.stack(
        [jax.nn.relu(x @ params["fe_w"][i] + params["fe_b"][i, 0]) for i in range(c)],
        axis=0).transpose(1, 2, 0, 3)                                   # (B, T, C, H)
    for i in range(NUM_LAYERS):
        o1 = _ref_encoder_layer(feats, params["enc1_w"][i], params["enc1_b"][i],
                                params["enc1_ln"][i])
        o2 = _ref_encoder_layer(feats.transpose(0, 2, 1, 3), params["enc2_w"][i],
                                params["enc2_b"][i],
                                params["enc2_ln"][i]).transpose(0, 2, 1, 3)
        a = jax.nn.sigmoid(params["alpha"][i])
        feats = a * o1 + (1.0 - a) * o2
    logits = jnp.einsum("btch,ch->btc", feats, params["cls_w"]) + params["cls_b"][0]
    return logits.max(axis=1)


# ============================ main ============================

if __name__ == "__main__":
    key = jax.random.PRNGKey(0)
    pkey, xkey = jax.random.split(key)
    params = init_params(pkey)

    nt = BATCH * NUM_SEGMENTS
    chw = NUM_FEATURES * SPATIAL * SPATIAL
    features = jax.random.normal(xkey, (nt, chw), jnp.float32)

    out = jax.block_until_ready(video_transformer_forward(features, params))
    ref = jax.block_until_ready(reference_forward(features, params))

    assert out.shape == (BATCH, NUM_CLASSES), out.shape
    np.testing.assert_allclose(np.asarray(out), np.asarray(ref), rtol=5e-3, atol=5e-3)
    print("KERNEL_OK")
</pallas_src>

<mosaic_0001>
module attributes {stable_mosaic.version = 11 : i64} {
  func.func @_fused_forward_kernel(%arg0: i32, %arg1: memref<1x8x16x16xf32, #tpu.memory_space<vmem>>, %arg2: memref<8x16xf32, #tpu.memory_space<vmem>>, %arg3: memref<16x128xf32, #tpu.memory_space<vmem>>, %arg4: memref<1x128xf32, #tpu.memory_space<vmem>>, %arg5: memref<1x2x32x96xf32, #tpu.memory_space<vmem>>, %arg6: memref<1x2x32x32xf32, #tpu.memory_space<vmem>>, %arg7: memref<1x2x32x32xf32, #tpu.memory_space<vmem>>, %arg8: memref<1x2x32x32xf32, #tpu.memory_space<vmem>>, %arg9: memref<1x2x1x96xf32, #tpu.memory_space<vmem>>, %arg10: memref<1x2x1x32xf32, #tpu.memory_space<vmem>>, %arg11: memref<1x2x1x32xf32, #tpu.memory_space<vmem>>, %arg12: memref<1x2x1x32xf32, #tpu.memory_space<vmem>>, %arg13: memref<1x2x4x32xf32, #tpu.memory_space<vmem>>, %arg14: memref<1x1xf32, #tpu.memory_space<vmem>>, %arg15: memref<4x32xf32, #tpu.memory_space<vmem>>, %arg16: memref<4x1xf32, #tpu.memory_space<vmem>>, %arg17: memref<1x4x1xf32, #tpu.memory_space<vmem>>) attributes {dimension_semantics = [#tpu.dimension_semantics<parallel>], iteration_bounds = array<i64: 2>, scalar_prefetch = 0 : i64, scratch_operands = 0 : i64, tpu.core_type = #tpu.core_type<tc>, window_params = [{transform_indices = @transform_0, window_bounds = array<i64: 1, 8, 16, 16>}, {pipeline_mode = #tpu.pipeline_mode<synchronous>, transform_indices = @transform_1, window_bounds = array<i64: 8, 16>}, {pipeline_mode = #tpu.pipeline_mode<synchronous>, transform_indices = @transform_2, window_bounds = array<i64: 16, 128>}, {pipeline_mode = #tpu.pipeline_mode<synchronous>, transform_indices = @transform_3, window_bounds = array<i64: 1, 128>}, {pipeline_mode = #tpu.pipeline_mode<synchronous>, transform_indices = @transform_4, window_bounds = array<i64: 1, 2, 32, 96>}, {pipeline_mode = #tpu.pipeline_mode<synchronous>, transform_indices = @transform_5, window_bounds = array<i64: 1, 2, 32, 32>}, {pipeline_mode = #tpu.pipeline_mode<synchronous>, transform_indices = @transform_6, window_bounds = array<i64: 1, 2, 32, 32>}, {pipeline_mode = #tpu.pipeline_mode<synchronous>, transform_indices = @transform_7, window_bounds = array<i64: 1, 2, 32, 32>}, {pipeline_mode = #tpu.pipeline_mode<synchronous>, transform_indices = @transform_8, window_bounds = array<i64: 1, 2, 1, 96>}, {pipeline_mode = #tpu.pipeline_mode<synchronous>, transform_indices = @transform_9, window_bounds = array<i64: 1, 2, 1, 32>}, {pipeline_mode = #tpu.pipeline_mode<synchronous>, transform_indices = @transform_10, window_bounds = array<i64: 1, 2, 1, 32>}, {pipeline_mode = #tpu.pipeline_mode<synchronous>, transform_indices = @transform_11, window_bounds = array<i64: 1, 2, 1, 32>}, {pipeline_mode = #tpu.pipeline_mode<synchronous>, transform_indices = @transform_12, window_bounds = array<i64: 1, 2, 4, 32>}, {pipeline_mode = #tpu.pipeline_mode<synchronous>, transform_indices = @transform_13, window_bounds = array<i64: 1, 1>}, {pipeline_mode = #tpu.pipeline_mode<synchronous>, transform_indices = @transform_14, window_bounds = array<i64: 4, 32>}, {pipeline_mode = #tpu.pipeline_mode<synchronous>, transform_indices = @transform_15, window_bounds = array<i64: 4, 1>}, {transform_indices = @transform_16, window_bounds = array<i64: 1, 4, 1>}]} {
    %c0 = arith.constant 0 : index
    %c0_0 = arith.constant 0 : index
    %c0_1 = arith.constant 0 : index
    %c0_2 = arith.constant 0 : index
    %0 = vector.load %arg1[%c0, %c0_0, %c0_1, %c0_2] : memref<1x8x16x16xf32, #tpu.memory_space<vmem>>, vector<1x8x16x16xf32>
    %1 = vector.shape_cast %0 : vector<1x8x16x16xf32> to vector<8x16x16xf32>
    %cst = arith.constant dense<0.000000e+00> : vector<8x16xf32>
    %2 = vector.multi_reduction <add>, %1, %cst [2] : vector<8x16x16xf32> to vector<8x16xf32>
    %cst_3 = arith.constant 1.600000e+01 : f32
    %3 = vector.broadcast %cst_3 : f32 to vector<8x16xf32>
    %4 = arith.divf %2, %3 : vector<8x16xf32>
    %c0_4 = arith.constant 0 : index
    %c0_5 = arith.constant 0 : index
    %5 = vector.load %arg2[%c0_4, %c0_5] : memref<8x16xf32, #tpu.memory_space<vmem>>, vector<8x16xf32>
    %6 = arith.addf %4, %5 : vector<8x16xf32>
    %c0_6 = arith.constant 0 : index
    %c0_7 = arith.constant 0 : index
    %7 = vector.load %arg3[%c0_6, %c0_7] : memref<16x128xf32, #tpu.memory_space<vmem>>, vector<16x128xf32>
    %cst_8 = arith.constant dense<0.000000e+00> : vector<8x128xf32>
    %8 = tpu.matmul %6, %7, %cst_8 {dimension_numbers = #tpu.dot_dimension_numbers<[1], [0], [0], [1], [0, 0, 1, 1], [], []>, precision = #tpu.contract_precision<fp32>} : vector<8x16xf32>, vector<16x128xf32>, vector<8x128xf32> -> vector<8x128xf32>
    %c0_9 = arith.constant 0 : index
    %c0_10 = arith.constant 0 : index
    %9 = vector.load %arg4[%c0_9, %c0_10] : memref<1x128xf32, #tpu.memory_space<vmem>>, vector<1x128xf32>
    %10 = vector.broadcast %9 : vector<1x128xf32> to vector<8x128xf32>
    %11 = arith.addf %8, %10 : vector<8x128xf32>
    %cst_11 = arith.constant 0.000000e+00 : f32
    %12 = vector.broadcast %cst_11 : f32 to vector<8x128xf32>
    %13 = arith.maximumf %11, %12 : vector<8x128xf32>
    %14 = vector.extract_strided_slice %13 {offsets = [0, 0], sizes = [8, 32], strides = [1, 1]} : vector<8x128xf32> to vector<8x32xf32>
    %15 = vector.extract_strided_slice %13 {offsets = [0, 32], sizes = [8, 32], strides = [1, 1]} : vector<8x128xf32> to vector<8x32xf32>
    %16 = vector.extract_strided_slice %13 {offsets = [0, 64], sizes = [8, 32], strides = [1, 1]} : vector<8x128xf32> to vector<8x32xf32>
    %17 = vector.extract_strided_slice %13 {offsets = [0, 96], sizes = [8, 32], strides = [1, 1]} : vector<8x128xf32> to vector<8x32xf32>
    %18 = tpu.concatenate %14, %15, %16, %17 in 0 : vector<8x32xf32>, vector<8x32xf32>, vector<8x32xf32>, vector<8x32xf32> -> vector<32x32xf32>
    %c0_12 = arith.constant 0 : index
    %c0_13 = arith.constant 0 : index
    %c0_14 = arith.constant 0 : index
    %c0_15 = arith.constant 0 : index
    %19 = vector.load %arg5[%c0_12, %c0_13, %c0_14, %c0_15] : memref<1x2x32x96xf32, #tpu.memory_space<vmem>>, vector<1x1x32x96xf32>
    %20 = vector.shape_cast %19 : vector<1x1x32x96xf32> to vector<32x96xf32>
    %cst_16 = arith.constant dense<0.000000e+00> : vector<32x96xf32>
    %21 = tpu.matmul %18, %20, %cst_16 {dimension_numbers = #tpu.dot_dimension_numbers<[1], [0], [0], [1], [0, 0, 1, 1], [], []>, precision = #tpu.contract_precision<fp32>} : vector<32x32xf32>, vector<32x96xf32>, vector<32x96xf32> -> vector<32x96xf32>
    %c0_17 = arith.constant 0 : index
    %c0_18 = arith.constant 0 : index
    %c0_19 = arith.constant 0 : index
    %c0_20 = arith.constant 0 : index
    %22 = vector.load %arg9[%c0_17, %c0_18, %c0_19, %c0_20] : memref<1x2x1x96xf32, #tpu.memory_space<vmem>>, vector<1x1x1x96xf32>
    %23 = vector.shape_cast %22 : vector<1x1x1x96xf32> to vector<1x96xf32>
    %24 = vector.broadcast %23 : vector<1x96xf32> to vector<32x96xf32>
    %25 = arith.addf %21, %24 : vector<32x96xf32>
    %26 = vector.shape_cast %25 : vector<32x96xf32> to vector<4x8x96xf32>
    %27 = vector.extract_strided_slice %26 {offsets = [0, 0, 0], sizes = [4, 8, 32], strides = [1, 1, 1]} : vector<4x8x96xf32> to vector<4x8x32xf32>
    %28 = vector.extract_strided_slice %26 {offsets = [0, 0, 32], sizes = [4, 8, 32], strides = [1, 1, 1]} : vector<4x8x96xf32> to vector<4x8x32xf32>
    %29 = vector.extract_strided_slice %26 {offsets = [0, 0, 64], sizes = [4, 8, 32], strides = [1, 1, 1]} : vector<4x8x96xf32> to vector<4x8x32xf32>
    "tpu.trace_start"() <{level = 10 : i32, message = "gnh,gmh->gnm"}> : () -> ()
    %cst_21 = arith.constant dense<0.000000e+00> : vector<4x8x8xf32>
    %30 = tpu.matmul %27, %28, %cst_21 {dimension_numbers = #tpu.dot_dimension_numbers<[2], [2], [1], [1], [0, 0, 0, 1, 1, 1], [0], [0]>, precision = #tpu.contract_precision<fp32>} : vector<4x8x32xf32>, vector<4x8x32xf32>, vector<4x8x8xf32> -> vector<4x8x8xf32>
    "tpu.trace_stop"() : () -> ()
    %cst_22 = arith.constant 0.176776692 : f32
    %31 = vector.broadcast %cst_22 : f32 to vector<4x8x8xf32>
    %32 = arith.mulf %30, %31 : vector<4x8x8xf32>
    %cst_23 = arith.constant dense<0xFF800000> : vector<4x8xf32>
    %33 = vector.multi_reduction <maximumf>, %32, %cst_23 [2] : vector<4x8x8xf32> to vector<4x8xf32>
    %34 = vector.shape_cast %33 : vector<4x8xf32> to vector<4x8x1xf32>
    %35 = vector.broadcast %34 : vector<4x8x1xf32> to vector<4x8x8xf32>
    %36 = arith.subf %32, %35 : vector<4x8x8xf32>
    %37 = math.exp %36 : vector<4x8x8xf32>
    %cst_24 = arith.constant dense<0.000000e+00> : vector<4x8xf32>
    %38 = vector.multi_reduction <add>, %37, %cst_24 [2] : vector<4x8x8xf32> to vector<4x8xf32>
    %39 = vector.shape_cast %38 : vector<4x8xf32> to vector<4x8x1xf32>
    %40 = tpu.reciprocal %39 {approx = true} : vector<4x8x1xf32> -> vector<4x8x1xf32>
    %41 = vector.broadcast %40 : vector<4x8x1xf32> to vector<4x8x8xf32>
    %42 = arith.mulf %37, %41 : vector<4x8x8xf32>
    "tpu.trace_start"() <{level = 10 : i32, message = "gnm,gmh->gnh"}> : () -> ()
    %cst_25 = arith.constant dense<0.000000e+00> : vector<4x8x32xf32>
    %43 = tpu.matmul %42, %29, %cst_25 {dimension_numbers = #tpu.dot_dimension_numbers<[2], [1], [1], [2], [0, 0, 0, 1, 1, 2], [0], [0]>, precision = #tpu.contract_precision<fp32>} : vector<4x8x8xf32>, vector<4x8x32xf32>, vector<4x8x32xf32> -> vector<4x8x32xf32>
    "tpu.trace_stop"() : () -> ()
    %44 = vector.shape_cast %43 : vector<4x8x32xf32> to vector<32x32xf32>
    %c0_26 = arith.constant 0 : index
    %c0_27 = arith.constant 0 : index
    %c0_28 = arith.constant 0 : index
    %c0_29 = arith.constant 0 : index
    %45 = vector.load %arg6[%c0_26, %c0_27, %c0_28, %c0_29] : memref<1x2x32x32xf32, #tpu.memory_space<vmem>>, vector<1x1x32x32xf32>
    %46 = vector.shape_cast %45 : vector<1x1x32x32xf32> to vector<32x32xf32>
    %cst_30 = arith.constant dense<0.000000e+00> : vector<32x32xf32>
    %47 = tpu.matmul %44, %46, %cst_30 {dimension_numbers = #tpu.dot_dimension_numbers<[1], [0], [0], [1], [0, 0, 1, 1], [], []>, precision = #tpu.contract_precision<fp32>} : vector<32x32xf32>, vector<32x32xf32>, vector<32x32xf32> -> vector<32x32xf32>
    %c0_31 = arith.constant 0 : index
    %c0_32 = arith.constant 0 : index
    %c0_33 = arith.constant 0 : index
    %c0_34 = arith.constant 0 : index
    %48 = vector.load %arg10[%c0_31, %c0_32, %c0_33, %c0_34] : memref<1x2x1x32xf32, #tpu.memory_space<vmem>>, vector<1x1x1x32xf32>
    %49 = vector.shape_cast %48 : vector<1x1x1x32xf32> to vector<1x32xf32>
    %50 = vector.broadcast %49 : vector<1x32xf32> to vector<32x32xf32>
    %51 = arith.addf %47, %50 : vector<32x32xf32>
    %cst_35 = arith.constant 0.000000e+00 : f32
    %52 = vector.broadcast %cst_35 : f32 to vector<32x32xf32>
    %53 = arith.maximumf %51, %52 : vector<32x32xf32>
    %c0_36 = arith.constant 0 : index
    %c0_37 = arith.constant 0 : index
    %c0_38 = arith.constant 0 : index
    %c0_39 = arith.constant 0 : index
    %54 = vector.load %arg13[%c0_36, %c0_37, %c0_38, %c0_39] : memref<1x2x4x32xf32, #tpu.memory_space<vmem>>, vector<1x1x4x32xf32>
    %55 = vector.shape_cast %54 : vector<1x1x4x32xf32> to vector<4x32xf32>
    %56 = arith.addf %18, %53 : vector<32x32xf32>
    %57 = vector.extract_strided_slice %55 {offsets = [0, 0], sizes = [1, 32], strides = [1, 1]} : vector<4x32xf32> to vector<1x32xf32>
    %58 = vector.extract_strided_slice %55 {offsets = [1, 0], sizes = [1, 32], strides = [1, 1]} : vector<4x32xf32> to vector<1x32xf32>
    %cst_40 = arith.constant dense<0.000000e+00> : vector<32xf32>
    %59 = vector.multi_reduction <add>, %56, %cst_40 [1] : vector<32x32xf32> to vector<32xf32>
    %60 = vector.shape_cast %59 : vector<32xf32> to vector<32x1xf32>
    %cst_41 = arith.constant 3.200000e+01 : f32
    %61 = vector.broadcast %cst_41 : f32 to vector<32x1xf32>
    %62 = arith.divf %60, %61 : vector<32x1xf32>
    %63 = vector.broadcast %62 : vector<32x1xf32> to vector<32x32xf32>
    %64 = arith.subf %56, %63 : vector<32x32xf32>
    %65 = arith.mulf %64, %64 : vector<32x32xf32>
    %cst_42 = arith.constant dense<0.000000e+00> : vector<32xf32>
    %66 = vector.multi_reduction <add>, %65, %cst_42 [1] : vector<32x32xf32> to vector<32xf32>
    %67 = vector.shape_cast %66 : vector<32xf32> to vector<32x1xf32>
    %cst_43 = arith.constant 3.200000e+01 : f32
    %68 = vector.broadcast %cst_43 : f32 to vector<32x1xf32>
    %69 = arith.divf %67, %68 : vector<32x1xf32>
    %70 = vector.broadcast %62 : vector<32x1xf32> to vector<32x32xf32>
    %71 = arith.subf %56, %70 : vector<32x32xf32>
    %cst_44 = arith.constant 9.99999974E-6 : f32
    %72 = vector.broadcast %cst_44 : f32 to vector<32x1xf32>
    %73 = arith.addf %69, %72 : vector<32x1xf32>
    %74 = math.rsqrt %73 : vector<32x1xf32>
    %75 = vector.broadcast %74 : vector<32x1xf32> to vector<32x32xf32>
    %76 = arith.mulf %71, %75 : vector<32x32xf32>
    %77 = vector.broadcast %57 : vector<1x32xf32> to vector<32x32xf32>
    %78 = arith.mulf %76, %77 : vector<32x32xf32>
    %79 = vector.broadcast %58 : vector<1x32xf32> to vector<32x32xf32>
    %80 = arith.addf %78, %79 : vector<32x32xf32>
    %c0_45 = arith.constant 0 : index
    %c0_46 = arith.constant 0 : index
    %c0_47 = arith.constant 0 : index
    %c0_48 = arith.constant 0 : index
    %81 = vector.load %arg7[%c0_45, %c0_46, %c0_47, %c0_48] : memref<1x2x32x32xf32, #tpu.memory_space<vmem>>, vector<1x1x32x32xf32>
    %82 = vector.shape_cast %81 : vector<1x1x32x32xf32> to vector<32x32xf32>
    %cst_49 = arith.constant dense<0.000000e+00> : vector<32x32xf32>
    %83 = tpu.matmul %80, %82, %cst_49 {dimension_numbers = #tpu.dot_dimension_numbers<[1], [0], [0], [1], [0, 0, 1, 1], [], []>, precision = #tpu.contract_precision<fp32>} : vector<32x32xf32>, vector<32x32xf32>, vector<32x32xf32> -> vector<32x32xf32>
    %c0_50 = arith.constant 0 : index
    %c0_51 = arith.constant 0 : index
    %c0_52 = arith.constant 0 : index
    %c0_53 = arith.constant 0 : index
    %84 = vector.load %arg11[%c0_50, %c0_51, %c0_52, %c0_53] : memref<1x2x1x32xf32, #tpu.memory_space<vmem>>, vector<1x1x1x32xf32>
    %85 = vector.shape_cast %84 : vector<1x1x1x32xf32> to vector<1x32xf32>
    %86 = vector.broadcast %85 : vector<1x32xf32> to vector<32x32xf32>
    %87 = arith.addf %83, %86 : vector<32x32xf32>
    %cst_54 = arith.constant 0.000000e+00 : f32
    %88 = vector.broadcast %cst_54 : f32 to vector<32x32xf32>
    %89 = arith.maximumf %87, %88 : vector<32x32xf32>
    %c0_55 = arith.constant 0 : index
    %c0_56 = arith.constant 0 : index
    %c0_57 = arith.constant 0 : index
    %c0_58 = arith.constant 0 : index
    %90 = vector.load %arg8[%c0_55, %c0_56, %c0_57, %c0_58] : memref<1x2x32x32xf32, #tpu.memory_space<vmem>>, vector<1x1x32x32xf32>
    %91 = vector.shape_cast %90 : vector<1x1x32x32xf32> to vector<32x32xf32>
    %cst_59 = arith.constant dense<0.000000e+00> : vector<32x32xf32>
    %92 = tpu.matmul %89, %91, %cst_59 {dimension_numbers = #tpu.dot_dimension_numbers<[1], [0], [0], [1], [0, 0, 1, 1], [], []>, precision = #tpu.contract_precision<fp32>} : vector<32x32xf32>, vector<32x32xf32>, vector<32x32xf32> -> vector<32x32xf32>
    %c0_60 = arith.constant 0 : index
    %c0_61 = arith.constant 0 : index
    %c0_62 = arith.constant 0 : index
    %c0_63 = arith.constant 0 : index
    %93 = vector.load %arg12[%c0_60, %c0_61, %c0_62, %c0_63] : memref<1x2x1x32xf32, #tpu.memory_space<vmem>>, vector<1x1x1x32xf32>
    %94 = vector.shape_cast %93 : vector<1x1x1x32xf32> to vector<1x32xf32>
    %95 = vector.broadcast %94 : vector<1x32xf32> to vector<32x32xf32>
    %96 = arith.addf %92, %95 : vector<32x32xf32>
    %97 = arith.addf %80, %96 : vector<32x32xf32>
    %98 = vector.extract_strided_slice %55 {offsets = [2, 0], sizes = [1, 32], strides = [1, 1]} : vector<4x32xf32> to vector<1x32xf32>
    %99 = vector.extract_strided_slice %55 {offsets = [3, 0], sizes = [1, 32], strides = [1, 1]} : vector<4x32xf32> to vector<1x32xf32>
    %cst_64 = arith.constant dense<0.000000e+00> : vector<32xf32>
    %100 = vector.multi_reduction <add>, %97, %cst_64 [1] : vector<32x32xf32> to vector<32xf32>
    %101 = vector.shape_cast %100 : vector<32xf32> to vector<32x1xf32>
    %cst_65 = arith.constant 3.200000e+01 : f32
    %102 = vector.broadcast %cst_65 : f32 to vector<32x1xf32>
    %103 = arith.divf %101, %102 : vector<32x1xf32>
    %104 = vector.broadcast %103 : vector<32x1xf32> to vector<32x32xf32>
    %105 = arith.subf %97, %104 : vector<32x32xf32>
    %106 = arith.mulf %105, %105 : vector<32x32xf32>
    %cst_66 = arith.constant dense<0.000000e+00> : vector<32xf32>
    %107 = vector.multi_reduction <add>, %106, %cst_66 [1] : vector<32x32xf32> to vector<32xf32>
    %108 = vector.shape_cast %107 : vector<32xf32> to vector<32x1xf32>
    %cst_67 = arith.constant 3.200000e+01 : f32
    %109 = vector.broadcast %cst_67 : f32 to vector<32x1xf32>
    %110 = arith.divf %108, %109 : vector<32x1xf32>
    %111 = vector.broadcast %103 : vector<32x1xf32> to vector<32x32xf32>
    %112 = arith.subf %97, %111 : vector<32x32xf32>
    %cst_68 = arith.constant 9.99999974E-6 : f32
    %113 = vector.broadcast %cst_68 : f32 to vector<32x1xf32>
    %114 = arith.addf %110, %113 : vector<32x1xf32>
    %115 = math.rsqrt %114 : vector<32x1xf32>
    %116 = vector.broadcast %115 : vector<32x1xf32> to vector<32x32xf32>
    %117 = arith.mulf %112, %116 : vector<32x32xf32>
    %118 = vector.broadcast %98 : vector<1x32xf32> to vector<32x32xf32>
    %119 = arith.mulf %117, %118 : vector<32x32xf32>
    %120 = vector.broadcast %99 : vector<1x32xf32> to vector<32x32xf32>
    %121 = arith.addf %119, %120 : vector<32x32xf32>
    %c0_69 = arith.constant 0 : index
    %c1 = arith.constant 1 : index
    %c0_70 = arith.constant 0 : index
    %c0_71 = arith.constant 0 : index
    %122 = vector.load %arg5[%c0_69, %c1, %c0_70, %c0_71] : memref<1x2x32x96xf32, #tpu.memory_space<vmem>>, vector<1x1x32x96xf32>
    %123 = vector.shape_cast %122 : vector<1x1x32x96xf32> to vector<32x96xf32>
    %cst_72 = arith.constant dense<0.000000e+00> : vector<32x96xf32>
    %124 = tpu.matmul %18, %123, %cst_72 {dimension_numbers = #tpu.dot_dimension_numbers<[1], [0], [0], [1], [0, 0, 1, 1], [], []>, precision = #tpu.contract_precision<fp32>} : vector<32x32xf32>, vector<32x96xf32>, vector<32x96xf32> -> vector<32x96xf32>
    %c0_73 = arith.constant 0 : index
    %c1_74 = arith.constant 1 : index
    %c0_75 = arith.constant 0 : index
    %c0_76 = arith.constant 0 : index
    %125 = vector.load %arg9[%c0_73, %c1_74, %c0_75, %c0_76] : memref<1x2x1x96xf32, #tpu.memory_space<vmem>>, vector<1x1x1x96xf32>
    %126 = vector.shape_cast %125 : vector<1x1x1x96xf32> to vector<1x96xf32>
    %127 = vector.broadcast %126 : vector<1x96xf32> to vector<32x96xf32>
    %128 = arith.addf %124, %127 : vector<32x96xf32>
    %129 = vector.shape_cast %128 : vector<32x96xf32> to vector<4x8x96xf32>
    %130 = vector.extract_strided_slice %129 {offsets = [0, 0, 0], sizes = [4, 1, 96], strides = [1, 1, 1]} : vector<4x8x96xf32> to vector<4x1x96xf32>
    %131 = vector.shape_cast %130 : vector<4x1x96xf32> to vector<4x96xf32>
    %132 = vector.extract_strided_slice %129 {offsets = [0, 1, 0], sizes = [4, 1, 96], strides = [1, 1, 1]} : vector<4x8x96xf32> to vector<4x1x96xf32>
    %133 = vector.shape_cast %132 : vector<4x1x96xf32> to vector<4x96xf32>
    %134 = vector.extract_strided_slice %129 {offsets = [0, 2, 0], sizes = [4, 1, 96], strides = [1, 1, 1]} : vector<4x8x96xf32> to vector<4x1x96xf32>
    %135 = vector.shape_cast %134 : vector<4x1x96xf32> to vector<4x96xf32>
    %136 = vector.extract_strided_slice %129 {offsets = [0, 3, 0], sizes = [4, 1, 96], strides = [1, 1, 1]} : vector<4x8x96xf32> to vector<4x1x96xf32>
    %137 = vector.shape_cast %136 : vector<4x1x96xf32> to vector<4x96xf32>
    %138 = vector.extract_strided_slice %129 {offsets = [0, 4, 0], sizes = [4, 1, 96], strides = [1, 1, 1]} : vector<4x8x96xf32> to vector<4x1x96xf32>
    %139 = vector.shape_cast %138 : vector<4x1x96xf32> to vector<4x96xf32>
    %140 = vector.extract_strided_slice %129 {offsets = [0, 5, 0], sizes = [4, 1, 96], strides = [1, 1, 1]} : vector<4x8x96xf32> to vector<4x1x96xf32>
    %141 = vector.shape_cast %140 : vector<4x1x96xf32> to vector<4x96xf32>
    %142 = vector.extract_strided_slice %129 {offsets = [0, 6, 0], sizes = [4, 1, 96], strides = [1, 1, 1]} : vector<4x8x96xf32> to vector<4x1x96xf32>
    %143 = vector.shape_cast %142 : vector<4x1x96xf32> to vector<4x96xf32>
    %144 = vector.extract_strided_slice %129 {offsets = [0, 7, 0], sizes = [4, 1, 96], strides = [1, 1, 1]} : vector<4x8x96xf32> to vector<4x1x96xf32>
    %145 = vector.shape_cast %144 : vector<4x1x96xf32> to vector<4x96xf32>
    %146 = vector.shape_cast %131 : vector<4x96xf32> to vector<1x4x96xf32>
    %147 = vector.shape_cast %133 : vector<4x96xf32> to vector<1x4x96xf32>
    %148 = vector.shape_cast %135 : vector<4x96xf32> to vector<1x4x96xf32>
    %149 = vector.shape_cast %137 : vector<4x96xf32> to vector<1x4x96xf32>
    %150 = vector.shape_cast %139 : vector<4x96xf32> to vector<1x4x96xf32>
    %151 = vector.shape_cast %141 : vector<4x96xf32> to vector<1x4x96xf32>
    %152 = vector.shape_cast %143 : vector<4x96xf32> to vector<1x4x96xf32>
    %153 = vector.shape_cast %145 : vector<4x96xf32> to vector<1x4x96xf32>
    %154 = tpu.concatenate %146, %147, %148, %149, %150, %151, %152, %153 in 0 : vector<1x4x96xf32>, vector<1x4x96xf32>, vector<1x4x96xf32>, vector<1x4x96xf32>, vector<1x4x96xf32>, vector<1x4x96xf32>, vector<1x4x96xf32>, vector<1x4x96xf32> -> vector<8x4x96xf32>
    %155 = vector.extract_strided_slice %154 {offsets = [0, 0, 0], sizes = [8, 4, 32], strides = [1, 1, 1]} : vector<8x4x96xf32> to vector<8x4x32xf32>
    %156 = vector.extract_strided_slice %154 {offsets = [0, 0, 32], sizes = [8, 4, 32], strides = [1, 1, 1]} : vector<8x4x96xf32> to vector<8x4x32xf32>
    %157 = vector.extract_strided_slice %154 {offsets = [0, 0, 64], sizes = [8, 4, 32], strides = [1, 1, 1]} : vector<8x4x96xf32> to vector<8x4x32xf32>
    "tpu.trace_start"() <{level = 10 : i32, message = "gnh,gmh->gnm"}> : () -> ()
    %cst_77 = arith.constant dense<0.000000e+00> : vector<8x4x4xf32>
    %158 = tpu.matmul %155, %156, %cst_77 {dimension_numbers = #tpu.dot_dimension_numbers<[2], [2], [1], [1], [0, 0, 0, 1, 1, 1], [0], [0]>, precision = #tpu.contract_precision<fp32>} : vector<8x4x32xf32>, vector<8x4x32xf32>, vector<8x4x4xf32> -> vector<8x4x4xf32>
    "tpu.trace_stop"() : () -> ()
    %cst_78 = arith.constant 0.176776692 : f32
    %159 = vector.broadcast %cst_78 : f32 to vector<8x4x4xf32>
    %160 = arith.mulf %158, %159 : vector<8x4x4xf32>
    %cst_79 = arith.constant dense<0xFF800000> : vector<8x4xf32>
    %161 = vector.multi_reduction <maximumf>, %160, %cst_79 [2] : vector<8x4x4xf32> to vector<8x4xf32>
    %162 = vector.shape_cast %161 : vector<8x4xf32> to vector<8x4x1xf32>
    %163 = vector.broadcast %162 : vector<8x4x1xf32> to vector<8x4x4xf32>
    %164 = arith.subf %160, %163 : vector<8x4x4xf32>
    %165 = math.exp %164 : vector<8x4x4xf32>
    %cst_80 = arith.constant dense<0.000000e+00> : vector<8x4xf32>
    %166 = vector.multi_reduction <add>, %165, %cst_80 [2] : vector<8x4x4xf32> to vector<8x4xf32>
    %167 = vector.shape_cast %166 : vector<8x4xf32> to vector<8x4x1xf32>
    %168 = tpu.reciprocal %167 {approx = true} : vector<8x4x1xf32> -> vector<8x4x1xf32>
    %169 = vector.broadcast %168 : vector<8x4x1xf32> to vector<8x4x4xf32>
    %170 = arith.mulf %165, %169 : vector<8x4x4xf32>
    "tpu.trace_start"() <{level = 10 : i32, message = "gnm,gmh->gnh"}> : () -> ()
    %cst_81 = arith.constant dense<0.000000e+00> : vector<8x4x32xf32>
    %171 = tpu.matmul %170, %157, %cst_81 {dimension_numbers = #tpu.dot_dimension_numbers<[2], [1], [1], [2], [0, 0, 0, 1, 1, 2], [0], [0]>, precision = #tpu.contract_precision<fp32>} : vector<8x4x4xf32>, vector<8x4x32xf32>, vector<8x4x32xf32> -> vector<8x4x32xf32>
    "tpu.trace_stop"() : () -> ()
    %172 = vector.extract_strided_slice %171 {offsets = [0, 0, 0], sizes = [8, 1, 32], strides = [1, 1, 1]} : vector<8x4x32xf32> to vector<8x1x32xf32>
    %173 = vector.shape_cast %172 : vector<8x1x32xf32> to vector<8x32xf32>
    %174 = vector.extract_strided_slice %171 {offsets = [0, 1, 0], sizes = [8, 1, 32], strides = [1, 1, 1]} : vector<8x4x32xf32> to vector<8x1x32xf32>
    %175 = vector.shape_cast %174 : vector<8x1x32xf32> to vector<8x32xf32>
    %176 = vector.extract_strided_slice %171 {offsets = [0, 2, 0], sizes = [8, 1, 32], strides = [1, 1, 1]} : vector<8x4x32xf32> to vector<8x1x32xf32>
    %177 = vector.shape_cast %176 : vector<8x1x32xf32> to vector<8x32xf32>
    %178 = vector.extract_strided_slice %171 {offsets = [0, 3, 0], sizes = [8, 1, 32], strides = [1, 1, 1]} : vector<8x4x32xf32> to vector<8x1x32xf32>
    %179 = vector.shape_cast %178 : vector<8x1x32xf32> to vector<8x32xf32>
    %180 = vector.shape_cast %173 : vector<8x32xf32> to vector<1x8x32xf32>
    %181 = vector.shape_cast %175 : vector<8x32xf32> to vector<1x8x32xf32>
    %182 = vector.shape_cast %177 : vector<8x32xf32> to vector<1x8x32xf32>
    %183 = vector.shape_cast %179 : vector<8x32xf32> to vector<1x8x32xf32>
    %184 = tpu.concatenate %180, %181, %182, %183 in 0 : vector<1x8x32xf32>, vector<1x8x32xf32>, vector<1x8x32xf32>, vector<1x8x32xf32> -> vector<4x8x32xf32>
    %185 = vector.shape_cast %184 : vector<4x8x32xf32> to vector<32x32xf32>
    %c0_82 = arith.constant 0 : index
    %c1_83 = arith.constant 1 : index
    %c0_84 = arith.constant 0 : index
    %c0_85 = arith.constant 0 : index
    %186 = vector.load %arg6[%c0_82, %c1_83, %c0_84, %c0_85] : memref<1x2x32x32xf32, #tpu.memory_space<vmem>>, vector<1x1x32x32xf32>
    %187 = vector.shape_cast %186 : vector<1x1x32x32xf32> to vector<32x32xf32>
    %cst_86 = arith.constant dense<0.000000e+00> : vector<32x32xf32>
    %188 = tpu.matmul %185, %187, %cst_86 {dimension_numbers = #tpu.dot_dimension_numbers<[1], [0], [0], [1], [0, 0, 1, 1], [], []>, precision = #tpu.contract_precision<fp32>} : vector<32x32xf32>, vector<32x32xf32>, vector<32x32xf32> -> vector<32x32xf32>
    %c0_87 = arith.constant 0 : index
    %c1_88 = arith.constant 1 : index
    %c0_89 = arith.constant 0 : index
    %c0_90 = arith.constant 0 : index
    %189 = vector.load %arg10[%c0_87, %c1_88, %c0_89, %c0_90] : memref<1x2x1x32xf32, #tpu.memory_space<vmem>>, vector<1x1x1x32xf32>
    %190 = vector.shape_cast %189 : vector<1x1x1x32xf32> to vector<1x32xf32>
    %191 = vector.broadcast %190 : vector<1x32xf32> to vector<32x32xf32>
    %192 = arith.addf %188, %191 : vector<32x32xf32>
    %cst_91 = arith.constant 0.000000e+00 : f32
    %193 = vector.broadcast %cst_91 : f32 to vector<32x32xf32>
    %194 = arith.maximumf %192, %193 : vector<32x32xf32>
    %c0_92 = arith.constant 0 : index
    %c1_93 = arith.constant 1 : index
    %c0_94 = arith.constant 0 : index
    %c0_95 = arith.constant 0 : index
    %195 = vector.load %arg13[%c0_92, %c1_93, %c0_94, %c0_95] : memref<1x2x4x32xf32, #tpu.memory_space<vmem>>, vector<1x1x4x32xf32>
    %196 = vector.shape_cast %195 : vector<1x1x4x32xf32> to vector<4x32xf32>
    %197 = arith.addf %18, %194 : vector<32x32xf32>
    %198 = vector.extract_strided_slice %196 {offsets = [0, 0], sizes = [1, 32], strides = [1, 1]} : vector<4x32xf32> to vector<1x32xf32>
    %199 = vector.extract_strided_slice %196 {offsets = [1, 0], sizes = [1, 32], strides = [1, 1]} : vector<4x32xf32> to vector<1x32xf32>
    %cst_96 = arith.constant dense<0.000000e+00> : vector<32xf32>
    %200 = vector.multi_reduction <add>, %197, %cst_96 [1] : vector<32x32xf32> to vector<32xf32>
    %201 = vector.shape_cast %200 : vector<32xf32> to vector<32x1xf32>
    %cst_97 = arith.constant 3.200000e+01 : f32
    %202 = vector.broadcast %cst_97 : f32 to vector<32x1xf32>
    %203 = arith.divf %201, %202 : vector<32x1xf32>
    %204 = vector.broadcast %203 : vector<32x1xf32> to vector<32x32xf32>
    %205 = arith.subf %197, %204 : vector<32x32xf32>
    %206 = arith.mulf %205, %205 : vector<32x32xf32>
    %cst_98 = arith.constant dense<0.000000e+00> : vector<32xf32>
    %207 = vector.multi_reduction <add>, %206, %cst_98 [1] : vector<32x32xf32> to vector<32xf32>
    %208 = vector.shape_cast %207 : vector<32xf32> to vector<32x1xf32>
    %cst_99 = arith.constant 3.200000e+01 : f32
    %209 = vector.broadcast %cst_99 : f32 to vector<32x1xf32>
    %210 = arith.divf %208, %209 : vector<32x1xf32>
    %211 = vector.broadcast %203 : vector<32x1xf32> to vector<32x32xf32>
    %212 = arith.subf %197, %211 : vector<32x32xf32>
    %cst_100 = arith.constant 9.99999974E-6 : f32
    %213 = vector.broadcast %cst_100 : f32 to vector<32x1xf32>
    %214 = arith.addf %210, %213 : vector<32x1xf32>
    %215 = math.rsqrt %214 : vector<32x1xf32>
    %216 = vector.broadcast %215 : vector<32x1xf32> to vector<32x32xf32>
    %217 = arith.mulf %212, %216 : vector<32x32xf32>
    %218 = vector.broadcast %198 : vector<1x32xf32> to vector<32x32xf32>
    %219 = arith.mulf %217, %218 : vector<32x32xf32>
    %220 = vector.broadcast %199 : vector<1x32xf32> to vector<32x32xf32>
    %221 = arith.addf %219, %220 : vector<32x32xf32>
    %c0_101 = arith.constant 0 : index
    %c1_102 = arith.constant 1 : index
    %c0_103 = arith.constant 0 : index
    %c0_104 = arith.constant 0 : index
    %222 = vector.load %arg7[%c0_101, %c1_102, %c0_103, %c0_104] : memref<1x2x32x32xf32, #tpu.memory_space<vmem>>, vector<1x1x32x32xf32>
    %223 = vector.shape_cast %222 : vector<1x1x32x32xf32> to vector<32x32xf32>
    %cst_105 = arith.constant dense<0.000000e+00> : vector<32x32xf32>
    %224 = tpu.matmul %221, %223, %cst_105 {dimension_numbers = #tpu.dot_dimension_numbers<[1], [0], [0], [1], [0, 0, 1, 1], [], []>, precision = #tpu.contract_precision<fp32>} : vector<32x32xf32>, vector<32x32xf32>, vector<32x32xf32> -> vector<32x32xf32>
    %c0_106 = arith.constant 0 : index
    %c1_107 = arith.constant 1 : index
    %c0_108 = arith.constant 0 : index
    %c0_109 = arith.constant 0 : index
    %225 = vector.load %arg11[%c0_106, %c1_107, %c0_108, %c0_109] : memref<1x2x1x32xf32, #tpu.memory_space<vmem>>, vector<1x1x1x32xf32>
    %226 = vector.shape_cast %225 : vector<1x1x1x32xf32> to vector<1x32xf32>
    %227 = vector.broadcast %226 : vector<1x32xf32> to vector<32x32xf32>
    %228 = arith.addf %224, %227 : vector<32x32xf32>
    %cst_110 = arith.constant 0.000000e+00 : f32
    %229 = vector.broadcast %cst_110 : f32 to vector<32x32xf32>
    %230 = arith.maximumf %228, %229 : vector<32x32xf32>
    %c0_111 = arith.constant 0 : index
    %c1_112 = arith.constant 1 : index
    %c0_113 = arith.constant 0 : index
    %c0_114 = arith.constant 0 : index
    %231 = vector.load %arg8[%c0_111, %c1_112, %c0_113, %c0_114] : memref<1x2x32x32xf32, #tpu.memory_space<vmem>>, vector<1x1x32x32xf32>
    %232 = vector.shape_cast %231 : vector<1x1x32x32xf32> to vector<32x32xf32>
    %cst_115 = arith.constant dense<0.000000e+00> : vector<32x32xf32>
    %233 = tpu.matmul %230, %232, %cst_115 {dimension_numbers = #tpu.dot_dimension_numbers<[1], [0], [0], [1], [0, 0, 1, 1], [], []>, precision = #tpu.contract_precision<fp32>} : vector<32x32xf32>, vector<32x32xf32>, vector<32x32xf32> -> vector<32x32xf32>
    %c0_116 = arith.constant 0 : index
    %c1_117 = arith.constant 1 : index
    %c0_118 = arith.constant 0 : index
    %c0_119 = arith.constant 0 : index
    %234 = vector.load %arg12[%c0_116, %c1_117, %c0_118, %c0_119] : memref<1x2x1x32xf32, #tpu.memory_space<vmem>>, vector<1x1x1x32xf32>
    %235 = vector.shape_cast %234 : vector<1x1x1x32xf32> to vector<1x32xf32>
    %236 = vector.broadcast %235 : vector<1x32xf32> to vector<32x32xf32>
    %237 = arith.addf %233, %236 : vector<32x32xf32>
    %238 = arith.addf %221, %237 : vector<32x32xf32>
    %239 = vector.extract_strided_slice %196 {offsets = [2, 0], sizes = [1, 32], strides = [1, 1]} : vector<4x32xf32> to vector<1x32xf32>
    %240 = vector.extract_strided_slice %196 {offsets = [3, 0], sizes = [1, 32], strides = [1, 1]} : vector<4x32xf32> to vector<1x32xf32>
    %cst_120 = arith.constant dense<0.000000e+00> : vector<32xf32>
    %241 = vector.multi_reduction <add>, %238, %cst_120 [1] : vector<32x32xf32> to vector<32xf32>
    %242 = vector.shape_cast %241 : vector<32xf32> to vector<32x1xf32>
    %cst_121 = arith.constant 3.200000e+01 : f32
    %243 = vector.broadcast %cst_121 : f32 to vector<32x1xf32>
    %244 = arith.divf %242, %243 : vector<32x1xf32>
    %245 = vector.broadcast %244 : vector<32x1xf32> to vector<32x32xf32>
    %246 = arith.subf %238, %245 : vector<32x32xf32>
    %247 = arith.mulf %246, %246 : vector<32x32xf32>
    %cst_122 = arith.constant dense<0.000000e+00> : vector<32xf32>
    %248 = vector.multi_reduction <add>, %247, %cst_122 [1] : vector<32x32xf32> to vector<32xf32>
    %249 = vector.shape_cast %248 : vector<32xf32> to vector<32x1xf32>
    %cst_123 = arith.constant 3.200000e+01 : f32
    %250 = vector.broadcast %cst_123 : f32 to vector<32x1xf32>
    %251 = arith.divf %249, %250 : vector<32x1xf32>
    %252 = vector.broadcast %244 : vector<32x1xf32> to vector<32x32xf32>
    %253 = arith.subf %238, %252 : vector<32x32xf32>
    %cst_124 = arith.constant 9.99999974E-6 : f32
    %254 = vector.broadcast %cst_124 : f32 to vector<32x1xf32>
    %255 = arith.addf %251, %254 : vector<32x1xf32>
    %256 = math.rsqrt %255 : vector<32x1xf32>
    %257 = vector.broadcast %256 : vector<32x1xf32> to vector<32x32xf32>
    %258 = arith.mulf %253, %257 : vector<32x32xf32>
    %259 = vector.broadcast %239 : vector<1x32xf32> to vector<32x32xf32>
    %260 = arith.mulf %258, %259 : vector<32x32xf32>
    %261 = vector.broadcast %240 : vector<1x32xf32> to vector<32x32xf32>
    %262 = arith.addf %260, %261 : vector<32x32xf32>
    %c0_125 = arith.constant 0 : index
    %c0_126 = arith.constant 0 : index
    %263 = vector.load %arg14[%c0_125, %c0_126] : memref<1x1xf32, #tpu.memory_space<vmem>>, vector<1x1xf32>
    %cst_127 = arith.constant 0.000000e+00 : f32
    %264 = vector.broadcast %cst_127 : f32 to vector<1x1xf32>
    %265 = arith.subf %264, %263 : vector<1x1xf32>
    %266 = math.exp %265 : vector<1x1xf32>
    %cst_128 = arith.constant 1.000000e+00 : f32
    %267 = vector.broadcast %cst_128 : f32 to vector<1x1xf32>
    %268 = arith.addf %267, %266 : vector<1x1xf32>
    %cst_129 = arith.constant 1.000000e+00 : f32
    %269 = vector.broadcast %cst_129 : f32 to vector<1x1xf32>
    %270 = arith.divf %269, %268 : vector<1x1xf32>
    %271 = vector.broadcast %270 : vector<1x1xf32> to vector<32x32xf32>
    %272 = arith.mulf %271, %121 : vector<32x32xf32>
    %cst_130 = arith.constant 1.000000e+00 : f32
    %273 = vector.broadcast %cst_130 : f32 to vector<1x1xf32>
    %274 = arith.subf %273, %270 : vector<1x1xf32>
    %275 = vector.broadcast %274 : vector<1x1xf32> to vector<32x32xf32>
    %276 = arith.mulf %275, %262 : vector<32x32xf32>
    %277 = arith.addf %272, %276 : vector<32x32xf32>
    %278 = vector.shape_cast %277 : vector<32x32xf32> to vector<4x8x32xf32>
    %c0_131 = arith.constant 0 : index
    %c0_132 = arith.constant 0 : index
    %279 = vector.load %arg15[%c0_131, %c0_132] : memref<4x32xf32, #tpu.memory_space<vmem>>, vector<4x32xf32>
    %280 = vector.shape_cast %279 : vector<4x32xf32> to vector<4x1x32xf32>
    %281 = vector.broadcast %280 : vector<4x1x32xf32> to vector<4x8x32xf32>
    %282 = arith.mulf %278, %281 : vector<4x8x32xf32>
    %cst_133 = arith.constant dense<0.000000e+00> : vector<4x8xf32>
    %283 = vector.multi_reduction <add>, %282, %cst_133 [2] : vector<4x8x32xf32> to vector<4x8xf32>
    %c0_134 = arith.constant 0 : index
    %c0_135 = arith.constant 0 : index
    %284 = vector.load %arg16[%c0_134, %c0_135] : memref<4x1xf32, #tpu.memory_space<vmem>>, vector<4x1xf32>
    %285 = vector.broadcast %284 : vector<4x1xf32> to vector<4x8xf32>
    %286 = arith.addf %283, %285 : vector<4x8xf32>
    %cst_136 = arith.constant dense<0xFF800000> : vector<4xf32>
    %287 = vector.multi_reduction <maximumf>, %286, %cst_136 [1] : vector<4x8xf32> to vector<4xf32>
    %288 = vector.shape_cast %287 : vector<4xf32> to vector<4x1xf32>
    %c0_137 = arith.constant 0 : index
    %c0_138 = arith.constant 0 : index
    %c0_139 = arith.constant 0 : index
    %289 = vector.load %arg17[%c0_137, %c0_138, %c0_139] : memref<1x4x1xf32, #tpu.memory_space<vmem>>, vector<1x4x1xf32>
    %290 = vector.shape_cast %289 : vector<1x4x1xf32> to vector<4x1xf32>
    %291 = vector.shape_cast %288 : vector<4x1xf32> to vector<1x4x1xf32>
    tpu.vector_store %arg17[%c0_137, %c0_138, %c0_139], %291 {strides = array<i32>} : memref<1x4x1xf32, #tpu.memory_space<vmem>>, vector<1x4x1xf32>,
    return
  }
  func.func @transform_0(%arg0: i32) -> (i32, i32, i32, i32) {
    %c0_i32 = arith.constant 0 : i32
    %c0_i32_0 = arith.constant 0 : i32
    %c0_i32_1 = arith.constant 0 : i32
    %c0_i32_2 = arith.constant 0 : i32
    return %arg0, %c0_i32, %c0_i32_0, %c0_i32_1 : i32, i32, i32, i32
  }
  func.func @transform_1(%arg0: i32) -> (i32, i32) {
    %c0_i32 = arith.constant 0 : i32
    %c0_i32_0 = arith.constant 0 : i32
    %c0_i32_1 = arith.constant 0 : i32
    return %c0_i32, %c0_i32_0 : i32, i32
  }
  func.func @transform_2(%arg0: i32) -> (i32, i32) {
    %c0_i32 = arith.constant 0 : i32
    %c0_i32_0 = arith.constant 0 : i32
    %c0_i32_1 = arith.constant 0 : i32
    return %c0_i32, %c0_i32_0 : i32, i32
  }
  func.func @transform_3(%arg0: i32) -> (i32, i32) {
    %c0_i32 = arith.constant 0 : i32
    %c0_i32_0 = arith.constant 0 : i32
    %c0_i32_1 = arith.constant 0 : i32
    return %c0_i32, %c0_i32_0 : i32, i32
  }
  func.func @transform_4(%arg0: i32) -> (i32, i32, i32, i32) {
    %c0_i32 = arith.constant 0 : i32
    %c0_i32_0 = arith.constant 0 : i32
    %c0_i32_1 = arith.constant 0 : i32
    %c0_i32_2 = arith.constant 0 : i32
    %c0_i32_3 = arith.constant 0 : i32
    return %c0_i32, %c0_i32_0, %c0_i32_1, %c0_i32_2 : i32, i32, i32, i32
  }
  func.func @transform_5(%arg0: i32) -> (i32, i32, i32, i32) {
    %c0_i32 = arith.constant 0 : i32
    %c0_i32_0 = arith.constant 0 : i32
    %c0_i32_1 = arith.constant 0 : i32
    %c0_i32_2 = arith.constant 0 : i32
    %c0_i32_3 = arith.constant 0 : i32
    return %c0_i32, %c0_i32_0, %c0_i32_1, %c0_i32_2 : i32, i32, i32, i32
  }
  func.func @transform_6(%arg0: i32) -> (i32, i32, i32, i32) {
    %c0_i32 = arith.constant 0 : i32
    %c0_i32_0 = arith.constant 0 : i32
    %c0_i32_1 = arith.constant 0 : i32
    %c0_i32_2 = arith.constant 0 : i32
    %c0_i32_3 = arith.constant 0 : i32
    return %c0_i32, %c0_i32_0, %c0_i32_1, %c0_i32_2 : i32, i32, i32, i32
  }
  func.func @transform_7(%arg0: i32) -> (i32, i32, i32, i32) {
    %c0_i32 = arith.constant 0 : i32
    %c0_i32_0 = arith.constant 0 : i32
    %c0_i32_1 = arith.constant 0 : i32
    %c0_i32_2 = arith.constant 0 : i32
    %c0_i32_3 = arith.constant 0 : i32
    return %c0_i32, %c0_i32_0, %c0_i32_1, %c0_i32_2 : i32, i32, i32, i32
  }
  func.func @transform_8(%arg0: i32) -> (i32, i32, i32, i32) {
    %c0_i32 = arith.constant 0 : i32
    %c0_i32_0 = arith.constant 0 : i32
    %c0_i32_1 = arith.constant 0 : i32
    %c0_i32_2 = arith.constant 0 : i32
    %c0_i32_3 = arith.constant 0 : i32
    return %c0_i32, %c0_i32_0, %c0_i32_1, %c0_i32_2 : i32, i32, i32, i32
  }
  func.func @transform_9(%arg0: i32) -> (i32, i32, i32, i32) {
    %c0_i32 = arith.constant 0 : i32
    %c0_i32_0 = arith.constant 0 : i32
    %c0_i32_1 = arith.constant 0 : i32
    %c0_i32_2 = arith.constant 0 : i32
    %c0_i32_3 = arith.constant 0 : i32
    return %c0_i32, %c0_i32_0, %c0_i32_1, %c0_i32_2 : i32, i32, i32, i32
  }
  func.func @transform_10(%arg0: i32) -> (i32, i32, i32, i32) {
    %c0_i32 = arith.constant 0 : i32
    %c0_i32_0 = arith.constant 0 : i32
    %c0_i32_1 = arith.constant 0 : i32
    %c0_i32_2 = arith.constant 0 : i32
    %c0_i32_3 = arith.constant 0 : i32
    return %c0_i32, %c0_i32_0, %c0_i32_1, %c0_i32_2 : i32, i32, i32, i32
  }
  func.func @transform_11(%arg0: i32) -> (i32, i32, i32, i32) {
    %c0_i32 = arith.constant 0 : i32
    %c0_i32_0 = arith.constant 0 : i32
    %c0_i32_1 = arith.constant 0 : i32
    %c0_i32_2 = arith.constant 0 : i32
    %c0_i32_3 = arith.constant 0 : i32
    return %c0_i32, %c0_i32_0, %c0_i32_1, %c0_i32_2 : i32, i32, i32, i32
  }
  func.func @transform_12(%arg0: i32) -> (i32, i32, i32, i32) {
    %c0_i32 = arith.constant 0 : i32
    %c0_i32_0 = arith.constant 0 : i32
    %c0_i32_1 = arith.constant 0 : i32
    %c0_i32_2 = arith.constant 0 : i32
    %c0_i32_3 = arith.constant 0 : i32
    return %c0_i32, %c0_i32_0, %c0_i32_1, %c0_i32_2 : i32, i32, i32, i32
  }
  func.func @transform_13(%arg0: i32) -> (i32, i32) {
    %c0_i32 = arith.constant 0 : i32
    %c0_i32_0 = arith.constant 0 : i32
    %c0_i32_1 = arith.constant 0 : i32
    return %c0_i32, %c0_i32_0 : i32, i32
  }
  func.func @transform_14(%arg0: i32) -> (i32, i32) {
    %c0_i32 = arith.constant 0 : i32
    %c0_i32_0 = arith.constant 0 : i32
    %c0_i32_1 = arith.constant 0 : i32
    return %c0_i32, %c0_i32_0 : i32, i32
  }
  func.func @transform_15(%arg0: i32) -> (i32, i32) {
    %c0_i32 = arith.constant 0 : i32
    %c0_i32_0 = arith.constant 0 : i32
    %c0_i32_1 = arith.constant 0 : i32
    return %c0_i32, %c0_i32_0 : i32, i32
  }
  func.func @transform_16(%arg0: i32) -> (i32, i32, i32) {
    %c0_i32 = arith.constant 0 : i32
    %c0_i32_0 = arith.constant 0 : i32
    %c0_i32_1 = arith.constant 0 : i32
    return %arg0, %c0_i32, %c0_i32_0 : i32, i32, i32
  }
}

</mosaic_0001>

<bundles_post_ra>
// kernel: tpu_custom_call.1
= control target key start
LH: loop header
LB: loop body
LE: loop exit
PB: predicated region body
PF: predicated region fallthrough
CT: control target
= control target key end

     0   :  { %s23882_s0 = inlined_call_operand.hbm [shape: f32[2,8,16,16], index: 0, kind: input, shape index: {}]   ;;  %s23883_s1 = inlined_call_operand.hbm [shape: f32[8,16], index: 1, kind: input, shape index: {}]   ;;  %s23884_s2 = inlined_call_operand.vmem [shape: f32[16,128], index: 2, kind: input, shape index: {}]   ;;  %s23885_s3 = inlined_call_operand.vmem [shape: f32[1,128], index: 3, kind: input, shape index: {}]   ;;  %s23886_s4 = inlined_call_operand.hbm [shape: f32[1,2,32,96], index: 4, kind: input, shape index: {}]   ;;  %s23887_s5 = inlined_call_operand.hbm [shape: f32[1,2,32,32], index: 5, kind: input, shape index: {}]   ;;  %s23888_s6 = inlined_call_operand.hbm [shape: f32[1,2,32,32], index: 6, kind: input, shape index: {}]   ;;  %s23889_s7 = inlined_call_operand.hbm [shape: f32[1,2,32,32], index: 7, kind: input, shape index: {}]   ;;  %s23890_s8 = inlined_call_operand.vmem [shape: f32[1,2,1,96], index: 8, kind: input, shape index: {}]   ;;  %s23891_s9 = inlined_call_operand.vmem [shape: f32[1,2,1,32], index: 9, kind: input, shape index: {}]   ;;  %s23892_s10 = inlined_call_operand.vmem [shape: f32[1,2,1,32], index: 10, kind: input, shape index: {}]   ;;  %s23893_s11 = inlined_call_operand.vmem [shape: f32[1,2,1,32], index: 11, kind: input, shape index: {}]   ;;  %s23894_s12 = inlined_call_operand.vmem [shape: f32[1,2,4,32], index: 12, kind: input, shape index: {}]   ;;  %s23895_s13 = inlined_call_operand.<no memory space> [shape: f32[1,1], index: 13, kind: input, shape index: {}]   ;;  %s23896_s14 = inlined_call_operand.vmem [shape: f32[4,32], index: 14, kind: input, shape index: {}]   ;;  %s23897_s15 = inlined_call_operand.vmem [shape: f32[4,1], index: 15, kind: input, shape index: {}]   ;;  %s23898_s16 = inlined_call_operand.vmem [shape: f32[2,4,1], index: 16, kind: output, shape index: {}]  }
   0x1   :  { %23904 = sst [smem:[#allocation17_spill]] %s23882_s0  ;;  %v21_v0 = vstv %s23895_s13 }
   0x2   :  { %23905 = sst [smem:[#allocation18_spill]] %s23883_s1  ;;  %22 = vst [vmem:[#allocation2] sm:$0x1] %v21_v0 }
   0x3   :  { %23906 = sst [smem:[#allocation19_spill]] %s23887_s5 }
   0x4   :  { %23907 = sst [smem:[#allocation20_spill]] %s23892_s10 }
   0x5   :  { %23908 = sst [smem:[#allocation21_spill]] %s23893_s11 }
   0x6   :  { %23909 = sst [smem:[#allocation22_spill]] %s23896_s14 }
   0x7   :  { %23910 = sst [smem:[#allocation23_spill]] %s23897_s15 }
   0x8   :  { %23911 = sst [smem:[#allocation24_spill]] %s23898_s16 }
   0x9   :  { %23 = vsyncpa [#allocation4], 0 }
   0xa   :  { %25 = vsyncpa [#allocation4 + $0x1], 0 }
   0xb   :  { %26 = vsyncpa [#allocation6], 0 }
   0xc   :  { %27 = vsyncpa [#allocation9], 0 }
   0xd   :  { %28 = vsyncpa [#allocation12], 0  ;;  %s21855_s23 = smov 0   ;;  %s21857_s24 = smov 0  }
   0xe   :  { %s21859_s25 = smov 0   ;;  %s21861_s26 = smov 0  }
   0xf LB: > { %s21751_s13 = smov [#allocation5]   ;;  %s21876_s28 = sadd.s32 4294967295, %s21749_s26   ;;  %s21749_s26 = sphi %s21861_s26, %s23936_s26   ;;  %s21745_s25 = sphi %s21859_s25, %s23935_s25   ;;  %s21741_s24 = sphi %s21857_s24, %s23934_s24   ;;  %s21737_s23 = sphi %s21855_s23, %s23933_s23  }
  0x10   : > { %s419_s27 = sshll.u32 %s21751_s13, 4  ;;  %p18300_p0 = scmp.ge.s32.totalorder %s21749_s26, 1  ;;  %s420_s27 = int_to_ptr.vmem [resolvable:$true] %s419_s27 }
  0x11   : > { %p23900_p1 = scmp.eq.s32.totalorder %s21876_s28, 0  ;;  %p406_p2 = scmp.lt.s32.totalorder %s21749_s26, 3 }
  0x12   : > { %s21752_s30 = smov [#allocation8]   ;;  %s21753_s18 = smov [#allocation7]  }
  0x13   : > { %p21881_p3 = pnand %p18300_p0, %p406_p2  ;;  %s448_s0 = sshll.u32 %s21752_s30, 4  ;;  %s21893_s0 = int_to_ptr.vmem [resolvable:$true] %s448_s0 }
  0x14   : > { %s435_s19 = sshll.u32 %s21753_s18, 4  ;;  %s23914_s1 = sld [smem:[#allocation18_spill]]  ;;  %s21895_s19 = int_to_ptr.vmem [resolvable:$true] %s435_s19 }
  0x15   : > { %s23912_s29 = scalar_select %p21881_p3, 1, 0 }
  0x16   : > { %p21367_p4 = pneg %p21881_p3 }
  0x18   : > { %p21889_p5 = pnand %p21367_p4, %p23900_p1 }
  0x1a   : > { %s21533_s22 = scalar_lea.hbm %s23914_s1, 128  ;;  %p21905_p7 = pneg %p21889_p5 }
  0x1b   : > { %p21534_p6 = scmp.ne.s32.totalorder %s23914_s1, %s21533_s22  ;;  %p21540_p10 = scmp.lt.u32.totalorder %s21533_s22, %s23914_s1 }
  0x1d   : > { %p21536_p8 = pnand %p21905_p7, %p21534_p6 }
  0x1f   : > { %p21537_p9 = pneg %p21536_p8 }
  0x21   : > { %p21542_p11 = pnand %p21540_p10, %p21537_p9 }
  0x23   : > { %21545 = shalt.err (!%p21542_p11)
}
  0x24   : > { %s21546_s20 = scalar_lea.vmem %s420_s27, 128  ;;  %p21554_p2 = scmp.lt.s32.totalorder %s420_s27, %s420_s27 }
  0x25   : > { %p21547_p12 = scmp.ne.s32.totalorder %s420_s27, %s21546_s20  ;;  %p21555_p4 = scmp.lt.s32.totalorder %s21546_s20, %s21546_s20 }
  0x27   : > { %p21549_p13 = pnand %p21547_p12, %p21905_p7  ;;  %p21556_p1 = por %p21555_p4, %p21554_p2 }
  0x29   : > { %p21550_p0 = pneg %p21549_p13 }
  0x2b   : > { %p21557_p3 = pnand %p21556_p1, %p21550_p0 }
  0x2d   : > { %21560 = shalt.err (!%p21557_p3)
}
  0x2e   : > { %21370 = dma.hbm_to_vmem [thread:$0]  (!%p21889_p5), %s23914_s1, 128, %s420_s27, [#allocation6]  }
  0x2f   : > { %s23916_s5 = sld [smem:[#allocation19_spill]] }
  0x35   : > { %s21561_s13 = scalar_lea.hbm %s23916_s5, 1024 }
  0x36   : > { %p21562_p6 = scmp.ne.s32.totalorder %s23916_s5, %s21561_s13  ;;  %p21568_p1 = scmp.lt.u32.totalorder %s21561_s13, %s23916_s5 }
  0x38   : > { %p21564_p8 = pnand %p21562_p6, %p21905_p7 }
  0x3a   : > { %p21565_p9 = pneg %p21564_p8 }
  0x3c   : > { %p21570_p3 = pnand %p21568_p1, %p21565_p9 }
  0x3e   : > { %21573 = shalt.err (!%p21570_p3)
}
  0x3f   : > { %s21574_s27 = scalar_lea.vmem %s21893_s0, 1024  ;;  %p21582_p13 = scmp.lt.s32.totalorder %s21893_s0, %s21893_s0 }
  0x40   : > { %p21575_p10 = scmp.ne.s32.totalorder %s21893_s0, %s21574_s27  ;;  %p21583_p0 = scmp.lt.s32.totalorder %s21574_s27, %s21574_s27 }
  0x42   : > { %p21577_p11 = pnand %p21575_p10, %p21905_p7  ;;  %p21584_p2 = por %p21583_p0, %p21582_p13 }
  0x44   : > { %p21578_p12 = pneg %p21577_p11 }
  0x46   : > { %p21585_p4 = pnand %p21584_p2, %p21578_p12 }
  0x48   : > { %21588 = shalt.err (!%p21585_p4)
}
  0x49   : > { %s21754_s14 = smov 128   ;;  %s21755_s11 = smov 8  }
  0x4a   : > { %21376 = dma.hbm_to_vmem [thread:$0]  (!%p21889_p5), %s23916_s5, 1024, %s21893_s0, [#allocation9], %s21754_s14, %s21754_s14, %s21755_s11  }
  0x4b   : > { %s21589_s13 = scalar_lea.hbm %s23886_s4, 1024 }
  0x4c   : > { %p21590_p6 = scmp.ne.s32.totalorder %s23886_s4, %s21589_s13  ;;  %p21596_p1 = scmp.lt.u32.totalorder %s21589_s13, %s23886_s4 }
  0x4e   : > { %p21592_p8 = pnand %p21590_p6, %p21905_p7 }
  0x50   : > { %p21593_p9 = pneg %p21592_p8 }
  0x52   : > { %p21598_p3 = pnand %p21596_p1, %p21593_p9 }
  0x54   : > { %21601 = shalt.err (!%p21598_p3)
}
  0x55   : > { %s21602_s0 = scalar_lea.vmem %s21895_s19, 1024  ;;  %p21610_p13 = scmp.lt.s32.totalorder %s21895_s19, %s21895_s19 }
  0x56   : > { %p21603_p10 = scmp.ne.s32.totalorder %s21895_s19, %s21602_s0  ;;  %p21611_p0 = scmp.lt.s32.totalorder %s21602_s0, %s21602_s0 }
  0x58   : > { %p21605_p11 = pnand %p21603_p10, %p21905_p7  ;;  %p21612_p2 = por %p21611_p0, %p21610_p13 }
  0x5a   : > { %p21606_p12 = pneg %p21605_p11 }
  0x5c   : > { %p21613_p4 = pnand %p21612_p2, %p21606_p12 }
  0x5e   : > { %21616 = shalt.err (!%p21613_p4)
}
  0x5f   : > { %21373 = dma.hbm_to_vmem [thread:$0]  (!%p21889_p5), %s23886_s4, 1024, %s21895_s19, [#allocation6], %s21754_s14, %s21754_s14, %s21755_s11  }
  0x60   : > { %s21756_s21 = smov [#allocation10]   ;;  %s21757_s22 = smov [#allocation11]  }
  0x61   : > { %s461_s15 = sshll.u32 %s21756_s21, 4  ;;  %s474_s13 = sshll.u32 %s21757_s22, 4  ;;  %s462_s15 = int_to_ptr.vmem [resolvable:$true] %s461_s15  ;;  %s475_s13 = int_to_ptr.vmem [resolvable:$true] %s474_s13 }
  0x62   : > { %s21617_s27 = scalar_lea.hbm %s23888_s6, 1024 }
  0x63   : > { %p21618_p6 = scmp.ne.s32.totalorder %s23888_s6, %s21617_s27  ;;  %p21624_p1 = scmp.lt.u32.totalorder %s21617_s27, %s23888_s6 }
  0x65   : > { %p21620_p8 = pnand %p21618_p6, %p21905_p7 }
  0x67   : > { %p21621_p9 = pneg %p21620_p8 }
  0x69   : > { %p21626_p3 = pnand %p21624_p1, %p21621_p9 }
  0x6b   : > { %21629 = shalt.err (!%p21626_p3)
}
  0x6c   : > { %s21630_s19 = scalar_lea.vmem %s462_s15, 1024  ;;  %p21638_p13 = scmp.lt.s32.totalorder %s462_s15, %s462_s15 }
  0x6d   : > { %p21631_p10 = scmp.ne.s32.totalorder %s462_s15, %s21630_s19  ;;  %p21639_p0 = scmp.lt.s32.totalorder %s21630_s19, %s21630_s19 }
  0x6f   : > { %p21633_p11 = pnand %p21631_p10, %p21905_p7  ;;  %p21640_p2 = por %p21639_p0, %p21638_p13 }
  0x71   : > { %p21634_p12 = pneg %p21633_p11 }
  0x73   : > { %p21641_p4 = pnand %p21640_p2, %p21634_p12 }
  0x75   : > { %21644 = shalt.err (!%p21641_p4)
}
  0x76   : > { %21379 = dma.hbm_to_vmem [thread:$0]  (!%p21889_p5), %s23888_s6, 1024, %s462_s15, [#allocation9], %s21754_s14, %s21754_s14, %s21755_s11  }
  0x77   : > { %s21645_s22 = scalar_lea.hbm %s23889_s7, 1024 }
  0x78   : > { %p21646_p6 = scmp.ne.s32.totalorder %s23889_s7, %s21645_s22  ;;  %p21652_p1 = scmp.lt.u32.totalorder %s21645_s22, %s23889_s7 }
  0x7a   : > { %p21648_p8 = pnand %p21646_p6, %p21905_p7 }
  0x7c   : > { %p21649_p9 = pneg %p21648_p8 }
  0x7e   : > { %p21654_p3 = pnand %p21652_p1, %p21649_p9 }
  0x80   : > { %21657 = shalt.err (!%p21654_p3)
}
  0x81   : > { %s21658_s1 = scalar_lea.vmem %s475_s13, 1024  ;;  %p21666_p13 = scmp.lt.s32.totalorder %s475_s13, %s475_s13 }
  0x82   : > { %p21659_p10 = scmp.ne.s32.totalorder %s475_s13, %s21658_s1  ;;  %p21667_p0 = scmp.lt.s32.totalorder %s21658_s1, %s21658_s1 }
  0x84   : > { %p21661_p11 = pnand %p21659_p10, %p21905_p7  ;;  %p21668_p2 = por %p21667_p0, %p21666_p13 }
  0x86   : > { %p21662_p12 = pneg %p21661_p11 }
  0x88   : > { %p21669_p4 = pnand %p21668_p2, %p21662_p12 }
  0x8a   : > { %21672 = shalt.err (!%p21669_p4)
}
  0x8b   : > { %21382 = dma.hbm_to_vmem [thread:$0]  (!%p21889_p5), %s23889_s7, 1024, %s475_s13, [#allocation12], %s21754_s14, %s21754_s14, %s21755_s11  }
  0x8c   : > { %s22016_s17 = sadd.s32 1, %s21749_s26   ;;  %s41_s5 = sadd.s32 1, %s21745_s25 }
  0x8d   : > { %s38_s30 = ssub.s32 %s21749_s26, %s22016_s17  ;;  %p48_p6 = scmp.ne.s32.totalorder %s21745_s25, %s21741_s24 }
  0x8e   : > { %p39_p7 = scmp.eq.s32.totalorder %s38_s30, 0  ;;  %p49_p8 = scmp.eq.s32.totalorder %s21749_s26, 0 }
  0x8f   : > { %p54_p9 = scmp.ne.s32.totalorder %s21741_s24, %s21737_s23  ;;  %p23917_p3 = scmp.eq.s32.totalorder %s21876_s28, 0 }
  0x90   : > { %s22027_s10 = scalar_select %p39_p7, %s21745_s25, %s41_s5  }
  0x91   : > { %p50_p1 = por %p49_p8, %p48_p6  ;;  %p22031_p10 = por %p23917_p3, %p54_p9 }
  0x92   : > { %p21392_p11 = scmp.lt.s32.totalorder %s21749_s26, 2  ;;  %s512_s21 = sand.u32 1, %s21745_s25  }
  0x93   : > { %s18307_s13 = sshll.u32 %s512_s21, 7  ;;  %s18371_s22 = sshll.u32 %s21749_s26, 11 }
  0x94   : > { %s23919_s27 = sld [smem:[#allocation17_spill]]  ;;  %s516_s23 = scalar_lea.vmem [#allocation3], %s18307_s13 }
  0x95   : > { %s523_s1 = sshll.u32 %s516_s23, 4  ;;  %p22045_p5 = pnand %p21392_p11, %p50_p1  ;;  %s22043_s1 = int_to_ptr.vmem [resolvable:$true] %s523_s1 }
  0x96   : > { %s22049_s26 = scalar_lea.sflag [#allocation4], %s512_s21 }
  0x97   : > { %p21675_p13 = pneg %p22045_p5 }
  0x9a   : > { %s22041_s0 = scalar_lea.hbm %s23919_s27, %s18371_s22  ;;  %s21678_s13 = scalar_lea.hbm %s23919_s27, 4096 }
  0x9b   : > { %s21673_s19 = scalar_lea.hbm %s22041_s0, 2048  ;;  %p21679_p4 = scmp.lt.u32.totalorder %s22041_s0, %s23919_s27 }
  0x9c   : > { %p21674_p12 = scmp.ne.s32.totalorder %s22041_s0, %s21673_s19  ;;  %p21680_p7 = scmp.lt.u32.totalorder %s21678_s13, %s21673_s19 }
  0x9d   : > { %p21682_p8 = scmp.lt.u32.totalorder %s21673_s19, %s22041_s0 }
  0x9e   : > { %p21676_p0 = pnand %p21675_p13, %p21674_p12  ;;  %p21681_p6 = por %p21680_p7, %p21679_p4 }
  0xa0   : > { %p21677_p2 = pneg %p21676_p0  ;;  %p21683_p9 = por %p21682_p8, %p21681_p6 }
  0xa2   : > { %p21684_p1 = pnand %p21683_p9, %p21677_p2 }
  0xa4   : > { %21687 = shalt.err (!%p21684_p1)
}
  0xa5   : > { %s21688_s21 = scalar_lea.vmem %s22043_s1, 2048  ;;  %s21758_s20 = smov [#allocation3]  }
  0xa6   : > { %p21689_p3 = scmp.ne.s32.totalorder %s22043_s1, %s21688_s21  ;;  %s21693_s23 = sshll.u32 %s21758_s20, 4  ;;  %s21694_s23 = int_to_ptr.vmem [resolvable:$false] %s21693_s23 }
  0xa7   : > { %s21695_s30 = scalar_lea.vmem %s21694_s23, 4096  ;;  %p21696_p0 = scmp.lt.s32.totalorder %s22043_s1, %s21694_s23 }
  0xa8   : > { %p21691_p11 = pnand %p21689_p3, %p21675_p13  ;;  %p21697_p4 = scmp.lt.s32.totalorder %s21695_s30, %s21688_s21 }
  0xaa   : > { %p21692_p12 = pneg %p21691_p11  ;;  %p21698_p7 = por %p21697_p4, %p21696_p0 }
  0xac   : > { %p21699_p6 = pnand %p21698_p7, %p21692_p12 }
  0xae   : > { %21702 = shalt.err (!%p21699_p6)
}
  0xaf   : > { %21386 = dma.hbm_to_vmem [thread:$0]  (!%p22045_p5), %s22041_s0, 2048, %s22043_s1, %s22049_s26, %s21754_s14, %s21754_s14, %s21755_s11  }
  0xb0   : > { %p23921_p13 = scmp.ne.s32.totalorder %s23912_s29, 0 }
  0xb1   : > { %s537_s19 = sand.u32 (!%p23921_p13), 1, %s21741_s24  }
  0xb2   : > { %535 = sbr.rel (%p23921_p13) target bundleno = 6176 (0x1820), region = 84  ;;  %s18311_s5 = sshll.u32 (!%p23921_p13), %s537_s19, 7 }
  0xb3   : > { %s538_s13 = scalar_lea.sflag (!%p23921_p13), [#allocation4], %s537_s19  ;;  %s22083_s22 = scalar_lea.vmem (!%p23921_p13), [#allocation3], %s18311_s5 }
  0xb9   : > { %21720 = dma.done.wait (%p22031_p10), %s538_s13, 2048  }
  0xba   : > { %21722 = vsyncadd (%p22031_p10), %s538_s13, 4294965248  ;;  %p23922_p2 = scmp.eq.s32.totalorder %s21876_s28, 0 }
  0xbc   : > { %21724 = dma.done.wait (%p23922_p2), [#allocation6], 1152   ;;  %p23923_p5 = pmov %p23922_p2 }
  0xbd   : > { %p23924_p8 = pmov %p23922_p2 }
  0xbe   : > { %21726 = vsyncadd (%p23923_p5), [#allocation6], 4294966144 }
  0xbf   : > { %21728 = dma.done.wait (%p23924_p8), [#allocation9], 2048   ;;  %p23925_p9 = pmov %p23922_p2 }
  0xc0   : > { %p23926_p1 = pmov %p23922_p2 }
  0xc1   : > { %21730 = vsyncadd (%p23925_p9), [#allocation9], 4294965248 }
  0xc2   : > { %21732 = dma.done.wait (%p23926_p1), [#allocation12], 1024   ;;  %p23927_p3 = pmov %p23926_p1 }
  0xc3   : > { %vm629_vm0 = vcmask 130048   ;;  %v615_v1 = vld [vmem:[%s22083_s22 + $0x10] sm:$0xff]  ;;  %v613_v2 = vld [vmem:[%s22083_s22] sm:$0xff]  ;;  %v616_v3 = vld [vmem:[%s22083_s22 + $0x18] sm:$0xff]  ;;  %v697_v33 = vlaneseq  ;;  %v21759_v41 = vmov 0   ;;  %vm21761_vm1 = vmmov 0  }
  0xc4   : > { %21734 = vsyncadd (%p23927_p3), [#allocation12], 4294966272  ;;  %v636_v4 = vsel %vm629_vm0, %v615_v1, 0.0  ;;  %v630_v5 = vsel %vm629_vm0, %v613_v2, 0.0  ;;  %v614_v6 = vld [vmem:[%s22083_s22 + $0x8] sm:$0xff]  ;;  %v639_v7 = vsel %vm629_vm0, %v616_v3, 0.0  ;;  %21446 = vset.pattern.permute.xlu1 %v21759_v41  ;;  %21445 = vset.pattern.permute.xlu0 %v21759_v41 }
  0xc5   : > { %637 = vadd.xlane.f32.xlu1 %v636_v4  ;;  %631 = vadd.xlane.f32.xlu0 %v630_v5  ;;  %v633_v8 = vsel %vm629_vm0, %v614_v6, 0.0  ;;  %v618_v9 = vld [vmem:[%s22083_s22 + $0x28] sm:$0xff]  ;;  %v617_v10 = vld [vmem:[%s22083_s22 + $0x20] sm:$0xff]  ;;  %v620_v13 = vld [vmem:[%s22083_s22 + $0x38] sm:$0xff]  ;;  %v22134_v34 = vshrl.u32 %v697_v33, 7  ;;  %vm901_vm2 = vcmask 130112  }
  0xc6   : > { %v645_v11 = vsel %vm629_vm0, %v618_v9, 0.0  ;;  %v642_v12 = vsel %vm629_vm0, %v617_v10, 0.0  ;;  %v619_v14 = vld [vmem:[%s22083_s22 + $0x30] sm:$0xff]  ;;  %v651_v15 = vsel %vm629_vm0, %v620_v13, 0.0  ;;  %v622_v17 = vld [vmem:[%s22083_s22 + $0x48] sm:$0xff]  ;;  %v621_v18 = vld [vmem:[%s22083_s22 + $0x40] sm:$0xff] }
  0xc7   : > { %v648_v16 = vsel %vm629_vm0, %v619_v14, 0.0  ;;  %v657_v19 = vsel %vm629_vm0, %v622_v17, 0.0  ;;  %v654_v20 = vsel %vm629_vm0, %v621_v18, 0.0  ;;  %v624_v21 = vld [vmem:[%s22083_s22 + $0x58] sm:$0xff]  ;;  %v623_v22 = vld [vmem:[%s22083_s22 + $0x50] sm:$0xff]  ;;  %v626_v25 = vld [vmem:[%s22083_s22 + $0x68] sm:$0xff] }
  0xc8   : > { %v663_v23 = vsel %vm629_vm0, %v624_v21, 0.0  ;;  %v660_v24 = vsel %vm629_vm0, %v623_v22, 0.0  ;;  %v625_v26 = vld [vmem:[%s22083_s22 + $0x60] sm:$0xff]  ;;  %v669_v27 = vsel %vm629_vm0, %v626_v25, 0.0  ;;  %v628_v29 = vld [vmem:[%s22083_s22 + $0x78] sm:$0xff]  ;;  %v627_v30 = vld [vmem:[%s22083_s22 + $0x70] sm:$0xff] }
  0xc9   : > { %640 = vadd.xlane.f32.xlu1 %v639_v7  ;;  %634 = vadd.xlane.f32.xlu0 %v633_v8  ;;  %v666_v28 = vsel %vm629_vm0, %v625_v26, 0.0  ;;  %v675_v31 = vsel %vm629_vm0, %v628_v29, 0.0  ;;  %v672_v32 = vsel %vm629_vm0, %v627_v30, 0.0  ;;  %v22137_v35 = vsub.s32 0, %v22134_v34  ;;  %v695_v36 = vld [vmem:[#allocation5] sm:$0xff]  ;;  %s21763_s15 = smov 64  }
  0xca   : > { %v22141_v38 = vsub.s32 1, %v22134_v34  ;;  %v22145_v40 = vsub.s32 2, %v22134_v34  ;;  %v22149_v43 = vsub.s32 3, %v22134_v34  ;;  %v743_v45 = vsub.s32 4, %v22134_v34  ;;  %s21764_s26 = smov 96   ;;  %s21765_s18 = smov 32  }
  0xcb   : > { %v700_v37 = vrot.slane %v695_v36, %v22137_v35  ;;  %v754_v47 = vsub.s32 5, %v22134_v34  ;;  %v765_v49 = vsub.s32 6, %v22134_v34  ;;  %v776_v51 = vsub.s32 7, %v22134_v34  ;;  %s23928_s29 = sld [smem:[#allocation20_spill]]  ;;  %s23929_s1 = sld [smem:[#allocation21_spill]] }
  0xcc   : > { %v711_v39 = vrot.slane %v695_v36, %v22141_v38  ;;  %v722_v42 = vrot.slane %v695_v36, %v22145_v40  ;;  %v733_v44 = vrot.slane %v695_v36, %v22149_v43  ;;  %v744_v46 = vrot.slane %v695_v36, %v743_v45  ;;  %s23930_s11 = sld [smem:[#allocation22_spill]]  ;;  %p609_p10 = scmp.lt.s32.totalorder %s21876_s28, 1 }
  0xcd   : > { %646 = vadd.xlane.f32.xlu1 %v645_v11  ;;  %643 = vadd.xlane.f32.xlu0 %v642_v12  ;;  %v755_v48 = vrot.slane %v695_v36, %v754_v47  ;;  %v766_v50 = vrot.slane %v695_v36, %v765_v49  ;;  %v777_v52 = vrot.slane %v695_v36, %v776_v51  ;;  %vm966_vm3 = vcmask 1041409   ;;  %s23932_s30 = sld [smem:[#allocation24_spill]] }
  0xce   : > { %vm968_vm4 = vcmask 1042434   ;;  %vm970_vm5 = vcmask 1043459   ;;  %vm972_vm6 = vcmask 1044484   ;;  %vm974_vm7 = vcmask 1045509   ;;  %s23938_s28 = smov (!%p609_p10, %s21876_s28), 1 }
  0xcf   : > { %vm976_vm8 = vcmask 1046534   ;;  %vm978_vm9 = vcmask 1047559   ;;  %vm1463_vm10 = vcmask 261120   ;;  %vm3902_vm11 = vcmask 64512   ;;  %s18317_s21 = sshll.u32 %s23938_s28, 2 }
  0xd0   : > { %vm12148_vm12 = vcmask 27648   ;;  %vm12243_vm13 = vcmask 1043456   ;;  %vm12239_vm14 = vcmask 31744   ;;  %vm18180_vm15 = vcmask 60416  }
  0xd1   : > { %652 = vadd.xlane.f32.xlu1 %v651_v15  ;;  %649 = vadd.xlane.f32.xlu0 %v648_v16 }
  0xd3   : > { %s612_s19 = scalar_lea.vmem %s23932_s30, %s18317_s21 }
  0xd5   : > { %658 = vadd.xlane.f32.xlu1 %v657_v19  ;;  %655 = vadd.xlane.f32.xlu0 %v654_v20 }
  0xd9   : > { %664 = vadd.xlane.f32.xlu1 %v663_v23  ;;  %661 = vadd.xlane.f32.xlu0 %v660_v24 }
  0xdd   : > { %670 = vadd.xlane.f32.xlu1 %v669_v27  ;;  %667 = vadd.xlane.f32.xlu0 %v666_v28 }
  0xe1   : > { %676 = vadd.xlane.f32.xlu1 %v675_v31  ;;  %673 = vadd.xlane.f32.xlu0 %v672_v32 }
  0xf2   : > { %706 = vbcast.lane.b32.xlu1 %v700_v37, 264 }
  0xf6   : > { %713 = vbcast.lane.b32.xlu1 %v711_v39, 256 }
  0xf7   : > { %702 = vbcast.lane.b32.xlu0 %v700_v37, 256 }
  0xfa   : > { %717 = vbcast.lane.b32.xlu1 %v711_v39, 264 }
  0xfb   : > { %724 = vbcast.lane.b32.xlu0 %v722_v42, 256 }
  0xfe   : > { %728 = vbcast.lane.b32.xlu1 %v722_v42, 264 }
  0xff   : > { %735 = vbcast.lane.b32.xlu0 %v733_v44, 256 }
 0x102   : > { %739 = vbcast.lane.b32.xlu1 %v733_v44, 264 }
 0x103   : > { %746 = vbcast.lane.b32.xlu0 %v744_v46, 256 }
 0x106   : > { %750 = vbcast.lane.b32.xlu1 %v744_v46, 264 }
 0x107   : > { %757 = vbcast.lane.b32.xlu0 %v755_v48, 256 }
 0x10a   : > { %761 = vbcast.lane.b32.xlu1 %v755_v48, 264 }
 0x10b   : > { %768 = vbcast.lane.b32.xlu0 %v766_v50, 256 }
 0x10e   : > { %772 = vbcast.lane.b32.xlu1 %v766_v50, 264 }
 0x10f   : > { %779 = vbcast.lane.b32.xlu0 %v777_v52, 256 }
 0x112   : > { %783 = vbcast.lane.b32.xlu1 %v777_v52, 264 }
 0x152   : > { %v638_v53 = vpop.xlane.xlu1 %637  ;;  %v632_v54 = vpop.xlane.xlu0 %631 }
 0x153   : > { %v679_v5 = vmul.f32 0.0625, %v632_v54  ;;  %v681_v11 = vmul.f32 0.0625, %v638_v53 }
 0x156   : > { %v641_v55 = vpop.xlane.xlu1 %640  ;;  %v635_v56 = vpop.xlane.xlu0 %634 }
 0x157   : > { %v680_v6 = vmul.f32 0.0625, %v635_v56  ;;  %v682_v15 = vmul.f32 0.0625, %v641_v55 }
 0x15a   : > { %v647_v57 = vpop.xlane.xlu1 %646  ;;  %v644_v58 = vpop.xlane.xlu0 %643 }
 0x15b   : > { %v683_v16 = vmul.f32 0.0625, %v644_v58  ;;  %v684_v21 = vmul.f32 0.0625, %v647_v57 }
 0x15e   : > { %v653_v59 = vpop.xlane.xlu1 %652  ;;  %v650_v60 = vpop.xlane.xlu0 %649 }
 0x15f   : > { %v685_v22 = vmul.f32 0.0625, %v650_v60  ;;  %v686_v27 = vmul.f32 0.0625, %v653_v59  ;;  %v817_v59 = vld [vmem:[%s23884_s2] sm:$0xff]  ;;  %v818_v60 = vld [vmem:[%s23884_s2 + $0x8] sm:$0xff] }
 0x162   : > { %v659_v61 = vpop.xlane.xlu1 %658  ;;  %v656_v62 = vpop.xlane.xlu0 %655 }
 0x163   : > { %v687_v28 = vmul.f32 0.0625, %v656_v62  ;;  %v688_v36 = vmul.f32 0.0625, %v659_v61  ;;  %v21760_v61 = vmov 0.0|0.0   ;;  %v983_v62 = vand.u32 4294901760, %v817_v59 }
 0x164   : > { %20496 = vmatprep.subr.bf16.mxu0 %v21760_v61 }
 0x166   : > { %v665_v63 = vpop.xlane.xlu1 %664  ;;  %v662_v0 = vpop.xlane.xlu0 %661 }
 0x167   : > { %v689_v37 = vmul.f32 0.0625, %v662_v0  ;;  %v690_v45 = vmul.f32 0.0625, %v665_v63  ;;  %v986_v63 = vand.u32 4294901760, %v818_v60  ;;  %v21762_v0 = vmov 0.0  }
 0x168   : > { %19066 = vmatprep.mubr.msk.f32.mxu0 %vm21761_vm1, %v21762_v0 }
 0x16a   : > { %v671_v1 = vpop.xlane.xlu1 %670  ;;  %v668_v2 = vpop.xlane.xlu0 %667 }
 0x16b   : > { %v691_v46 = vmul.f32 0.0625, %v668_v2  ;;  %v692_v51 = vmul.f32 0.0625, %v671_v1  ;;  %v22165_v1 = vpack.c.bf16 %v986_v63, %v983_v62  ;;  %v22167_v2 = vsub.f32 %v817_v59, %v983_v62 }
 0x16d   : > { %20498 = vmatpush3.bf16.msra.mxu0 %v22165_v1 }
 0x16e   : > { %v677_v3 = vpop.xlane.xlu1 %676  ;;  %v674_v4 = vpop.xlane.xlu0 %673  ;;  %20499 = vmatprep.subr.bf16.mxu0 %v21760_v61 }
 0x16f   : > { %v693_v52 = vmul.f32 0.0625, %v674_v4  ;;  %v694_v56 = vmul.f32 0.0625, %v677_v3  ;;  %v22169_v3 = vsub.f32 %v818_v60, %v986_v63  ;;  %v1062_v4 = vand.u32 4294901760, %v22167_v2 }
 0x172   : > { %v707_v7 = vpop.permute.xlu1 %706  ;;  %v703_v8 = vpop.permute.xlu0 %702 }
 0x173   : > { %v802_v9 = vadd.f32 %v707_v7, %v680_v6  ;;  %v801_v10 = vadd.f32 %v703_v8, %v679_v5  ;;  %v1069_v5 = vand.u32 4294901760, %v22169_v3  ;;  %v1063_v6 = vsub.f32 %v22167_v2, %v1062_v4 }
 0x175   : > { %846 = vperm.xlu1 %21446, %v802_v9   ;;  %843 = vperm.xlu0 %21445, %v801_v10   ;;  %v1070_v7 = vsub.f32 %v22169_v3, %v1069_v5  ;;  %v1064_v8 = vand.u32 4294901760, %v1063_v6 }
 0x176   : > { %v714_v12 = vpop.permute.xlu1 %713  ;;  %v725_v13 = vpop.permute.xlu0 %724 }
 0x177   : > { %v803_v14 = vadd.f32 %v714_v12, %v681_v11  ;;  %v805_v19 = vadd.f32 %v725_v13, %v683_v16  ;;  %v1071_v9 = vand.u32 4294901760, %v1070_v7  ;;  %v20503_v11 = vpack.c.bf16 %v22169_v3, %v22167_v2  ;;  %v1452_v2 = vld [vmem:[#allocation7] sm:$0xff]  ;;  %v1453_v3 = vld [vmem:[#allocation7 + $0x8] sm:$0xff] }
 0x178   : > { %v22181_v12 = vpack.c.bf16 %v1069_v5, %v1062_v4 }
 0x179   : > { %849 = vperm.xlu1 %21446, %v803_v14   ;;  %v22177_v10 = vpack.c.bf16 %v1071_v9, %v1064_v8 }
 0x17a   : > { %v718_v17 = vpop.permute.xlu1 %717  ;;  %v736_v18 = vpop.permute.xlu0 %735 }
 0x17b   : > { %v804_v20 = vadd.f32 %v718_v17, %v682_v15  ;;  %v807_v25 = vadd.f32 %v736_v18, %v685_v22 }
 0x17d   : > { %852 = vperm.xlu0 %21445, %v804_v20   ;;  %855 = vperm.xlu1 %21446, %v805_v19   ;;  %v891_v20 = vand.u32 127, %v697_v33 }
 0x17e   : > { %v729_v23 = vpop.permute.xlu1 %728  ;;  %v747_v24 = vpop.permute.xlu0 %746 }
 0x17f   : > { %v806_v26 = vadd.f32 %v729_v23, %v684_v21  ;;  %v809_v31 = vadd.f32 %v747_v24, %v687_v28  ;;  %v896_v23 = vadd.s32 4294967288, %v891_v20 }
 0x181   : > { %858 = vperm.xlu0 %21445, %v806_v26   ;;  %861 = vperm.xlu1 %21446, %v807_v25   ;;  %v22185_v26 = vsub.s32 %v891_v20, %v22134_v34  ;;  %v1455_v20 = vld [vmem:[#allocation7 + $0x18] sm:$0xff] }
 0x182   : > { %v740_v29 = vpop.permute.xlu1 %739  ;;  %v758_v30 = vpop.permute.xlu0 %757 }
 0x183   : > { %v808_v32 = vadd.f32 %v740_v29, %v686_v27  ;;  %v811_v42 = vadd.f32 %v758_v30, %v689_v37  ;;  %v899_v27 = vsub.s32 %v896_v23, %v22134_v34 }
 0x185   : > { %864 = vperm.xlu0 %21445, %v808_v32   ;;  %867 = vperm.xlu1 %21446, %v809_v31  }
 0x186   : > { %v751_v39 = vpop.permute.xlu1 %750  ;;  %v769_v41 = vpop.permute.xlu0 %768 }
 0x187   : > { %v810_v44 = vadd.f32 %v751_v39, %v688_v36  ;;  %v813_v48 = vadd.f32 %v769_v41, %v691_v46 }
 0x189   : > { %870 = vperm.xlu0 %21445, %v810_v44   ;;  %873 = vperm.xlu1 %21446, %v811_v42  }
 0x18a   : > { %v762_v47 = vpop.permute.xlu1 %761  ;;  %v780_v50 = vpop.permute.xlu0 %779 }
 0x18b   : > { %v812_v49 = vadd.f32 %v762_v47, %v690_v45  ;;  %v815_v54 = vadd.f32 %v780_v50, %v693_v52 }
 0x18d   : > { %876 = vperm.xlu0 %21445, %v812_v49   ;;  %879 = vperm.xlu1 %21446, %v813_v48  }
 0x18e   : > { %v773_v53 = vpop.permute.xlu1 %772 }
 0x18f   : > { %v814_v55 = vadd.f32 %v773_v53, %v692_v51 }
 0x191   : > { %882 = vperm.xlu0 %21445, %v814_v55   ;;  %885 = vperm.xlu1 %21446, %v815_v54  }
 0x192   : > { %v784_v57 = vpop.permute.xlu1 %783 }
 0x193   : > { %v816_v58 = vadd.f32 %v784_v57, %v694_v56 }
 0x195   : > { %888 = vperm.xlu0 %21445, %v816_v58  }
 0x1f4   : > { %v847_v13 = vpop.permute.xlu1 %846  ;;  %v844_v14 = vpop.permute.xlu0 %843 }
 0x1f5   : > { %v900_v32 = vrot.slane %v847_v13, %v899_v27  ;;  %v895_v36 = vrot.slane %v844_v14, %v22185_v26 }
 0x1f7   : > { %v902_v49 = vsel %vm901_vm2, %v900_v32, %v895_v36 }
 0x1f8   : > { %v850_v15 = vpop.permute.xlu1 %849 }
 0x1f9   : > { %v906_v37 = vrot.slane %v850_v15, %v22185_v26 }
 0x1fc   : > { %v856_v16 = vpop.permute.xlu1 %855  ;;  %v853_v17 = vpop.permute.xlu0 %852 }
 0x1fd   : > { %v910_v28 = vrot.slane %v853_v17, %v899_v27  ;;  %v915_v39 = vrot.slane %v856_v16, %v22185_v26 }
 0x1ff   : > { %v911_v42 = vsel %vm901_vm2, %v910_v28, %v906_v37 }
 0x200   : > { %v862_v18 = vpop.permute.xlu1 %861  ;;  %v859_v19 = vpop.permute.xlu0 %858  ;;  %v967_v53 = vsel %vm966_vm3, %v911_v42, %v902_v49 }
 0x201   : > { %v919_v29 = vrot.slane %v859_v19, %v899_v27  ;;  %v924_v44 = vrot.slane %v862_v18, %v22185_v26  ;;  %v1476_v19 = vand.u32 4294901760, %v1453_v3 }
 0x203   : > { %v920_v46 = vsel %vm901_vm2, %v919_v29, %v915_v39 }
 0x204   : > { %v868_v21 = vpop.permute.xlu1 %867  ;;  %v865_v22 = vpop.permute.xlu0 %864  ;;  %v969_v57 = vsel %vm968_vm4, %v920_v46, %v967_v53 }
 0x205   : > { %v928_v33 = vrot.slane %v865_v22, %v899_v27  ;;  %v933_v47 = vrot.slane %v868_v21, %v22185_v26 }
 0x207   : > { %v929_v50 = vsel %vm901_vm2, %v928_v33, %v924_v44 }
 0x208   : > { %v874_v24 = vpop.permute.xlu1 %873  ;;  %v871_v25 = vpop.permute.xlu0 %870  ;;  %v971_v59 = vsel %vm970_vm5, %v929_v50, %v969_v57 }
 0x209   : > { %v937_v41 = vrot.slane %v871_v25, %v899_v27  ;;  %v942_v51 = vrot.slane %v874_v24, %v22185_v26 }
 0x20b   : > { %v938_v54 = vsel %vm901_vm2, %v937_v41, %v933_v47  ;;  %v18318_v47 = vld [vmem:[%s23885_s3] ss:$0 sm:$0xff] }
 0x20c   : > { %v880_v30 = vpop.permute.xlu1 %879  ;;  %v877_v31 = vpop.permute.xlu0 %876  ;;  %v973_v63 = vsel %vm972_vm6, %v938_v54, %v971_v59 }
 0x20d   : > { %v946_v45 = vrot.slane %v877_v31, %v899_v27  ;;  %v951_v55 = vrot.slane %v880_v30, %v22185_v26 }
 0x20f   : > { %v947_v58 = vsel %vm901_vm2, %v946_v45, %v942_v51 }
 0x210   : > { %v883_v48 = vpop.permute.xlu0 %882  ;;  %v886_v56 = vpop.permute.xlu1 %885  ;;  %v975_v6 = vsel %vm974_vm7, %v947_v58, %v973_v63 }
 0x211   : > { %v955_v52 = vrot.slane %v883_v48, %v899_v27  ;;  %v960_v4 = vrot.slane %v886_v56, %v22185_v26 }
 0x213   : > { %v956_v60 = vsel %vm901_vm2, %v955_v52, %v951_v55 }
 0x214   : > { %v889_v62 = vpop.permute.xlu0 %888  ;;  %v977_v7 = vsel %vm976_vm8, %v956_v60, %v975_v6 }
 0x215   : > { %v964_v5 = vrot.slane %v889_v62, %v899_v27 }
 0x217   : > { %v965_v8 = vsel %vm901_vm2, %v964_v5, %v960_v4 }
 0x218   : > { %v979_v9 = vsel %vm978_vm9, %v965_v8, %v977_v7 }
 0x219   : > { %v980_v13 = vsel %vm629_vm0, %v979_v9, 0  ;;  %vm18184_vm0 = vcmask 3072  }
 0x21a   : > { %v1049_v14 = vand.u32 4294901760, %v980_v13 }
 0x21c   : > { %v1050_v15 = vsub.f32 %v980_v13, %v1049_v14 }
 0x21e   : > { %v1051_v16 = vand.u32 4294901760, %v1050_v15 }
 0x220   : > { %v1052_v17 = vsub.f32 %v1050_v15, %v1051_v16 }
 0x222   : > { %v1053_v18 = vand.u32 4294901760, %v1052_v17 }
 0x224   : > { %19067 = vmatmul.mubr.f32.vlgmr.msra.gmra.mrb[0].mxu0 %v1053_v18 }
 0x225   : > { %20501 = vmatpush3.bf16.msra.mxu0 %v22177_v10  ;;  %19073 = vmatprep.mubr.msk.f32.mxu0 %vm21761_vm1, %v21762_v0  ;;  %v1454_v10 = vld [vmem:[#allocation7 + $0x10] sm:$0xff] }
 0x226   : > { %20502 = vmatprep.subr.bf16.mxu0 %v21760_v61  ;;  %v1479_v21 = vand.u32 4294901760, %v1454_v10 }
 0x228   : > { %v22239_v24 = vsub.f32 %v1454_v10, %v1479_v21 }
 0x22a   : > { %v1598_v29 = vand.u32 4294901760, %v22239_v24 }
 0x22c   : > { %19074 = vmatmul.mubr.f32.vlgmr.msra.gmra.mrb[0].mxu0 %v1049_v14  ;;  %v1599_v36 = vsub.f32 %v22239_v24, %v1598_v29 }
 0x22d   : > { %20504 = vmatpush3.bf16.msra.mxu0 %v20503_v11  ;;  %19080 = vmatprep.mubr.msk.f32.mxu0 %vm21761_vm1, %v21762_v0  ;;  %v1473_v11 = vand.u32 4294901760, %v1452_v2 }
 0x22e   : > { %20505 = vmatprep.subr.bf16.mxu0 %v21760_v61  ;;  %v1600_v41 = vand.u32 4294901760, %v1599_v36 }
 0x22f   : > { %v22233_v22 = vpack.c.bf16 %v1476_v19, %v1473_v11  ;;  %v22235_v23 = vsub.f32 %v1452_v2, %v1473_v11 }
 0x231   : > { %v1584_v27 = vand.u32 4294901760, %v22235_v23 }
 0x233   : > { %v1585_v31 = vsub.f32 %v22235_v23, %v1584_v27 }
 0x234   : > { %19081 = vmatmul.mubr.f32.vlgmr.msra.gmra.mrb[0].mxu0 %v1050_v15 }
 0x235   : > { %20507 = vmatpush3.bf16.msra.mxu0 %v22165_v1  ;;  %19087 = vmatprep.mubr.msk.f32.mxu0 %vm21761_vm1, %v21762_v0  ;;  %v1586_v33 = vand.u32 4294901760, %v1585_v31 }
 0x236   : > { %20508 = vmatprep.subr.bf16.mxu0 %v21760_v61 }
 0x23c   : > { %19088 = vmatmul.mubr.f32.vlgmr.msra.gmra.mrb[0].mxu0 %v1051_v16 }
 0x23d   : > { %20510 = vmatpush3.bf16.msra.mxu0 %v22181_v12  ;;  %19094 = vmatprep.mubr.msk.f32.mxu0 %vm21761_vm1, %v21762_v0  ;;  %v1482_v12 = vand.u32 4294901760, %v1455_v20 }
 0x23e   : > { %20511 = vmatprep.subr.bf16.mxu0 %v21760_v61  ;;  %v22237_v61 = vsub.f32 %v1453_v3, %v1476_v19 }
 0x23f   : > { %v22243_v25 = vsub.f32 %v1455_v20, %v1482_v12 }
 0x240   : > { %v1591_v28 = vand.u32 4294901760, %v22237_v61  ;;  %v20530_v46 = vpack.c.bf16 %v22237_v61, %v22235_v23 }
 0x241   : > { %v1605_v30 = vand.u32 4294901760, %v22243_v25  ;;  %v20534_v5 = vpack.c.bf16 %v22243_v25, %v22239_v24 }
 0x242   : > { %v1592_v32 = vsub.f32 %v22237_v61, %v1591_v28  ;;  %v20546_v20 = vpack.c.bf16 %v1591_v28, %v1584_v27  ;;  %v18319_v27 = vld [vmem:[%s23890_s8] ss:$0 sm:$0xff] }
 0x243   : > { %v1606_v37 = vsub.f32 %v22243_v25, %v1605_v30 }
 0x244   : > { %19095 = vmatmul.mubr.f32.vlgmr.msra.gmra.mrb[0].mxu0 %v1049_v14  ;;  %v1593_v39 = vand.u32 4294901760, %v1592_v32 }
 0x245   : > { %20513 = vmatpush3.bf16.msra.mxu0 %v22165_v1  ;;  %19101 = vmatprep.mubr.msk.f32.mxu0 %vm21761_vm1, %v21762_v0  ;;  %v22241_v1 = vpack.c.bf16 %v1482_v12, %v1479_v21  ;;  %v1607_v42 = vand.u32 4294901760, %v1606_v37  ;;  %v20550_v21 = vpack.c.bf16 %v1605_v30, %v1598_v29 }
 0x246   : > { %20515 = vmatprep.subr.bf16.mxu0 %v22233_v22  ;;  %v20522_v44 = vpack.c.bf16 %v1593_v39, %v1586_v33 }
 0x247   : > { %v20526_v45 = vpack.c.bf16 %v1607_v42, %v1600_v41 }
 0x248   : > { %20523 = vmatprep.subr.bf16.mxu1 %v20522_v44 }
 0x249   : > { %20525 = vmatpush3.bf16.msra.mxu1 %v20522_v44 }
 0x24a   : > { %20527 = vmatprep.subr.bf16.mxu1 %v20526_v45 }
 0x24c   : > { %19102 = vmatmul.mubr.f32.vlgmr.msra.gmra.mrb[0].mxu0 %v1049_v14 }
 0x24d   : > { %20517 = vmatpush3.bf16.msra.mxu0 %v22233_v22  ;;  %20529 = vmatpush3.bf16.msra.mxu1 %v20526_v45 }
 0x24e   : > { %20519 = vmatprep.subr.bf16.mxu0 %v22241_v1  ;;  %20531 = vmatprep.subr.bf16.mxu1 %v20530_v46 }
 0x251   : > { %20521 = vmatpush3.bf16.msra.mxu0 %v22241_v1 }
 0x252   : > { %20555 = vmatprep.subr.bf16.mxu0 %v22233_v22 }
 0x31f   : > { %v1437_v48 = vpop.f32.mrb[0].mxu0 }
 0x320   : > { %v20902_v49 = vadd.f32 %v18318_v47, %v1437_v48  ;;  %v19103_v50 = vpop.f32.mrb[1].mxu0 }
 0x322   : > { %v22271_v51 = vmax.f32 %v20902_v49, 0.0 }
 0x324   : > { %v1464_v52 = vsel %vm1463_vm10, %v22271_v51, 0  ;;  %1446 = vrot.lane.b32.xlu0 %v22271_v51, %s21763_s15  ;;  %1443 = vrot.lane.b32.xlu1 %v22271_v51, %s21764_s26 }
 0x325   : > { %v22279_v53 = vand.u32 4294901760, %v1464_v52 }
 0x327   : > { %19126 = vmatprep.mubr.f32.mxu1 %v22279_v53  ;;  %v22283_v54 = vsub.f32 %v1464_v52, %v22279_v53 }
 0x328   : > { %1449 = vrot.lane.b32.xlu1 %v22271_v51, %s21765_s18  ;;  %s23931_s18 = sld [smem:[#allocation23_spill]] }
 0x329   : > { %v22287_v55 = vand.u32 4294901760, %v22283_v54 }
 0x32b   : > { %v1544_v56 = vsub.f32 %v22283_v54, %v22287_v55 }
 0x32d   : > { %v22291_v57 = vand.u32 4294901760, %v1544_v56 }
 0x32f   : > { %19112 = vmatprep.mubr.f32.mxu0 %v22291_v57 }
 0x396   : > { %v22294_v58 = vpop.permute.xlu0 %1446  ;;  %v22296_v59 = vpop.permute.xlu1 %1443 }
 0x397   : > { %v1468_v60 = vsel %vm1463_vm10, %v22294_v58, 0  ;;  %v1466_v62 = vsel %vm1463_vm10, %v22296_v59, 0 }
 0x398   : > { %v22302_v63 = vand.u32 4294901760, %v1468_v60  ;;  %v22304_v4 = vand.u32 4294901760, %v1466_v62 }
 0x39a   : > { %v22309_v6 = vsub.f32 %v1468_v60, %v22302_v63  ;;  %v22312_v7 = vsub.f32 %v1466_v62, %v22304_v4  ;;  %v22314_v8 = vpop.permute.xlu1 %1449  ;;  %19127 = vmatmul.mubr.f32.vlgmr.msra.gmra.mrb[0].mxu1 %v22304_v4 }
 0x39b   : > { %v1470_v9 = vsel %vm1463_vm10, %v22314_v8, 0  ;;  %19129 = vmatprep.mubr.f32.mxu1 %v22302_v63  ;;  %20533 = vmatpush3.bf16.msra.mxu1 %v20530_v46 }
 0x39c   : > { %v22320_v13 = vand.u32 4294901760, %v1470_v9  ;;  %20535 = vmatprep.subr.bf16.mxu1 %v20534_v5  ;;  %v22323_v14 = vand.u32 4294901760, %v22312_v7  ;;  %v22326_v15 = vand.u32 4294901760, %v22309_v6 }
 0x39e   : > { %v22329_v16 = vsub.f32 %v1470_v9, %v22320_v13  ;;  %19130 = vmatmul.mubr.f32.gmra.mrb[2].mxu1 %v22320_v13  ;;  %v1554_v17 = vsub.f32 %v22312_v7, %v22323_v14  ;;  %v1564_v18 = vsub.f32 %v22309_v6, %v22326_v15 }
 0x39f   : > { %20537 = vmatpush3.bf16.msra.mxu1 %v20534_v5  ;;  %19140 = vmatprep.mubr.f32.mxu1 %v22283_v54 }
 0x3a0   : > { %v22337_v2 = vand.u32 4294901760, %v1554_v17  ;;  %20539 = vmatprep.subr.bf16.mxu1 %v22233_v22  ;;  %v22340_v3 = vand.u32 4294901760, %v1564_v18  ;;  %v22343_v10 = vand.u32 4294901760, %v22329_v16 }
 0x3a2   : > { %19113 = vmatmul.mubr.f32.vlgmr.msra.gmra.mrb[2].mxu0 %v22337_v2  ;;  %19141 = vmatmul.mubr.f32.vlgmr.msra.gmra.mrb[0].mxu1 %v22312_v7  ;;  %v1574_v11 = vsub.f32 %v22329_v16, %v22343_v10 }
 0x3a3   : > { %19115 = vmatprep.mubr.f32.mxu0 %v22340_v3  ;;  %19143 = vmatprep.mubr.f32.mxu1 %v22309_v6 }
 0x3a4   : > { %20541 = vmatpush3.bf16.msra.mxu1 %v22233_v22  ;;  %20557 = vmatpush3.bf16.msra.mxu0 %v22233_v22  ;;  %v22353_v19 = vand.u32 4294901760, %v1574_v11 }
 0x3a5   : > { %20543 = vmatprep.subr.bf16.mxu1 %v22241_v1  ;;  %20559 = vmatprep.subr.bf16.mxu0 %v22241_v1 }
 0x3a6   : > { %19116 = vmatmul.mubr.f32.gmra.mrb[4].mxu0 %v22353_v19  ;;  %19144 = vmatmul.mubr.f32.gmra.mrb[2].mxu1 %v22329_v16 }
 0x3a7   : > { %19154 = vmatprep.mubr.f32.mxu1 %v22287_v55  ;;  %19182 = vmatprep.mubr.f32.mxu0 %v22279_v53 }
 0x3a8   : > { %20545 = vmatpush3.bf16.msra.mxu1 %v22241_v1  ;;  %20561 = vmatpush3.bf16.msra.mxu0 %v22241_v1 }
 0x3a9   : > { %20547 = vmatprep.subr.bf16.mxu1 %v20546_v20  ;;  %19188 = vmatprep.subr.mxu0 %v21762_v0 }
 0x3ab   : > { %19155 = vmatmul.mubr.f32.vlgmr.msra.gmra.mrb[0].mxu1 %v22323_v14  ;;  %19183 = vmatmul.mubr.f32.vlgmr.msra.gmra.mrb[6].mxu0 %v22304_v4 }
 0x3ac   : > { %19157 = vmatprep.mubr.f32.mxu1 %v22326_v15  ;;  %20549 = vmatpush3.bf16.msra.mxu1 %v20546_v20 }
 0x3ad   : > { %20551 = vmatprep.subr.bf16.mxu1 %v20550_v21  ;;  %19190 = vmatprep.mubr.msk.f32.mxu0 %vm21761_vm1, %v21762_v0 }
 0x3af   : > { %19158 = vmatmul.mubr.f32.gmra.mrb[2].mxu1 %v22343_v10 }
 0x3b0   : > { %20553 = vmatpush3.bf16.msra.mxu1 %v20550_v21  ;;  %19168 = vmatprep.mubr.f32.mxu1 %v22279_v53 }
 0x3b1   : > { %20898 = vmatprep.subr.bf16.mxu1 %v22233_v22 }
 0x3b3   : > { %19169 = vmatmul.mubr.f32.vlgmr.msra.gmra.mrb[0].mxu1 %v22304_v4 }
 0x3b4   : > { %19171 = vmatprep.mubr.f32.mxu1 %v22302_v63  ;;  %20900 = vmatpush3.bf16.msra.mxu1 %v22233_v22 }
 0x3b5   : > { %20899 = vmatprep.subr.bf16.mxu1 %v22241_v1 }
 0x3b7   : > { %19172 = vmatmul.mubr.f32.gmra.mrb[2].mxu1 %v22320_v13 }
 0x3b8   : > { %19185 = vmatprep.mubr.f32.mxu1 %v22302_v63  ;;  %20901 = vmatpush3.bf16.msra.mxu1 %v22241_v1 }
 0x3b9   : > { %19248 = vmatprep.subr.mxu1 %v21762_v0 }
 0x3bf   : > { %19186 = vmatmul.mubr.f32.vlgmr.msra.gmra.mrb[2].mxu1 %v22320_v13 }
 0x3c0   : > { %19250 = vmatprep.mubr.msk.f32.mxu1 %vm21761_vm1, %v21762_v0 }
 0x475   : > { %v19114_v12 = vpop.f32.mrb[2].mxu0 }
 0x476   : > { %v1547_v23 = vpop.f32.mrb[3].mxu0  ;;  %v1558_v28 = vadd.f32 %v19114_v12, %v18319_v27 }
 0x477   : > { %v1548_v29 = vadd.f32 %v18319_v27, %v1547_v23 }
 0x479   : > { %v19117_v61 = vpop.f32.mrb[4].mxu0 }
 0x47a   : > { %v1567_v24 = vpop.f32.mrb[5].mxu0  ;;  %v1578_v33 = vadd.f32 %v19117_v61, %v18319_v27 }
 0x47b   : > { %v1568_v39 = vadd.f32 %v18319_v27, %v1567_v24 }
 0x47e   : > { %v19184_v22 = vpop.f32.mrb[6].mxu0 }
 0x47f   : > { %v2064_v25 = vpop.f32.mrb[7].mxu0 }
 0x486   : > { %v19170_v1 = vpop.f32.mrb[0].mxu1 }
 0x487   : > { %v20904_v30 = vadd.f32 %v19170_v1, %v1558_v28  ;;  %v1971_v31 = vpop.f32.mrb[1].mxu1 }
 0x488   : > { %v20907_v32 = vadd.f32 %v1971_v31, %v1548_v29 }
 0x489   : > { %v22394_v36 = vadd.f32 %v20904_v30, %v19184_v22 }
 0x48a   : > { %v22396_v37 = vadd.f32 %v20907_v32, %v2064_v25 }
 0x48b   : > { %2540 = vrot.lane.b32.xlu1 %v22394_v36, %s21764_s26  ;;  %v2542_v31 = vsel %vm1463_vm10, %v22394_v36, 0 }
 0x48c   : > { %2087 = vrot.lane.b32.xlu0 %v22396_v37, %s21764_s26  ;;  %v2089_v46 = vsel %vm1463_vm10, %v22396_v37, 0 }
 0x48d   : > { %v22412_v47 = vand.u32 4294901760, %v2089_v46 }
 0x48f   : > { %v2160_v48 = vsub.f32 %v2089_v46, %v22412_v47 }
 0x491   : > { %v2161_v50 = vand.u32 4294901760, %v2160_v48 }
 0x492   : > { %v19187_v41 = vpop.f32.mrb[2].mxu1 }
 0x493   : > { %v22402_v42 = vadd.f32 %v19187_v41, %v1578_v33  ;;  %v2076_v44 = vpop.f32.mrb[3].mxu1  ;;  %v2162_v62 = vsub.f32 %v2160_v48, %v2161_v50  ;;  %v22446_v33 = vand.u32 4294901760, %v2542_v31 }
 0x494   : > { %v22404_v45 = vadd.f32 %v2076_v44, %v1568_v39 }
 0x495   : > { %3446 = vrot.lane.b32.xlu1 %v22402_v42, %s21764_s26  ;;  %v2163_v18 = vand.u32 4294901760, %v2162_v62  ;;  %v2613_v41 = vsub.f32 %v2542_v31, %v22446_v33 }
 0x496   : > { %2993 = vrot.lane.b32.xlu0 %v22404_v45, %s21764_s26  ;;  %v2995_v49 = vsel %vm1463_vm10, %v22404_v45, 0 }
 0x497   : > { %v22417_v52 = vand.u32 4294901760, %v2995_v49  ;;  %v2614_v46 = vand.u32 4294901760, %v2613_v41 }
 0x499   : > { %v3066_v9 = vsub.f32 %v2995_v49, %v22417_v52  ;;  %v2615_v49 = vsub.f32 %v2613_v41, %v2614_v46 }
 0x49b   : > { %v3067_v20 = vand.u32 4294901760, %v3066_v9 }
 0x49d   : > { %v3068_v24 = vsub.f32 %v3066_v9, %v3067_v20 }
 0x49f   : > { %v3069_v27 = vand.u32 4294901760, %v3068_v24 }
 0x4fd   : > { %v2541_v30 = vpop.permute.xlu1 %2540 }
 0x4fe   : > { %v2088_v56 = vpop.permute.xlu0 %2087  ;;  %v2544_v32 = vsel %vm1463_vm10, %v2541_v30, 0 }
 0x4ff   : > { %v2091_v60 = vsel %vm1463_vm10, %v2088_v56, 0  ;;  %v2547_v39 = vand.u32 4294901760, %v2544_v32  ;;  %v2616_v56 = vand.u32 4294901760, %v2615_v49 }
 0x500   : > { %v2094_v5 = vand.u32 4294901760, %v2091_v60 }
 0x501   : > { %v2624_v44 = vsub.f32 %v2544_v32, %v2547_v39 }
 0x502   : > { %v2171_v17 = vsub.f32 %v2091_v60, %v2094_v5  ;;  %19189 = vmatpush3.xpose.msra.mxu0 %v2094_v5 }
 0x503   : > { %19193 = vmatprep.subr.mxu0 %v21762_v0 }
 0x504   : > { %v2172_v11 = vand.u32 4294901760, %v2171_v17 }
 0x505   : > { %19191 = vmatmul.mubr.f32.vlgmr.msra.gmra.mrb[8].mxu0 %v2163_v18 }
 0x506   : > { %v2173_v21 = vsub.f32 %v2171_v17, %v2172_v11  ;;  %19195 = vmatprep.mubr.msk.f32.mxu0 %vm21761_vm1, %v21762_v0 }
 0x508   : > { %v2174_v12 = vand.u32 4294901760, %v2173_v21  ;;  %v2994_v23 = vpop.permute.xlu0 %2993 }
 0x509   : > { %v2997_v61 = vsel %vm1463_vm10, %v2994_v23, 0 }
 0x50a   : > { %v3000_v22 = vand.u32 4294901760, %v2997_v61  ;;  %19194 = vmatpush3.xpose.msra.mxu0 %v2174_v12 }
 0x50b   : > { %19198 = vmatprep.subr.mxu0 %v21762_v0 }
 0x50c   : > { %v3077_v25 = vsub.f32 %v2997_v61, %v3000_v22  ;;  %19249 = vmatpush3.xpose.msra.mxu1 %v3000_v22 }
 0x50d   : > { %19196 = vmatmul.mubr.f32.vlgmr.msra.gmra.mrb[8].mxu0 %v22412_v47  ;;  %19253 = vmatprep.subr.mxu1 %v21762_v0 }
 0x50e   : > { %v3078_v28 = vand.u32 4294901760, %v3077_v25  ;;  %19199 = vmatpush3.xpose.msra.mxu0 %v2171_v17  ;;  %19200 = vmatprep.mubr.msk.f32.mxu0 %vm21761_vm1, %v21762_v0 }
 0x50f   : > { %19251 = vmatmul.mubr.f32.vlgmr.msra.gmra.mrb[4].mxu1 %v3069_v27  ;;  %19203 = vmatprep.subr.mxu0 %v21762_v0 }
 0x510   : > { %v3079_v29 = vsub.f32 %v3077_v25, %v3078_v28  ;;  %19255 = vmatprep.mubr.msk.f32.mxu1 %vm21761_vm1, %v21762_v0 }
 0x512   : > { %v3080_v1 = vand.u32 4294901760, %v3079_v29 }
 0x514   : > { %19254 = vmatpush3.xpose.msra.mxu1 %v3080_v1 }
 0x515   : > { %19201 = vmatmul.mubr.f32.vlgmr.msra.gmra.mrb[8].mxu0 %v2160_v48  ;;  %19258 = vmatprep.subr.mxu1 %v21762_v0  ;;  %v2625_v48 = vand.u32 4294901760, %v2624_v44 }
 0x516   : > { %19204 = vmatpush3.xpose.msra.mxu0 %v2094_v5  ;;  %19205 = vmatprep.mubr.msk.f32.mxu0 %vm21761_vm1, %v21762_v0 }
 0x517   : > { %19256 = vmatmul.mubr.f32.vlgmr.msra.gmra.mrb[4].mxu1 %v22417_v52  ;;  %19208 = vmatprep.subr.mxu0 %v21762_v0 }
 0x518   : > { %19259 = vmatpush3.xpose.msra.mxu1 %v3077_v25  ;;  %19260 = vmatprep.mubr.msk.f32.mxu1 %vm21761_vm1, %v21762_v0 }
 0x519   : > { %19263 = vmatprep.subr.mxu1 %v21762_v0 }
 0x51d   : > { %19206 = vmatmul.mubr.f32.vlgmr.msra.gmra.mrb[8].mxu0 %v2161_v50  ;;  %v2626_v50 = vsub.f32 %v2624_v44, %v2625_v48 }
 0x51e   : > { %19209 = vmatpush3.xpose.msra.mxu0 %v2172_v11  ;;  %19210 = vmatprep.mubr.msk.f32.mxu0 %vm21761_vm1, %v21762_v0 }
 0x51f   : > { %19261 = vmatmul.mubr.f32.vlgmr.msra.gmra.mrb[4].mxu1 %v3066_v9  ;;  %19213 = vmatprep.subr.mxu0 %v21762_v0  ;;  %v2627_v60 = vand.u32 4294901760, %v2626_v50 }
 0x520   : > { %19264 = vmatpush3.xpose.msra.mxu1 %v3000_v22  ;;  %19265 = vmatprep.mubr.msk.f32.mxu1 %vm21761_vm1, %v21762_v0 }
 0x521   : > { %19268 = vmatprep.subr.mxu1 %v21762_v0 }
 0x525   : > { %19211 = vmatmul.mubr.f32.vlgmr.msra.gmra.mrb[8].mxu0 %v22412_v47 }
 0x526   : > { %19214 = vmatpush3.xpose.msra.mxu0 %v2094_v5  ;;  %19215 = vmatprep.mubr.msk.f32.mxu0 %vm21761_vm1, %v21762_v0 }
 0x527   : > { %19266 = vmatmul.mubr.f32.vlgmr.msra.gmra.mrb[4].mxu1 %v3067_v20  ;;  %19218 = vmatprep.subr.mxu0 %v21762_v0 }
 0x528   : > { %19269 = vmatpush3.xpose.msra.mxu1 %v3078_v28  ;;  %19270 = vmatprep.mubr.msk.f32.mxu1 %vm21761_vm1, %v21762_v0 }
 0x529   : > { %19273 = vmatprep.subr.mxu1 %v21762_v0 }
 0x52d   : > { %19216 = vmatmul.mubr.f32.vlgmr.msra.gmra.mrb[8].mxu0 %v22412_v47  ;;  %v3447_v47 = vpop.permute.xlu1 %3446 }
 0x52e   : > { %19219 = vmatpush3.xpose.msra.mxu0 %v2547_v39  ;;  %19220 = vmatprep.mubr.msk.f32.mxu0 %vm21761_vm1, %v21762_v0  ;;  %v3450_v62 = vsel %vm1463_vm10, %v3447_v47, 0 }
 0x52f   : > { %19271 = vmatmul.mubr.f32.vlgmr.msra.gmra.mrb[4].mxu1 %v22417_v52  ;;  %19223 = vmatprep.subr.mxu0 %v21762_v0  ;;  %v3453_v9 = vand.u32 4294901760, %v3450_v62 }
 0x530   : > { %19274 = vmatpush3.xpose.msra.mxu1 %v3000_v22  ;;  %19275 = vmatprep.mubr.msk.f32.mxu1 %vm21761_vm1, %v21762_v0 }
 0x531   : > { %19221 = vmatmul.mubr.f32.vlgmr.msra.gmra.mrb[10].mxu0 %v2616_v56  ;;  %19308 = vmatprep.subr.mxu1 %v21762_v0  ;;  %v3530_v18 = vsub.f32 %v3450_v62, %v3453_v9 }
 0x532   : > { %19224 = vmatpush3.xpose.msra.mxu0 %v2627_v60  ;;  %19225 = vmatprep.mubr.msk.f32.mxu0 %vm21761_vm1, %v21762_v0 }
 0x533   : > { %19228 = vmatprep.subr.mxu0 %v21762_v0  ;;  %v3531_v20 = vand.u32 4294901760, %v3530_v18 }
 0x535   : > { %v3532_v12 = vsub.f32 %v3530_v18, %v3531_v20 }
 0x537   : > { %19276 = vmatmul.mubr.f32.vlgmr.msra.gmra.mrb[4].mxu1 %v22417_v52  ;;  %v3448_v52 = vsel %vm1463_vm10, %v22402_v42, 0  ;;  %v3533_v61 = vand.u32 4294901760, %v3532_v12 }
 0x538   : > { %19310 = vmatprep.mubr.msk.f32.mxu1 %vm21761_vm1, %v21762_v0  ;;  %v3518_v5 = vand.u32 4294901760, %v3448_v52 }
 0x539   : > { %19226 = vmatmul.mubr.f32.vlgmr.msra.gmra.mrb[10].mxu0 %v22446_v33 }
 0x53a   : > { %19229 = vmatpush3.xpose.msra.mxu0 %v2624_v44  ;;  %19230 = vmatprep.mubr.msk.f32.mxu0 %vm21761_vm1, %v21762_v0  ;;  %v3519_v17 = vsub.f32 %v3448_v52, %v3518_v5 }
 0x53b   : > { %19233 = vmatprep.subr.mxu0 %v21762_v0 }
 0x53c   : > { %v3520_v11 = vand.u32 4294901760, %v3519_v17 }
 0x53e   : > { %v3521_v21 = vsub.f32 %v3519_v17, %v3520_v11 }
 0x540   : > { %v3522_v23 = vand.u32 4294901760, %v3521_v21 }
 0x541   : > { %19231 = vmatmul.mubr.f32.vlgmr.msra.gmra.mrb[10].mxu0 %v2613_v41 }
 0x542   : > { %19234 = vmatpush3.xpose.msra.mxu0 %v2547_v39  ;;  %19235 = vmatprep.mubr.msk.f32.mxu0 %vm21761_vm1, %v21762_v0 }
 0x543   : > { %19238 = vmatprep.subr.mxu0 %v21762_v0 }
 0x549   : > { %19236 = vmatmul.mubr.f32.vlgmr.msra.gmra.mrb[10].mxu0 %v2614_v46 }
 0x54a   : > { %19239 = vmatpush3.xpose.msra.mxu0 %v2625_v48  ;;  %19240 = vmatprep.mubr.msk.f32.mxu0 %vm21761_vm1, %v21762_v0 }
 0x54b   : > { %19243 = vmatprep.subr.mxu0 %v21762_v0 }
 0x551   : > { %19241 = vmatmul.mubr.f32.vlgmr.msra.gmra.mrb[10].mxu0 %v22446_v33 }
 0x552   : > { %19244 = vmatpush3.xpose.msra.mxu0 %v2547_v39  ;;  %19245 = vmatprep.mubr.msk.f32.mxu0 %vm21761_vm1, %v21762_v0 }
 0x553   : > { %19278 = vmatprep.subr.mxu0 %v21762_v0 }
 0x559   : > { %19246 = vmatmul.mubr.f32.vlgmr.msra.gmra.mrb[10].mxu0 %v22446_v33 }
 0x55a   : > { %19279 = vmatpush3.xpose.msra.mxu0 %v3453_v9  ;;  %19280 = vmatprep.mubr.msk.f32.mxu0 %vm21761_vm1, %v21762_v0 }
 0x55b   : > { %19283 = vmatprep.subr.mxu0 %v21762_v0 }
 0x55d   : > { %19281 = vmatmul.mubr.f32.vlgmr.msra.gmra.mrb[12].mxu0 %v3522_v23 }
 0x55e   : > { %19284 = vmatpush3.xpose.msra.mxu0 %v3533_v61  ;;  %19285 = vmatprep.mubr.msk.f32.mxu0 %vm21761_vm1, %v21762_v0 }
 0x55f   : > { %19288 = vmatprep.subr.mxu0 %v21762_v0 }
 0x565   : > { %19286 = vmatmul.mubr.f32.vlgmr.msra.gmra.mrb[12].mxu0 %v3518_v5 }
 0x566   : > { %19289 = vmatpush3.xpose.msra.mxu0 %v3530_v18  ;;  %19290 = vmatprep.mubr.msk.f32.mxu0 %vm21761_vm1, %v21762_v0 }
 0x567   : > { %19293 = vmatprep.subr.mxu0 %v21762_v0 }
 0x56d   : > { %19291 = vmatmul.mubr.f32.vlgmr.msra.gmra.mrb[12].mxu0 %v3519_v17 }
 0x56e   : > { %19294 = vmatpush3.xpose.msra.mxu0 %v3453_v9  ;;  %19295 = vmatprep.mubr.msk.f32.mxu0 %vm21761_vm1, %v21762_v0 }
 0x56f   : > { %19298 = vmatprep.subr.mxu0 %v21762_v0 }
 0x575   : > { %19296 = vmatmul.mubr.f32.vlgmr.msra.gmra.mrb[12].mxu0 %v3520_v11 }
 0x576   : > { %19299 = vmatpush3.xpose.msra.mxu0 %v3531_v20  ;;  %19300 = vmatprep.mubr.msk.f32.mxu0 %vm21761_vm1, %v21762_v0 }
 0x577   : > { %19303 = vmatprep.subr.mxu0 %v21762_v0 }
 0x57d   : > { %19301 = vmatmul.mubr.f32.vlgmr.msra.gmra.mrb[12].mxu0 %v3518_v5 }
 0x57e   : > { %19304 = vmatpush3.xpose.msra.mxu0 %v3453_v9  ;;  %19305 = vmatprep.mubr.msk.f32.mxu0 %vm21761_vm1, %v21762_v0 }
 0x57f   : > { %19338 = vmatprep.subr.mxu0 %v21762_v0 }
 0x585   : > { %19306 = vmatmul.mubr.f32.vlgmr.msra.gmra.mrb[12].mxu0 %v3518_v5 }
 0x586   : > { %19340 = vmatprep.mubr.msk.f32.mxu0 %vm21761_vm1, %v21762_v0 }
 0x600   : > { %v2535_v24 = vpop.f32.mrb[8].mxu0 }
 0x601   : > { %v3898_v22 = vmul.f32 0.17677669, %v2535_v24  ;;  %v19217_v25 = vpop.f32.mrb[9].mxu0 }
 0x603   : > { %v3903_v27 = vsel %vm3902_vm11, %v3898_v22, -inf }
 0x604   : > { %3904 = vmax.xlane.f32.xlu0 %v3903_v27 }
 0x60a   : > { %v3441_v28 = vpop.f32.mrb[4].mxu1 }
 0x60b   : > { %v3900_v29 = vmul.f32 0.17677669, %v3441_v28  ;;  %v19277_v1 = vpop.f32.mrb[5].mxu1 }
 0x60d   : > { %v3909_v30 = vsel %vm3902_vm11, %v3900_v29, -inf }
 0x60e   : > { %3910 = vmax.xlane.f32.xlu0 %v3909_v30 }
 0x62c   : > { %v2988_v31 = vpop.f32.mrb[10].mxu0 }
 0x62d   : > { %v3899_v32 = vmul.f32 0.17677669, %v2988_v31  ;;  %v19247_v33 = vpop.f32.mrb[11].mxu0 }
 0x62f   : > { %v3906_v39 = vsel %vm3902_vm11, %v3899_v32, -inf }
 0x630   : > { %3907 = vmax.xlane.f32.xlu1 %v3906_v39 }
 0x658   : > { %v3894_v41 = vpop.f32.mrb[12].mxu0 }
 0x659   : > { %v3901_v44 = vmul.f32 0.17677669, %v3894_v41  ;;  %v19307_v46 = vpop.f32.mrb[13].mxu0 }
 0x65b   : > { %v3912_v48 = vsel %vm3902_vm11, %v3901_v44, -inf }
 0x65c   : > { %3913 = vmax.xlane.f32.xlu0 %v3912_v48 }
 0x691   : > { %v3905_v49 = vpop.xlane.xlu0 %3904 }
 0x692   : > { %v3915_v50 = vsub.f32 %v3898_v22, %v3905_v49 }
 0x694   : > { %v3919_v56 = vmul.f32 1.442695, %v3915_v50 }
 0x696   : > { %21447 = vpow2.f32 %v3919_v56 }
 0x69b   : > { %v3911_v18 = vpop.xlane.xlu0 %3910 }
 0x69c   : > { %v3917_v12 = vsub.f32 %v3900_v29, %v3911_v18 }
 0x69e   : > { %v3923_v23 = vmul.f32 1.442695, %v3917_v12 }
 0x6a0   : > { %v21448_v60 = vpop.eup %21447 }
 0x6a1   : > { %v3927_v47 = vsel %vm3902_vm11, %v21448_v60, 0.0 }
 0x6a2   : > { %3928 = vadd.xlane.f32.xlu0 %v3927_v47 }
 0x6b8   : > { %3947 = vrot.lane.b32.xlu0 %v22396_v37, %s21763_s15 }
 0x6bd   : > { %v3908_v52 = vpop.xlane.xlu1 %3907 }
 0x6be   : > { %v3916_v62 = vsub.f32 %v3899_v32, %v3908_v52 }
 0x6c0   : > { %v3921_v5 = vmul.f32 1.442695, %v3916_v62 }
 0x6c2   : > { %21449 = vpow2.f32 %v3921_v5 }
 0x6cc   : > { %v21450_v9 = vpop.eup %21449 }
 0x6cd   : > { %v3930_v17 = vsel %vm3902_vm11, %v21450_v9, 0.0 }
 0x6ce   : > { %3931 = vadd.xlane.f32.xlu1 %v3930_v17 }
 0x6df   : > { %4399 = vrot.lane.b32.xlu1 %v22394_v36, %s21763_s15 }
 0x6e9   : > { %v3914_v11 = vpop.xlane.xlu0 %3913 }
 0x6ea   : > { %v3918_v20 = vsub.f32 %v3901_v44, %v3914_v11 }
 0x6ec   : > { %v3925_v21 = vmul.f32 1.442695, %v3918_v20 }
 0x6ee   : > { %21451 = vpow2.f32 %v3925_v21 }
 0x6ef   : > { %21453 = vpow2.f32 %v3923_v23 }
 0x6f8   : > { %v22522_v37 = vpop.eup %21451 }
 0x6f9   : > { %v3936_v61 = vsel %vm3902_vm11, %v22522_v37, 0.0  ;;  %v22526_v24 = vpop.eup %21453 }
 0x6fa   : > { %3937 = vadd.xlane.f32.xlu0 %v3936_v61  ;;  %v3933_v22 = vsel %vm3902_vm11, %v22526_v24, 0.0 }
 0x703   : > { %3934 = vadd.xlane.f32.xlu1 %v3933_v22 }
 0x710   : > { %4851 = vrot.lane.b32.xlu0 %v22404_v45, %s21763_s15 }
 0x714   : > { %5303 = vrot.lane.b32.xlu1 %v22402_v42, %s21763_s15 }
 0x72f   : > { %v3929_v36 = vpop.xlane.xlu0 %3928 }
 0x730   : > { %21455 = vrcp.f32 %v3929_v36 }
 0x733   : > { %v3948_v25 = vpop.permute.xlu0 %3947 }
 0x734   : > { %v3954_v27 = vand.u32 4294901760, %v3948_v25 }
 0x736   : > { %19309 = vmatpush3.msra.mxu1 %v3954_v27  ;;  %v4031_v1 = vsub.f32 %v3948_v25, %v3954_v27 }
 0x737   : > { %19313 = vmatprep.subr.mxu1 %v21762_v0 }
 0x738   : > { %v4032_v32 = vand.u32 4294901760, %v4031_v1 }
 0x73a   : > { %v21456_v28 = vpop.eup %21455  ;;  %v4033_v45 = vsub.f32 %v4031_v1, %v4032_v32 }
 0x73b   : > { %v3943_v29 = vmul.f32 %v21456_v28, %v21448_v60 }
 0x73c   : > { %v4034_v42 = vand.u32 4294901760, %v4033_v45 }
 0x73d   : > { %v3951_v30 = vsel %vm3902_vm11, %v3943_v29, 0 }
 0x73e   : > { %v4019_v31 = vand.u32 4294901760, %v3951_v30 }
 0x740   : > { %v4020_v33 = vsub.f32 %v3951_v30, %v4019_v31 }
 0x742   : > { %v4021_v39 = vand.u32 4294901760, %v4020_v33 }
 0x744   : > { %v4022_v41 = vsub.f32 %v4020_v33, %v4021_v39 }
 0x746   : > { %v4023_v44 = vand.u32 4294901760, %v4022_v41 }
 0x748   : > { %19311 = vmatmul.mubr.f32.vlgmr.msra.gmra.mrb[6].mxu1 %v4023_v44 }
 0x749   : > { %19314 = vmatpush3.msra.mxu1 %v4034_v42  ;;  %19315 = vmatprep.mubr.msk.f32.mxu1 %vm21761_vm1, %v21762_v0 }
 0x74a   : > { %19318 = vmatprep.subr.mxu1 %v21762_v0 }
 0x750   : > { %19316 = vmatmul.mubr.f32.vlgmr.msra.gmra.mrb[6].mxu1 %v4019_v31 }
 0x751   : > { %19319 = vmatpush3.msra.mxu1 %v4031_v1  ;;  %19320 = vmatprep.mubr.msk.f32.mxu1 %vm21761_vm1, %v21762_v0 }
 0x752   : > { %19323 = vmatprep.subr.mxu1 %v21762_v0 }
 0x758   : > { %19321 = vmatmul.mubr.f32.vlgmr.msra.gmra.mrb[6].mxu1 %v4020_v33 }
 0x759   : > { %19324 = vmatpush3.msra.mxu1 %v3954_v27  ;;  %19325 = vmatprep.mubr.msk.f32.mxu1 %vm21761_vm1, %v21762_v0 }
 0x75a   : > { %19328 = vmatprep.subr.mxu1 %v21762_v0 }
 0x75b   : > { %v3932_v46 = vpop.xlane.xlu1 %3931 }
 0x75c   : > { %21457 = vrcp.f32 %v3932_v46 }
 0x75f   : > { %v4400_v48 = vpop.permute.xlu1 %4399 }
 0x760   : > { %v4406_v49 = vand.u32 4294901760, %v4400_v48  ;;  %19326 = vmatmul.mubr.f32.vlgmr.msra.gmra.mrb[6].mxu1 %v4021_v39 }
 0x761   : > { %19329 = vmatpush3.msra.mxu1 %v4032_v32  ;;  %19330 = vmatprep.mubr.msk.f32.mxu1 %vm21761_vm1, %v21762_v0 }
 0x762   : > { %19339 = vmatpush3.msra.mxu0 %v4406_v49  ;;  %19333 = vmatprep.subr.mxu1 %v21762_v0  ;;  %v4483_v60 = vsub.f32 %v4400_v48, %v4406_v49 }
 0x763   : > { %19343 = vmatprep.subr.mxu0 %v21762_v0 }
 0x764   : > { %v4484_v62 = vand.u32 4294901760, %v4483_v60 }
 0x766   : > { %v21458_v50 = vpop.eup %21457  ;;  %v4485_v18 = vsub.f32 %v4483_v60, %v4484_v62 }
 0x767   : > { %v3944_v56 = vmul.f32 %v21458_v50, %v21450_v9 }
 0x768   : > { %19331 = vmatmul.mubr.f32.vlgmr.msra.gmra.mrb[6].mxu1 %v4019_v31  ;;  %v4486_v20 = vand.u32 4294901760, %v4485_v18 }
 0x769   : > { %19334 = vmatpush3.msra.mxu1 %v3954_v27  ;;  %19335 = vmatprep.mubr.msk.f32.mxu1 %vm21761_vm1, %v21762_v0  ;;  %v4403_v47 = vsel %vm3902_vm11, %v3944_v56, 0 }
 0x76a   : > { %v4471_v52 = vand.u32 4294901760, %v4403_v47  ;;  %19368 = vmatprep.subr.mxu1 %v21762_v0 }
 0x76c   : > { %v4472_v5 = vsub.f32 %v4403_v47, %v4471_v52 }
 0x76e   : > { %v4473_v17 = vand.u32 4294901760, %v4472_v5 }
 0x770   : > { %19336 = vmatmul.mubr.f32.vlgmr.msra.gmra.mrb[6].mxu1 %v4019_v31  ;;  %v4474_v11 = vsub.f32 %v4472_v5, %v4473_v17 }
 0x771   : > { %19370 = vmatprep.mubr.msk.f32.mxu1 %vm21761_vm1, %v21762_v0 }
 0x772   : > { %v4475_v9 = vand.u32 4294901760, %v4474_v11 }
 0x774   : > { %19341 = vmatmul.mubr.f32.vlgmr.msra.gmra.mrb[14].mxu0 %v4475_v9  ;;  %v5757_v9 = vld [vmem:[#allocation8 + $0x10] sm:$0xff] }
 0x775   : > { %19344 = vmatpush3.msra.mxu0 %v4486_v20  ;;  %19345 = vmatprep.mubr.msk.f32.mxu0 %vm21761_vm1, %v21762_v0  ;;  %v5758_v20 = vld [vmem:[#allocation8 + $0x18] sm:$0xff] }
 0x776   : > { %19348 = vmatprep.subr.mxu0 %v21762_v0 }
 0x77c   : > { %19346 = vmatmul.mubr.f32.vlgmr.msra.gmra.mrb[14].mxu0 %v4471_v52 }
 0x77d   : > { %19349 = vmatpush3.msra.mxu0 %v4483_v60  ;;  %19350 = vmatprep.mubr.msk.f32.mxu0 %vm21761_vm1, %v21762_v0 }
 0x77e   : > { %19353 = vmatprep.subr.mxu0 %v21762_v0 }
 0x784   : > { %19351 = vmatmul.mubr.f32.vlgmr.msra.gmra.mrb[14].mxu0 %v4472_v5  ;;  %v5756_v5 = vld [vmem:[#allocation8 + $0x8] sm:$0xff] }
 0x785   : > { %19354 = vmatpush3.msra.mxu0 %v4406_v49  ;;  %19355 = vmatprep.mubr.msk.f32.mxu0 %vm21761_vm1, %v21762_v0  ;;  %v5782_v18 = vand.u32 4294901760, %v5756_v5 }
 0x786   : > { %19358 = vmatprep.subr.mxu0 %v21762_v0 }
 0x787   : > { %v3938_v21 = vpop.xlane.xlu0 %3937 }
 0x788   : > { %21459 = vrcp.f32 %v3938_v21  ;;  %v5785_v21 = vand.u32 4294901760, %v5757_v9 }
 0x78b   : > { %v4852_v12 = vpop.permute.xlu0 %4851 }
 0x78c   : > { %v22564_v23 = vand.u32 4294901760, %v4852_v12  ;;  %19356 = vmatmul.mubr.f32.vlgmr.msra.gmra.mrb[14].mxu0 %v4473_v17 }
 0x78d   : > { %19359 = vmatpush3.msra.mxu0 %v4484_v62  ;;  %19360 = vmatprep.mubr.msk.f32.mxu0 %vm21761_vm1, %v21762_v0  ;;  %v5755_v62 = vld [vmem:[#allocation8] sm:$0xff] }
 0x78e   : > { %19369 = vmatpush3.msra.mxu1 %v22564_v23  ;;  %19363 = vmatprep.subr.mxu0 %v21762_v0  ;;  %v5779_v17 = vand.u32 4294901760, %v5755_v62 }
 0x78f   : > { %19373 = vmatprep.subr.mxu1 %v21762_v0 }
 0x790   : > { %v3935_v61 = vpop.xlane.xlu1 %3934  ;;  %v22612_v11 = vpack.c.bf16 %v5782_v18, %v5779_v17 }
 0x791   : > { %21461 = vrcp.f32 %v3935_v61 }
 0x792   : > { %v21460_v22 = vpop.eup %21459 }
 0x793   : > { %v3946_v36 = vmul.f32 %v21460_v22, %v22522_v37  ;;  %v4935_v37 = vsub.f32 %v4852_v12, %v22564_v23  ;;  %v5788_v12 = vand.u32 4294901760, %v5758_v20  ;;  %v5896_v22 = vsub.f32 %v5756_v5, %v5782_v18 }
 0x794   : > { %19361 = vmatmul.mubr.f32.vlgmr.msra.gmra.mrb[14].mxu0 %v4471_v52  ;;  %v5304_v25 = vpop.permute.xlu1 %5303 }
 0x795   : > { %19364 = vmatpush3.msra.mxu0 %v4406_v49  ;;  %v5310_v27 = vand.u32 4294901760, %v5304_v25  ;;  %19365 = vmatprep.mubr.msk.f32.mxu0 %vm21761_vm1, %v21762_v0  ;;  %v5307_v28 = vsel %vm3902_vm11, %v3946_v36, 0  ;;  %v4936_v49 = vand.u32 4294901760, %v4935_v37  ;;  %v22616_v61 = vpack.c.bf16 %v5788_v12, %v5785_v21 }
 0x796   : > { %19398 = vmatprep.subr.mxu0 %v21762_v0  ;;  %v5375_v29 = vand.u32 4294901760, %v5307_v28 }
 0x797   : > { %v5387_v1 = vsub.f32 %v5304_v25, %v5310_v27  ;;  %v4937_v56 = vsub.f32 %v4935_v37, %v4936_v49  ;;  %v5897_v25 = vand.u32 4294901760, %v5896_v22 }
 0x798   : > { %v5376_v30 = vsub.f32 %v5307_v28, %v5375_v29 }
 0x799   : > { %v5388_v31 = vand.u32 4294901760, %v5387_v1  ;;  %v5898_v28 = vsub.f32 %v5896_v22, %v5897_v25 }
 0x79a   : > { %v5377_v32 = vand.u32 4294901760, %v5376_v30 }
 0x79b   : > { %v21462_v33 = vpop.eup %21461  ;;  %v5389_v39 = vsub.f32 %v5387_v1, %v5388_v31 }
 0x79c   : > { %v3945_v45 = vmul.f32 %v21462_v33, %v22526_v24  ;;  %19366 = vmatmul.mubr.f32.vlgmr.msra.gmra.mrb[14].mxu0 %v4471_v52  ;;  %v5378_v41 = vsub.f32 %v5376_v30, %v5377_v32  ;;  %v4938_v52 = vand.u32 4294901760, %v4937_v56 }
 0x79d   : > { %v5390_v44 = vand.u32 4294901760, %v5389_v39  ;;  %19399 = vmatpush3.msra.mxu0 %v5310_v27  ;;  %19400 = vmatprep.mubr.msk.f32.mxu0 %vm21761_vm1, %v21762_v0 }
 0x79e   : > { %19403 = vmatprep.subr.mxu0 %v21762_v0  ;;  %v5379_v42 = vand.u32 4294901760, %v5378_v41  ;;  %v4855_v46 = vsel %vm3902_vm11, %v3945_v45, 0 }
 0x79f   : > { %v4923_v48 = vand.u32 4294901760, %v4855_v46 }
 0x7a0   : > { %19401 = vmatmul.mubr.f32.vlgmr.msra.gmra.mrb[16].mxu0 %v5379_v42 }
 0x7a1   : > { %19404 = vmatpush3.msra.mxu0 %v5390_v44  ;;  %19405 = vmatprep.mubr.msk.f32.mxu0 %vm21761_vm1, %v21762_v0  ;;  %v4924_v24 = vsub.f32 %v4855_v46, %v4923_v48 }
 0x7a2   : > { %19408 = vmatprep.subr.mxu0 %v21762_v0 }
 0x7a3   : > { %v4925_v50 = vand.u32 4294901760, %v4924_v24 }
 0x7a5   : > { %v4926_v60 = vsub.f32 %v4924_v24, %v4925_v50 }
 0x7a7   : > { %v4927_v47 = vand.u32 4294901760, %v4926_v60 }
 0x7a8   : > { %19406 = vmatmul.mubr.f32.vlgmr.msra.gmra.mrb[16].mxu0 %v5375_v29 }
 0x7a9   : > { %19409 = vmatpush3.msra.mxu0 %v5387_v1  ;;  %19371 = vmatmul.mubr.f32.vlgmr.msra.gmra.mrb[8].mxu1 %v4927_v47  ;;  %v5910_v1 = vsub.f32 %v5758_v20, %v5788_v12 }
 0x7aa   : > { %19374 = vmatpush3.msra.mxu1 %v4938_v52  ;;  %19410 = vmatprep.mubr.msk.f32.mxu0 %vm21761_vm1, %v21762_v0 }
 0x7ab   : > { %19413 = vmatprep.subr.mxu0 %v21762_v0  ;;  %19375 = vmatprep.mubr.msk.f32.mxu1 %vm21761_vm1, %v21762_v0  ;;  %v5911_v33 = vand.u32 4294901760, %v5910_v1 }
 0x7ac   : > { %19378 = vmatprep.subr.mxu1 %v21762_v0 }
 0x7ad   : > { %v5912_v45 = vsub.f32 %v5910_v1, %v5911_v33 }
 0x7af   : > { %v5913_v44 = vand.u32 4294901760, %v5912_v45 }
 0x7b0   : > { %19411 = vmatmul.mubr.f32.vlgmr.msra.gmra.mrb[16].mxu0 %v5376_v30 }
 0x7b1   : > { %19414 = vmatpush3.msra.mxu0 %v5310_v27  ;;  %19376 = vmatmul.mubr.f32.vlgmr.msra.gmra.mrb[8].mxu1 %v4923_v48 }
 0x7b2   : > { %19379 = vmatpush3.msra.mxu1 %v4935_v37  ;;  %19415 = vmatprep.mubr.msk.f32.mxu0 %vm21761_vm1, %v21762_v0 }
 0x7b3   : > { %19418 = vmatprep.subr.mxu0 %v21762_v0  ;;  %19380 = vmatprep.mubr.msk.f32.mxu1 %vm21761_vm1, %v21762_v0 }
 0x7b4   : > { %19383 = vmatprep.subr.mxu1 %v21762_v0 }
 0x7b8   : > { %19416 = vmatmul.mubr.f32.vlgmr.msra.gmra.mrb[16].mxu0 %v5377_v32 }
 0x7b9   : > { %19419 = vmatpush3.msra.mxu0 %v5388_v31  ;;  %19381 = vmatmul.mubr.f32.vlgmr.msra.gmra.mrb[8].mxu1 %v4924_v24  ;;  %v5899_v31 = vand.u32 4294901760, %v5898_v28 }
 0x7ba   : > { %19384 = vmatpush3.msra.mxu1 %v22564_v23  ;;  %19420 = vmatprep.mubr.msk.f32.mxu0 %vm21761_vm1, %v21762_v0 }
 0x7bb   : > { %19423 = vmatprep.subr.mxu0 %v21762_v0  ;;  %19385 = vmatprep.mubr.msk.f32.mxu1 %vm21761_vm1, %v21762_v0 }
 0x7bc   : > { %19388 = vmatprep.subr.mxu1 %v21762_v0 }
 0x7c0   : > { %19421 = vmatmul.mubr.f32.vlgmr.msra.gmra.mrb[16].mxu0 %v5375_v29 }
 0x7c1   : > { %19424 = vmatpush3.msra.mxu0 %v5310_v27  ;;  %19386 = vmatmul.mubr.f32.vlgmr.msra.gmra.mrb[8].mxu1 %v4925_v50 }
 0x7c2   : > { %19389 = vmatpush3.msra.mxu1 %v4936_v49  ;;  %19425 = vmatprep.mubr.msk.f32.mxu0 %vm21761_vm1, %v21762_v0 }
 0x7c3   : > { %19390 = vmatprep.mubr.msk.f32.mxu1 %vm21761_vm1, %v21762_v0  ;;  %19393 = vmatprep.subr.mxu1 %v21762_v0 }
 0x7c8   : > { %19426 = vmatmul.mubr.f32.vlgmr.msra.gmra.mrb[16].mxu0 %v5375_v29  ;;  %v5903_v29 = vsub.f32 %v5757_v9, %v5785_v21 }
 0x7c9   : > { %19391 = vmatmul.mubr.f32.vlgmr.msra.gmra.mrb[8].mxu1 %v4923_v48 }
 0x7ca   : > { %19394 = vmatpush3.msra.mxu1 %v22564_v23  ;;  %19395 = vmatprep.mubr.msk.f32.mxu1 %vm21761_vm1, %v21762_v0  ;;  %v5889_v23 = vsub.f32 %v5755_v62, %v5779_v17  ;;  %v5904_v32 = vand.u32 4294901760, %v5903_v29 }
 0x7cb   : > { %20563 = vmatprep.subr.bf16.mxu1 %v22612_v11 }
 0x7cc   : > { %v5890_v36 = vand.u32 4294901760, %v5889_v23  ;;  %v5905_v37 = vsub.f32 %v5903_v29, %v5904_v32  ;;  %v20578_v46 = vpack.c.bf16 %v5896_v22, %v5889_v23  ;;  %v20598_v52 = vpack.c.bf16 %v5911_v33, %v5904_v32 }
 0x7ce   : > { %v5891_v27 = vsub.f32 %v5889_v23, %v5890_v36  ;;  %v5906_v41 = vand.u32 4294901760, %v5905_v37  ;;  %v20594_v56 = vpack.c.bf16 %v5897_v25, %v5890_v36 }
 0x7d0   : > { %v5892_v30 = vand.u32 4294901760, %v5891_v27  ;;  %v20574_v42 = vpack.c.bf16 %v5913_v44, %v5906_v41 }
 0x7d1   : > { %19396 = vmatmul.mubr.f32.vlgmr.msra.gmra.mrb[8].mxu1 %v4923_v48  ;;  %v20582_v48 = vpack.c.bf16 %v5910_v1, %v5903_v29 }
 0x7d2   : > { %20565 = vmatpush3.bf16.msra.mxu1 %v22612_v11  ;;  %v20570_v39 = vpack.c.bf16 %v5899_v31, %v5892_v30 }
 0x7d3   : > { %20567 = vmatprep.subr.bf16.mxu1 %v22616_v61 }
 0x7d6   : > { %20569 = vmatpush3.bf16.msra.mxu1 %v22616_v61 }
 0x7d7   : > { %20571 = vmatprep.subr.bf16.mxu1 %v20570_v39 }
 0x843   : > { %v4395_v49 = vpop.f32.mrb[6].mxu1 }
 0x844   : > { %v5767_v24 = vsel %vm1463_vm10, %v4395_v49, 0  ;;  %v19337_v50 = vpop.f32.mrb[7].mxu1 }
 0x845   : > { %v22621_v60 = vand.u32 4294901760, %v5767_v24 }
 0x847   : > { %v5848_v47 = vsub.f32 %v5767_v24, %v22621_v60 }
 0x849   : > { %v5849_v62 = vand.u32 4294901760, %v5848_v47 }
 0x84b   : > { %v5850_v5 = vsub.f32 %v5848_v47, %v5849_v62 }
 0x84d   : > { %v5851_v17 = vand.u32 4294901760, %v5850_v5 }
 0x84f   : > { %19436 = vmatprep.mubr.f32.mxu1 %v5851_v17 }
 0x86f   : > { %v4847_v18 = vpop.f32.mrb[14].mxu0 }
 0x870   : > { %v5770_v9 = vsel %vm1463_vm10, %v4847_v18, 0  ;;  %v19367_v20 = vpop.f32.mrb[15].mxu0 }
 0x871   : > { %v5857_v21 = vand.u32 4294901760, %v5770_v9 }
 0x873   : > { %v5858_v12 = vsub.f32 %v5770_v9, %v5857_v21 }
 0x875   : > { %v5859_v23 = vand.u32 4294901760, %v5858_v12 }
 0x877   : > { %v5860_v22 = vsub.f32 %v5858_v12, %v5859_v23 }
 0x879   : > { %v5861_v27 = vand.u32 4294901760, %v5860_v22 }
 0x87b   : > { %19437 = vmatmul.mubr.f32.vlgmr.msra.gmra.mrb[10].mxu1 %v5861_v27 }
 0x87c   : > { %20573 = vmatpush3.bf16.msra.mxu1 %v20570_v39 }
 0x87d   : > { %20575 = vmatprep.subr.bf16.mxu1 %v20574_v42 }
 0x880   : > { %20577 = vmatpush3.bf16.msra.mxu1 %v20574_v42  ;;  %v18320_v42 = vld [vmem:[%s23891_s9] ss:$0 sm:$0xff] }
 0x881   : > { %20579 = vmatprep.subr.bf16.mxu1 %v20578_v46 }
 0x89b   : > { %v5751_v36 = vpop.f32.mrb[16].mxu0 }
 0x89c   : > { %v5776_v25 = vsel %vm1463_vm10, %v5751_v36, 0  ;;  %v19427_v28 = vpop.f32.mrb[17].mxu0 }
 0x89d   : > { %v5877_v29 = vand.u32 4294901760, %v5776_v25 }
 0x89f   : > { %v5878_v1 = vsub.f32 %v5776_v25, %v5877_v29 }
 0x8a1   : > { %v5879_v37 = vand.u32 4294901760, %v5878_v1 }
 0x8a3   : > { %v5880_v44 = vsub.f32 %v5878_v1, %v5879_v37 }
 0x8a4   : > { %v5299_v30 = vpop.f32.mrb[8].mxu1 }
 0x8a5   : > { %v5773_v31 = vsel %vm1463_vm10, %v5299_v30, 0  ;;  %v19397_v32 = vpop.f32.mrb[9].mxu1  ;;  %v5881_v24 = vand.u32 4294901760, %v5880_v44 }
 0x8a6   : > { %v5867_v33 = vand.u32 4294901760, %v5773_v31 }
 0x8a8   : > { %v5868_v45 = vsub.f32 %v5773_v31, %v5867_v33 }
 0x8aa   : > { %v5869_v41 = vand.u32 4294901760, %v5868_v45 }
 0x8ac   : > { %v5870_v49 = vsub.f32 %v5868_v45, %v5869_v41 }
 0x8ae   : > { %v5871_v39 = vand.u32 4294901760, %v5870_v49 }
 0x8b0   : > { %19439 = vmatprep.mubr.f32.mxu1 %v5871_v39 }
 0x8b1   : > { %19440 = vmatmul.mubr.f32.gmra.mrb[12].mxu1 %v5881_v24 }
 0x8b2   : > { %19450 = vmatprep.mubr.f32.mxu1 %v22621_v60 }
 0x8b5   : > { %19451 = vmatmul.mubr.f32.vlgmr.msra.gmra.mrb[10].mxu1 %v5857_v21 }
 0x8b6   : > { %19453 = vmatprep.mubr.f32.mxu1 %v5867_v33  ;;  %20581 = vmatpush3.bf16.msra.mxu1 %v20578_v46 }
 0x8b7   : > { %20583 = vmatprep.subr.bf16.mxu1 %v20582_v48 }
 0x8b9   : > { %19454 = vmatmul.mubr.f32.gmra.mrb[12].mxu1 %v5877_v29 }
 0x8ba   : > { %20585 = vmatpush3.bf16.msra.mxu1 %v20582_v48  ;;  %19464 = vmatprep.mubr.f32.mxu1 %v5848_v47 }
 0x8bb   : > { %20587 = vmatprep.subr.bf16.mxu1 %v22612_v11 }
 0x8bd   : > { %19465 = vmatmul.mubr.f32.vlgmr.msra.gmra.mrb[10].mxu1 %v5858_v12 }
 0x8be   : > { %19467 = vmatprep.mubr.f32.mxu1 %v5868_v45  ;;  %20589 = vmatpush3.bf16.msra.mxu1 %v22612_v11 }
 0x8bf   : > { %20591 = vmatprep.subr.bf16.mxu1 %v22616_v61 }
 0x8c1   : > { %19468 = vmatmul.mubr.f32.gmra.mrb[12].mxu1 %v5878_v1 }
 0x8c2   : > { %20593 = vmatpush3.bf16.msra.mxu1 %v22616_v61  ;;  %19478 = vmatprep.mubr.f32.mxu1 %v5849_v62 }
 0x8c3   : > { %20595 = vmatprep.subr.bf16.mxu1 %v20594_v56 }
 0x8c5   : > { %19479 = vmatmul.mubr.f32.vlgmr.msra.gmra.mrb[10].mxu1 %v5859_v23 }
 0x8c6   : > { %19481 = vmatprep.mubr.f32.mxu1 %v5869_v41  ;;  %20597 = vmatpush3.bf16.msra.mxu1 %v20594_v56 }
 0x8c7   : > { %20599 = vmatprep.subr.bf16.mxu1 %v20598_v52 }
 0x8c9   : > { %19482 = vmatmul.mubr.f32.gmra.mrb[12].mxu1 %v5879_v37 }
 0x8ca   : > { %20601 = vmatpush3.bf16.msra.mxu1 %v20598_v52  ;;  %19492 = vmatprep.mubr.f32.mxu1 %v22621_v60 }
 0x8cb   : > { %20603 = vmatprep.subr.bf16.mxu1 %v22612_v11 }
 0x8cd   : > { %19493 = vmatmul.mubr.f32.vlgmr.msra.gmra.mrb[10].mxu1 %v5857_v21 }
 0x8ce   : > { %19495 = vmatprep.mubr.f32.mxu1 %v5867_v33  ;;  %20605 = vmatpush3.bf16.msra.mxu1 %v22612_v11 }
 0x8cf   : > { %20607 = vmatprep.subr.bf16.mxu1 %v22616_v61 }
 0x8d1   : > { %19496 = vmatmul.mubr.f32.gmra.mrb[12].mxu1 %v5877_v29 }
 0x8d2   : > { %20609 = vmatpush3.bf16.msra.mxu1 %v22616_v61  ;;  %19506 = vmatprep.mubr.f32.mxu1 %v22621_v60 }
 0x8d5   : > { %19507 = vmatmul.mubr.f32.vlgmr.msra.gmra.mrb[10].mxu1 %v5857_v21 }
 0x8d6   : > { %19509 = vmatprep.mubr.f32.mxu1 %v5867_v33 }
 0x8d9   : > { %19510 = vmatmul.mubr.f32.gmra.mrb[12].mxu1 %v5877_v29 }
 0x9a8   : > { %v19508_v46 = vpop.f32.mrb[10].mxu1 }
 0x9a9   : > { %v20913_v48 = vadd.f32 %v19508_v46, %v18320_v42  ;;  %v6370_v50 = vpop.f32.mrb[11].mxu1 }
 0x9aa   : > { %v20914_v56 = vadd.f32 %v18320_v42, %v6370_v50 }
 0x9ab   : > { %v6393_v47 = vmax.f32 %v20913_v48, 0.0 }
 0x9ac   : > { %v6392_v11 = vmax.f32 %v20914_v56, 0.0  ;;  %v19511_v52 = vpop.f32.mrb[12].mxu1  ;;  %v6470_v56 = vld [vmem:[#allocation10] sm:$0xff] }
 0x9ad   : > { %v20915_v62 = vadd.f32 %v19511_v52, %v18320_v42  ;;  %v6382_v5 = vpop.f32.mrb[13].mxu1  ;;  %v6398_v61 = vadd.f32 %v6393_v47, %v22296_v59  ;;  %v6471_v47 = vld [vmem:[#allocation10 + $0x8] sm:$0xff]  ;;  %v6494_v52 = vand.u32 4294901760, %v6470_v56 }
 0x9ae   : > { %v20916_v17 = vadd.f32 %v18320_v42, %v6382_v5  ;;  %v6397_v60 = vadd.f32 %v6392_v11, %v22271_v51  ;;  %v6472_v11 = vld [vmem:[#allocation10 + $0x10] sm:$0xff]  ;;  %v6473_v5 = vld [vmem:[#allocation10 + $0x18] sm:$0xff] }
 0x9af   : > { %v6395_v18 = vmax.f32 %v20915_v62, 0.0  ;;  %v6404_v9 = vsel %vm1463_vm10, %v6398_v61, 0.0  ;;  %v6497_v62 = vand.u32 4294901760, %v6471_v47 }
 0x9b0   : > { %v6394_v20 = vmax.f32 %v20916_v17, 0.0  ;;  %6405 = vadd.xlane.f32.xlu0 %v6404_v9  ;;  %v6401_v21 = vsel %vm1463_vm10, %v6397_v60, 0.0  ;;  %v6503_v17 = vand.u32 4294901760, %v6473_v5  ;;  %v6604_v9 = vsub.f32 %v6470_v56, %v6494_v52 }
 0x9b1   : > { %6402 = vadd.xlane.f32.xlu1 %v6401_v21  ;;  %v6400_v12 = vadd.f32 %v6395_v18, %v22314_v8 }
 0x9b2   : > { %v6399_v23 = vadd.f32 %v6394_v20, %v22294_v58  ;;  %v6611_v20 = vsub.f32 %v6471_v47, %v6497_v62  ;;  %v6605_v21 = vand.u32 4294901760, %v6604_v9 }
 0x9b3   : > { %v6410_v22 = vsel %vm1463_vm10, %v6400_v12, 0.0 }
 0x9b4   : > { %v6407_v27 = vsel %vm1463_vm10, %v6399_v23, 0.0 }
 0x9b5   : > { %6408 = vadd.xlane.f32.xlu0 %v6407_v27  ;;  %6411 = vadd.xlane.f32.xlu1 %v6410_v22 }
 0xa3d   : > { %v6406_v36 = vpop.xlane.xlu0 %6405 }
 0xa3e   : > { %v6415_v25 = vmul.f32 0.03125, %v6406_v36  ;;  %v6403_v28 = vpop.xlane.xlu1 %6402  ;;  %v6625_v36 = vsub.f32 %v6473_v5, %v6503_v17 }
 0xa3f   : > { %v6414_v29 = vmul.f32 0.03125, %v6403_v28 }
 0xa40   : > { %v22649_v1 = vsub.f32 %v6398_v61, %v6415_v25  ;;  %v6500_v61 = vand.u32 4294901760, %v6472_v11 }
 0xa41   : > { %v22651_v30 = vsub.f32 %v6397_v60, %v6414_v29  ;;  %v22669_v60 = vpack.c.bf16 %v6497_v62, %v6494_v52 }
 0xa42   : > { %v6409_v31 = vpop.xlane.xlu0 %6408  ;;  %v6412_v32 = vpop.xlane.xlu1 %6411  ;;  %v6423_v33 = vmul.f32 %v22649_v1, %v22649_v1  ;;  %v22671_v18 = vpack.c.bf16 %v6503_v17, %v6500_v61  ;;  %v6618_v27 = vsub.f32 %v6472_v11, %v6500_v61 }
 0xa43   : > { %v6416_v37 = vmul.f32 0.03125, %v6409_v31  ;;  %v6417_v45 = vmul.f32 0.03125, %v6412_v32  ;;  %v6422_v41 = vmul.f32 %v22651_v30, %v22651_v30  ;;  %20611 = vmatprep.subr.bf16.mxu0 %v22669_v60  ;;  %v6626_v31 = vand.u32 4294901760, %v6625_v36 }
 0xa44   : > { %v6429_v44 = vsel %vm1463_vm10, %v6423_v33, 0.0  ;;  %20613 = vmatpush3.bf16.msra.mxu0 %v22669_v60  ;;  %v6619_v29 = vand.u32 4294901760, %v6618_v27 }
 0xa45   : > { %v22658_v49 = vsub.f32 %v6399_v23, %v6416_v37  ;;  %v22660_v39 = vsub.f32 %v6400_v12, %v6417_v45  ;;  %6430 = vadd.xlane.f32.xlu1 %v6429_v44  ;;  %v6426_v24 = vsel %vm1463_vm10, %v6422_v41, 0.0  ;;  %v6612_v12 = vand.u32 4294901760, %v6611_v20  ;;  %20615 = vmatprep.subr.bf16.mxu0 %v22671_v18 }
 0xa46   : > { %6427 = vadd.xlane.f32.xlu0 %v6426_v24  ;;  %v6606_v23 = vsub.f32 %v6604_v9, %v6605_v21  ;;  %v6620_v33 = vsub.f32 %v6618_v27, %v6619_v29  ;;  %v6627_v37 = vsub.f32 %v6625_v36, %v6626_v31  ;;  %v22682_v24 = vpack.c.bf16 %v6611_v20, %v6604_v9 }
 0xa47   : > { %v6424_v42 = vmul.f32 %v22658_v49, %v22658_v49  ;;  %v6425_v46 = vmul.f32 %v22660_v39, %v22660_v39  ;;  %v6613_v22 = vsub.f32 %v6611_v20, %v6612_v12 }
 0xa48   : > { %20617 = vmatpush3.bf16.msra.mxu0 %v22671_v18  ;;  %v6607_v25 = vand.u32 4294901760, %v6606_v23  ;;  %v6621_v45 = vand.u32 4294901760, %v6620_v33  ;;  %v6628_v41 = vand.u32 4294901760, %v6627_v37 }
 0xa49   : > { %v6432_v48 = vsel %vm1463_vm10, %v6424_v42, 0.0  ;;  %v6435_v50 = vsel %vm1463_vm10, %v6425_v46, 0.0  ;;  %v6614_v28 = vand.u32 4294901760, %v6613_v22  ;;  %v22684_v42 = vpack.c.bf16 %v6625_v36, %v6618_v27 }
 0xa4a   : > { %6433 = vadd.xlane.f32.xlu0 %v6432_v48  ;;  %6436 = vadd.xlane.f32.xlu1 %v6435_v50  ;;  %v22680_v44 = vpack.c.bf16 %v6628_v41, %v6621_v45  ;;  %v22686_v46 = vpack.c.bf16 %v6612_v12, %v6605_v21  ;;  %v22688_v48 = vpack.c.bf16 %v6626_v31, %v6619_v29  ;;  %v6396_v21 = vld [vmem:[%s23894_s12] sm:$0xf] }
 0xa4b   : > { %v22677_v32 = vpack.c.bf16 %v6614_v28, %v6607_v25  ;;  %v6457_v12 = vrot.slane %v6396_v21, %v22137_v35  ;;  %v6465_v36 = vrot.slane %v6396_v21, %v22141_v38 }
 0xa4d   : > { %20619 = vmatprep.subr.bf16.mxu0 %v22677_v32 }
 0xad2   : > { %v6431_v50 = vpop.xlane.xlu1 %6430 }
 0xad3   : > { %v6439_v56 = vmul.f32 0.03125, %v6431_v50  ;;  %v6428_v47 = vpop.xlane.xlu0 %6427 }
 0xad4   : > { %v6438_v11 = vmul.f32 0.03125, %v6428_v47 }
 0xad5   : > { %v6443_v52 = vadd.f32 1e-05, %v6439_v56 }
 0xad6   : > { %v6442_v62 = vadd.f32 1e-05, %v6438_v11 }
 0xad7   : > { %21463 = vrsqrt.f32 %v6443_v52  ;;  %v6434_v5 = vpop.xlane.xlu0 %6433  ;;  %v6437_v61 = vpop.xlane.xlu1 %6436 }
 0xad8   : > { %21465 = vrsqrt.f32 %v6442_v62  ;;  %v6440_v17 = vmul.f32 0.03125, %v6434_v5  ;;  %v6441_v23 = vmul.f32 0.03125, %v6437_v61 }
 0xada   : > { %v6444_v9 = vadd.f32 1e-05, %v6440_v17  ;;  %v6445_v20 = vadd.f32 1e-05, %v6441_v23 }
 0xadc   : > { %21467 = vrsqrt.f32 %v6444_v9 }
 0xadd   : > { %21469 = vrsqrt.f32 %v6445_v20 }
 0xae1   : > { %v21464_v22 = vpop.eup %21463 }
 0xae2   : > { %v21466_v27 = vpop.eup %21465  ;;  %v6451_v25 = vmul.f32 %v21464_v22, %v22649_v1 }
 0xae3   : > { %v6450_v28 = vmul.f32 %v21466_v27, %v22651_v30 }
 0xae4   : > { %v6459_v29 = vmul.f32 %v6457_v12, %v6451_v25 }
 0xae5   : > { %v6458_v31 = vmul.f32 %v6457_v12, %v6450_v28 }
 0xae6   : > { %v21468_v33 = vpop.eup %21467  ;;  %v22697_v37 = vadd.f32 %v6465_v36, %v6459_v29 }
 0xae7   : > { %v21470_v45 = vpop.eup %21469  ;;  %v6452_v41 = vmul.f32 %v21468_v33, %v22658_v49  ;;  %v22700_v50 = vadd.f32 %v6465_v36, %v6458_v31 }
 0xae8   : > { %v6453_v56 = vmul.f32 %v21470_v45, %v22660_v39  ;;  %v6485_v47 = vsel %vm1463_vm10, %v22697_v37, 0 }
 0xae9   : > { %v6482_v1 = vsel %vm1463_vm10, %v22700_v50, 0  ;;  %v22707_v11 = vand.u32 4294901760, %v6485_v47  ;;  %v6460_v30 = vmul.f32 %v6457_v12, %v6452_v41 }
 0xaea   : > { %v22709_v52 = vand.u32 4294901760, %v6482_v1  ;;  %v6461_v62 = vmul.f32 %v6457_v12, %v6453_v56 }
 0xaeb   : > { %v6573_v5 = vsub.f32 %v6485_v47, %v22707_v11  ;;  %v22712_v61 = vadd.f32 %v6465_v36, %v6460_v30  ;;  %v7824_v30 = vld [vmem:[#allocation7 + $0x38] sm:$0xff] }
 0xaec   : > { %v6563_v49 = vsub.f32 %v6482_v1, %v22709_v52  ;;  %v22715_v17 = vadd.f32 %v6465_v36, %v6461_v62 }
 0xaed   : > { %v6574_v39 = vand.u32 4294901760, %v6573_v5  ;;  %v6488_v23 = vsel %vm1463_vm10, %v22712_v61, 0 }
 0xaee   : > { %v6564_v9 = vand.u32 4294901760, %v6563_v49  ;;  %v22719_v20 = vand.u32 4294901760, %v6488_v23  ;;  %v6491_v21 = vsel %vm1463_vm10, %v22715_v17, 0 }
 0xaef   : > { %v6575_v22 = vsub.f32 %v6573_v5, %v6574_v39  ;;  %v22723_v12 = vand.u32 4294901760, %v6491_v21 }
 0xaf0   : > { %v6565_v27 = vsub.f32 %v6563_v49, %v6564_v9  ;;  %v6583_v25 = vsub.f32 %v6488_v23, %v22719_v20 }
 0xaf1   : > { %v6593_v28 = vsub.f32 %v6491_v21, %v22723_v12  ;;  %v6576_v31 = vand.u32 4294901760, %v6575_v22 }
 0xaf2   : > { %v6566_v36 = vand.u32 4294901760, %v6565_v27  ;;  %v6584_v29 = vand.u32 4294901760, %v6583_v25 }
 0xaf3   : > { %v6594_v33 = vand.u32 4294901760, %v6593_v28 }
 0xaf4   : > { %19520 = vmatprep.mubr.f32.mxu0 %v6566_v36  ;;  %v6585_v45 = vsub.f32 %v6583_v25, %v6584_v29 }
 0xaf5   : > { %19521 = vmatmul.mubr.f32.vlgmr.msra.gmra.mrb[18].mxu0 %v6576_v31  ;;  %v6595_v41 = vsub.f32 %v6593_v28, %v6594_v33 }
 0xaf6   : > { %20621 = vmatpush3.bf16.msra.mxu0 %v22677_v32  ;;  %v6586_v56 = vand.u32 4294901760, %v6585_v45  ;;  %v7821_v32 = vld [vmem:[#allocation7 + $0x20] sm:$0xff] }
 0xaf7   : > { %v6596_v47 = vand.u32 4294901760, %v6595_v41  ;;  %20623 = vmatprep.subr.bf16.mxu0 %v22680_v44 }
 0xaf8   : > { %19523 = vmatprep.mubr.f32.mxu0 %v6586_v56 }
 0xaf9   : > { %19524 = vmatmul.mubr.f32.gmra.mrb[20].mxu0 %v6596_v47 }
 0xafa   : > { %20625 = vmatpush3.bf16.msra.mxu0 %v22680_v44  ;;  %19534 = vmatprep.mubr.f32.mxu0 %v22709_v52  ;;  %v7822_v44 = vld [vmem:[#allocation7 + $0x28] sm:$0xff] }
 0xafb   : > { %20627 = vmatprep.subr.bf16.mxu0 %v22682_v24  ;;  %v7837_v1 = vand.u32 4294901760, %v7822_v44 }
 0xafd   : > { %19535 = vmatmul.mubr.f32.vlgmr.msra.gmra.mrb[18].mxu0 %v22707_v11  ;;  %v7951_v23 = vsub.f32 %v7822_v44, %v7837_v1 }
 0xafe   : > { %19537 = vmatprep.mubr.f32.mxu0 %v22719_v20  ;;  %20629 = vmatpush3.bf16.msra.mxu0 %v22682_v24  ;;  %v7834_v24 = vand.u32 4294901760, %v7821_v32 }
 0xaff   : > { %20631 = vmatprep.subr.bf16.mxu0 %v22684_v42 }
 0xb01   : > { %19538 = vmatmul.mubr.f32.gmra.mrb[20].mxu0 %v22723_v12 }
 0xb02   : > { %20633 = vmatpush3.bf16.msra.mxu0 %v22684_v42  ;;  %19548 = vmatprep.mubr.f32.mxu0 %v6563_v49  ;;  %v7823_v42 = vld [vmem:[#allocation7 + $0x30] sm:$0xff]  ;;  %v22745_v49 = vsub.f32 %v7821_v32, %v7834_v24 }
 0xb03   : > { %20635 = vmatprep.subr.bf16.mxu0 %v22669_v60  ;;  %v7840_v62 = vand.u32 4294901760, %v7823_v42 }
 0xb05   : > { %19549 = vmatmul.mubr.f32.vlgmr.msra.gmra.mrb[18].mxu0 %v6573_v5  ;;  %v7843_v5 = vand.u32 4294901760, %v7824_v30  ;;  %v7958_v21 = vsub.f32 %v7823_v42, %v7840_v62 }
 0xb06   : > { %19551 = vmatprep.mubr.f32.mxu0 %v6583_v25  ;;  %20637 = vmatpush3.bf16.msra.mxu0 %v22669_v60 }
 0xb07   : > { %20639 = vmatprep.subr.bf16.mxu0 %v22671_v18  ;;  %v7965_v22 = vsub.f32 %v7824_v30, %v7843_v5  ;;  %v7959_v25 = vand.u32 4294901760, %v7958_v21  ;;  %v20710_v36 = vpack.c.bf16 %v7843_v5, %v7840_v62 }
 0xb09   : > { %19552 = vmatmul.mubr.f32.gmra.mrb[20].mxu0 %v6593_v28  ;;  %v7966_v28 = vand.u32 4294901760, %v7965_v22  ;;  %v7960_v31 = vsub.f32 %v7958_v21, %v7959_v25 }
 0xb0a   : > { %20641 = vmatpush3.bf16.msra.mxu0 %v22671_v18  ;;  %19562 = vmatprep.mubr.f32.mxu0 %v6564_v9  ;;  %v7945_v9 = vand.u32 4294901760, %v22745_v49 }
 0xb0b   : > { %20643 = vmatprep.subr.bf16.mxu0 %v22686_v46  ;;  %v7961_v41 = vand.u32 4294901760, %v7960_v31 }
 0xb0d   : > { %19563 = vmatmul.mubr.f32.vlgmr.msra.gmra.mrb[18].mxu0 %v6574_v39  ;;  %v7952_v39 = vand.u32 4294901760, %v7951_v23 }
 0xb0e   : > { %19565 = vmatprep.mubr.f32.mxu0 %v6584_v29  ;;  %20645 = vmatpush3.bf16.msra.mxu0 %v22686_v46  ;;  %v22754_v46 = vpack.c.bf16 %v7837_v1, %v7834_v24 }
 0xb0f   : > { %20647 = vmatprep.subr.bf16.mxu0 %v22688_v48  ;;  %v7953_v27 = vsub.f32 %v7951_v23, %v7952_v39 }
 0xb11   : > { %19566 = vmatmul.mubr.f32.gmra.mrb[20].mxu0 %v6594_v33  ;;  %v7967_v33 = vsub.f32 %v7965_v22, %v7966_v28 }
 0xb12   : > { %20649 = vmatpush3.bf16.msra.mxu0 %v22688_v48  ;;  %19576 = vmatprep.mubr.f32.mxu0 %v22709_v52  ;;  %v7946_v48 = vsub.f32 %v22745_v49, %v7945_v9 }
 0xb13   : > { %20651 = vmatprep.subr.bf16.mxu0 %v22669_v60  ;;  %v7968_v56 = vand.u32 4294901760, %v7967_v33 }
 0xb14   : > { %v7947_v29 = vand.u32 4294901760, %v7946_v48  ;;  %v18321_v48 = vld [vmem:[%s23928_s29] ss:$0 sm:$0xff] }
 0xb15   : > { %19577 = vmatmul.mubr.f32.vlgmr.msra.gmra.mrb[18].mxu0 %v22707_v11 }
 0xb16   : > { %19579 = vmatprep.mubr.f32.mxu0 %v22719_v20  ;;  %20653 = vmatpush3.bf16.msra.mxu0 %v22669_v60  ;;  %v7954_v60 = vand.u32 4294901760, %v7953_v27 }
 0xb17   : > { %20655 = vmatprep.subr.bf16.mxu0 %v22671_v18 }
 0xb18   : > { %v20714_v45 = vpack.c.bf16 %v7954_v60, %v7947_v29 }
 0xb19   : > { %19580 = vmatmul.mubr.f32.gmra.mrb[20].mxu0 %v22723_v12 }
 0xb1a   : > { %20657 = vmatpush3.bf16.msra.mxu0 %v22671_v18  ;;  %19590 = vmatprep.mubr.f32.mxu0 %v22709_v52  ;;  %v20718_v18 = vpack.c.bf16 %v7968_v56, %v7961_v41  ;;  %v20726_v52 = vpack.c.bf16 %v7965_v22, %v7958_v21 }
 0xb1b   : > { %20707 = vmatprep.subr.bf16.mxu0 %v22754_v46 }
 0xb1d   : > { %19591 = vmatmul.mubr.f32.vlgmr.msra.gmra.mrb[18].mxu0 %v22707_v11  ;;  %v20722_v11 = vpack.c.bf16 %v7951_v23, %v22745_v49 }
 0xb1e   : > { %19593 = vmatprep.mubr.f32.mxu0 %v22719_v20  ;;  %20709 = vmatpush3.bf16.msra.mxu0 %v22754_v46 }
 0xb1f   : > { %20711 = vmatprep.subr.bf16.mxu0 %v20710_v36 }
 0xb21   : > { %19594 = vmatmul.mubr.f32.gmra.mrb[20].mxu0 %v22723_v12 }
 0xb22   : > { %20713 = vmatpush3.bf16.msra.mxu0 %v20710_v36  ;;  %19688 = vmatprep.mubr.f32.mxu0 %v22291_v57  ;;  %v20738_v57 = vpack.c.bf16 %v7952_v39, %v7945_v9 }
 0xb23   : > { %20715 = vmatprep.subr.bf16.mxu0 %v20714_v45 }
 0xb25   : > { %19689 = vmatmul.mubr.f32.vlgmr.msra.gmra.mrb[22].mxu0 %v22337_v2  ;;  %v20742_v2 = vpack.c.bf16 %v7966_v28, %v7959_v25 }
 0xb26   : > { %19691 = vmatprep.mubr.f32.mxu0 %v22340_v3  ;;  %20717 = vmatpush3.bf16.msra.mxu0 %v20714_v45  ;;  %v7114_v3 = vld [vmem:[#allocation11 + $0x18] sm:$0xff] }
 0xb27   : > { %20719 = vmatprep.subr.bf16.mxu0 %v20718_v18 }
 0xb29   : > { %19692 = vmatmul.mubr.f32.gmra.mrb[24].mxu0 %v22353_v19 }
 0xb2a   : > { %20721 = vmatpush3.bf16.msra.mxu0 %v20718_v18  ;;  %19702 = vmatprep.mubr.f32.mxu0 %v22279_v53 }
 0xb2b   : > { %20723 = vmatprep.subr.bf16.mxu0 %v20722_v11 }
 0xb2d   : > { %19703 = vmatmul.mubr.f32.vlgmr.msra.gmra.mrb[22].mxu0 %v22304_v4 }
 0xb2e   : > { %19705 = vmatprep.mubr.f32.mxu0 %v22302_v63  ;;  %20725 = vmatpush3.bf16.msra.mxu0 %v20722_v11 }
 0xb2f   : > { %20727 = vmatprep.subr.bf16.mxu0 %v20726_v52 }
 0xb31   : > { %19706 = vmatmul.mubr.f32.gmra.mrb[24].mxu0 %v22320_v13 }
 0xb32   : > { %20729 = vmatpush3.bf16.msra.mxu0 %v20726_v52  ;;  %19716 = vmatprep.mubr.f32.mxu0 %v22283_v54  ;;  %v7111_v54 = vld [vmem:[#allocation11] sm:$0xff] }
 0xb33   : > { %20731 = vmatprep.subr.bf16.mxu0 %v22754_v46 }
 0xb35   : > { %19717 = vmatmul.mubr.f32.vlgmr.msra.gmra.mrb[22].mxu0 %v22312_v7 }
 0xb36   : > { %19719 = vmatprep.mubr.f32.mxu0 %v22309_v6  ;;  %20733 = vmatpush3.bf16.msra.mxu0 %v22754_v46  ;;  %v7135_v6 = vand.u32 4294901760, %v7111_v54 }
 0xb37   : > { %20735 = vmatprep.subr.bf16.mxu0 %v20710_v36 }
 0xb39   : > { %19720 = vmatmul.mubr.f32.gmra.mrb[24].mxu0 %v22329_v16 }
 0xb3a   : > { %20737 = vmatpush3.bf16.msra.mxu0 %v20710_v36  ;;  %19730 = vmatprep.mubr.f32.mxu0 %v22287_v55  ;;  %v7112_v55 = vld [vmem:[#allocation11 + $0x8] sm:$0xff] }
 0xb3b   : > { %20739 = vmatprep.subr.bf16.mxu0 %v20738_v57  ;;  %v7138_v7 = vand.u32 4294901760, %v7112_v55 }
 0xb3d   : > { %19731 = vmatmul.mubr.f32.vlgmr.msra.gmra.mrb[22].mxu0 %v22323_v14  ;;  %v22798_v14 = vpack.c.bf16 %v7138_v7, %v7135_v6  ;;  %v7252_v16 = vsub.f32 %v7112_v55, %v7138_v7 }
 0xb3e   : > { %19733 = vmatprep.mubr.f32.mxu0 %v22326_v15  ;;  %20741 = vmatpush3.bf16.msra.mxu0 %v20738_v57  ;;  %v7245_v15 = vsub.f32 %v7111_v54, %v7135_v6 }
 0xb3f   : > { %20743 = vmatprep.subr.bf16.mxu0 %v20742_v2  ;;  %20659 = vmatprep.subr.bf16.mxu1 %v22798_v14  ;;  %v7253_v19 = vand.u32 4294901760, %v7252_v16 }
 0xb40   : > { %20661 = vmatpush3.bf16.msra.mxu1 %v22798_v14  ;;  %v20674_v39 = vpack.c.bf16 %v7252_v16, %v7245_v15 }
 0xb41   : > { %19734 = vmatmul.mubr.f32.gmra.mrb[24].mxu0 %v22343_v10  ;;  %v7144_v10 = vand.u32 4294901760, %v7114_v3  ;;  %v7254_v12 = vsub.f32 %v7252_v16, %v7253_v19 }
 0xb42   : > { %20745 = vmatpush3.bf16.msra.mxu0 %v20742_v2  ;;  %19744 = vmatprep.mubr.f32.mxu0 %v22279_v53 }
 0xb43   : > { %20747 = vmatprep.subr.bf16.mxu0 %v22754_v46  ;;  %v7266_v32 = vsub.f32 %v7114_v3, %v7144_v10  ;;  %v7255_v24 = vand.u32 4294901760, %v7254_v12 }
 0xb45   : > { %19745 = vmatmul.mubr.f32.vlgmr.msra.gmra.mrb[22].mxu0 %v22304_v4  ;;  %v7267_v42 = vand.u32 4294901760, %v7266_v32 }
 0xb46   : > { %19747 = vmatprep.mubr.f32.mxu0 %v22302_v63  ;;  %20749 = vmatpush3.bf16.msra.mxu0 %v22754_v46 }
 0xb47   : > { %20751 = vmatprep.subr.bf16.mxu0 %v20710_v36  ;;  %v7268_v5 = vsub.f32 %v7266_v32, %v7267_v42 }
 0xb49   : > { %19748 = vmatmul.mubr.f32.gmra.mrb[24].mxu0 %v22320_v13  ;;  %v7269_v23 = vand.u32 4294901760, %v7268_v5 }
 0xb4a   : > { %20753 = vmatpush3.bf16.msra.mxu0 %v20710_v36  ;;  %19758 = vmatprep.mubr.f32.mxu0 %v22279_v53  ;;  %v7113_v53 = vld [vmem:[#allocation11 + $0x10] sm:$0xff] }
 0xb4b   : > { %19794 = vmatprep.subr.mxu0 %v21762_v0 }
 0xb4d   : > { %19759 = vmatmul.mubr.f32.vlgmr.msra.gmra.mrb[22].mxu0 %v22304_v4  ;;  %v7141_v4 = vand.u32 4294901760, %v7113_v53 }
 0xb4e   : > { %19761 = vmatprep.mubr.f32.mxu0 %v22302_v63  ;;  %v7246_v63 = vand.u32 4294901760, %v7245_v15 }
 0xb4f   : > { %v7259_v47 = vsub.f32 %v7113_v53, %v7141_v4 }
 0xb50   : > { %v7247_v20 = vsub.f32 %v7245_v15, %v7246_v63  ;;  %v22806_v22 = vpack.c.bf16 %v7253_v19, %v7246_v63 }
 0xb51   : > { %19762 = vmatmul.mubr.f32.gmra.mrb[24].mxu0 %v22320_v13  ;;  %v22802_v13 = vpack.c.bf16 %v7144_v10, %v7141_v4  ;;  %v7260_v1 = vand.u32 4294901760, %v7259_v47  ;;  %v20678_v21 = vpack.c.bf16 %v7266_v32, %v7259_v47 }
 0xb52   : > { %19796 = vmatprep.mubr.msk.f32.mxu0 %vm21761_vm1, %v21762_v0  ;;  %v7248_v44 = vand.u32 4294901760, %v7247_v20 }
 0xb53   : > { %20663 = vmatprep.subr.bf16.mxu1 %v22802_v13  ;;  %v7261_v62 = vsub.f32 %v7259_v47, %v7260_v1  ;;  %v22808_v46 = vpack.c.bf16 %v7267_v42, %v7260_v1 }
 0xb54   : > { %20665 = vmatpush3.bf16.msra.mxu1 %v22802_v13  ;;  %v20666_v30 = vpack.c.bf16 %v7255_v24, %v7248_v44 }
 0xb55   : > { %v7262_v49 = vand.u32 4294901760, %v7261_v62 }
 0xb56   : > { %20667 = vmatprep.subr.bf16.mxu1 %v20666_v30 }
 0xb57   : > { %v20670_v9 = vpack.c.bf16 %v7269_v23, %v7262_v49 }
 0xbf0   : > { %v19592_v27 = vpop.f32.mrb[18].mxu0 }
 0xbf1   : > { %v20917_v25 = vadd.f32 %v19592_v27, %v18321_v48  ;;  %v7085_v28 = vpop.f32.mrb[19].mxu0 }
 0xbf2   : > { %v20918_v36 = vadd.f32 %v18321_v48, %v7085_v28 }
 0xbf3   : > { %v7108_v29 = vmax.f32 %v20917_v25, 0.0 }
 0xbf4   : > { %v7107_v60 = vmax.f32 %v20918_v36, 0.0  ;;  %v19595_v31 = vpop.f32.mrb[20].mxu0 }
 0xbf5   : > { %v7126_v33 = vsel %vm1463_vm10, %v7108_v29, 0  ;;  %v20919_v45 = vadd.f32 %v19595_v31, %v18321_v48  ;;  %v7097_v41 = vpop.f32.mrb[21].mxu0 }
 0xbf6   : > { %v22814_v56 = vand.u32 4294901760, %v7126_v33  ;;  %v7123_v18 = vsel %vm1463_vm10, %v7107_v60, 0  ;;  %v20920_v11 = vadd.f32 %v18321_v48, %v7097_v41 }
 0xbf7   : > { %v22817_v52 = vand.u32 4294901760, %v7123_v18  ;;  %v7110_v57 = vmax.f32 %v20919_v45, 0.0 }
 0xbf8   : > { %v7214_v2 = vsub.f32 %v7126_v33, %v22814_v56  ;;  %v7109_v54 = vmax.f32 %v20920_v11, 0.0 }
 0xbf9   : > { %v7204_v55 = vsub.f32 %v7123_v18, %v22817_v52  ;;  %v7132_v6 = vsel %vm1463_vm10, %v7110_v57, 0 }
 0xbfa   : > { %v7215_v7 = vand.u32 4294901760, %v7214_v2  ;;  %v22822_v15 = vand.u32 4294901760, %v7132_v6  ;;  %v7129_v16 = vsel %vm1463_vm10, %v7109_v54, 0 }
 0xbfb   : > { %v22825_v53 = vand.u32 4294901760, %v7129_v16  ;;  %v7205_v3 = vand.u32 4294901760, %v7204_v55 }
 0xbfc   : > { %v7216_v4 = vsub.f32 %v7214_v2, %v7215_v7  ;;  %v7234_v10 = vsub.f32 %v7132_v6, %v22822_v15 }
 0xbfd   : > { %v7224_v63 = vsub.f32 %v7129_v16, %v22825_v53  ;;  %v7206_v19 = vsub.f32 %v7204_v55, %v7205_v3 }
 0xbfe   : > { %v7235_v20 = vand.u32 4294901760, %v7234_v10  ;;  %v7217_v32 = vand.u32 4294901760, %v7216_v4 }
 0xbff   : > { %v7207_v12 = vand.u32 4294901760, %v7206_v19  ;;  %v7225_v47 = vand.u32 4294901760, %v7224_v63 }
 0xc00   : > { %v7236_v44 = vsub.f32 %v7234_v10, %v7235_v20 }
 0xc01   : > { %19604 = vmatprep.mubr.f32.mxu1 %v7207_v12  ;;  %v7226_v24 = vsub.f32 %v7224_v63, %v7225_v47 }
 0xc02   : > { %19605 = vmatmul.mubr.f32.vlgmr.msra.gmra.mrb[14].mxu1 %v7217_v32  ;;  %v7237_v42 = vand.u32 4294901760, %v7236_v44 }
 0xc03   : > { %20669 = vmatpush3.bf16.msra.mxu1 %v20666_v30  ;;  %v7227_v1 = vand.u32 4294901760, %v7226_v24  ;;  %v18324_v30 = vld [vmem:[%s23890_s8 + $0x1] ss:$0 sm:$0xff] }
 0xc04   : > { %20671 = vmatprep.subr.bf16.mxu1 %v20670_v9 }
 0xc05   : > { %19607 = vmatprep.mubr.f32.mxu1 %v7227_v1 }
 0xc06   : > { %19608 = vmatmul.mubr.f32.gmra.mrb[16].mxu1 %v7237_v42 }
 0xc07   : > { %20673 = vmatpush3.bf16.msra.mxu1 %v20670_v9  ;;  %19618 = vmatprep.mubr.f32.mxu1 %v22817_v52 }
 0xc08   : > { %20675 = vmatprep.subr.bf16.mxu1 %v20674_v39 }
 0xc0a   : > { %19619 = vmatmul.mubr.f32.vlgmr.msra.gmra.mrb[14].mxu1 %v22814_v56 }
 0xc0b   : > { %19621 = vmatprep.mubr.f32.mxu1 %v22825_v53  ;;  %20677 = vmatpush3.bf16.msra.mxu1 %v20674_v39 }
 0xc0c   : > { %20679 = vmatprep.subr.bf16.mxu1 %v20678_v21 }
 0xc0e   : > { %19622 = vmatmul.mubr.f32.gmra.mrb[16].mxu1 %v22822_v15 }
 0xc0f   : > { %20681 = vmatpush3.bf16.msra.mxu1 %v20678_v21  ;;  %19632 = vmatprep.mubr.f32.mxu1 %v7204_v55 }
 0xc10   : > { %20683 = vmatprep.subr.bf16.mxu1 %v22798_v14 }
 0xc12   : > { %19633 = vmatmul.mubr.f32.vlgmr.msra.gmra.mrb[14].mxu1 %v7214_v2 }
 0xc13   : > { %19635 = vmatprep.mubr.f32.mxu1 %v7224_v63  ;;  %20685 = vmatpush3.bf16.msra.mxu1 %v22798_v14 }
 0xc14   : > { %20687 = vmatprep.subr.bf16.mxu1 %v22802_v13 }
 0xc16   : > { %19636 = vmatmul.mubr.f32.gmra.mrb[16].mxu1 %v7234_v10 }
 0xc17   : > { %20689 = vmatpush3.bf16.msra.mxu1 %v22802_v13  ;;  %19646 = vmatprep.mubr.f32.mxu1 %v7205_v3 }
 0xc18   : > { %20691 = vmatprep.subr.bf16.mxu1 %v22806_v22 }
 0xc1a   : > { %19647 = vmatmul.mubr.f32.vlgmr.msra.gmra.mrb[14].mxu1 %v7215_v7 }
 0xc1b   : > { %19649 = vmatprep.mubr.f32.mxu1 %v7225_v47  ;;  %20693 = vmatpush3.bf16.msra.mxu1 %v22806_v22 }
 0xc1c   : > { %20695 = vmatprep.subr.bf16.mxu1 %v22808_v46 }
 0xc1e   : > { %19650 = vmatmul.mubr.f32.gmra.mrb[16].mxu1 %v7235_v20 }
 0xc1f   : > { %20697 = vmatpush3.bf16.msra.mxu1 %v22808_v46  ;;  %19660 = vmatprep.mubr.f32.mxu1 %v22817_v52 }
 0xc20   : > { %v19760_v62 = vpop.f32.mrb[22].mxu0  ;;  %20699 = vmatprep.subr.bf16.mxu1 %v22798_v14 }
 0xc21   : > { %v22846_v5 = vadd.f32 %v19760_v62, %v18324_v30  ;;  %v8425_v49 = vpop.f32.mrb[23].mxu0 }
 0xc22   : > { %v22848_v23 = vadd.f32 %v18324_v30, %v8425_v49  ;;  %19661 = vmatmul.mubr.f32.vlgmr.msra.gmra.mrb[14].mxu1 %v22814_v56 }
 0xc23   : > { %19663 = vmatprep.mubr.f32.mxu1 %v22825_v53  ;;  %20701 = vmatpush3.bf16.msra.mxu1 %v22798_v14  ;;  %v8476_v9 = vrot.slane %v22846_v5, 7  ;;  %v18334_v39 = vrot.slane %v22846_v5, 11  ;;  %v18328_v21 = vrot.slane %v22846_v5, 9  ;;  %v18339_v22 = vrot.slane %v22846_v5, 13 }
 0xc24   : > { %v19763_v46 = vpop.f32.mrb[24].mxu0  ;;  %20703 = vmatprep.subr.bf16.mxu1 %v22802_v13  ;;  %v8451_v48 = vrot.slane %v22848_v23, 1  ;;  %v8463_v27 = vrot.slane %v22848_v23, 4  ;;  %v8455_v25 = vrot.slane %v22848_v23, 2  ;;  %v8471_v28 = vrot.slane %v22848_v23, 6 }
 0xc25   : > { %v22862_v14 = vadd.f32 %v19763_v46, %v18324_v30  ;;  %v8437_v36 = vpop.f32.mrb[25].mxu0  ;;  %v8479_v29 = vsel %vm966_vm3, %v8476_v9, %v22848_v23  ;;  %v8459_v60 = vrot.slane %v22848_v23, 3  ;;  %v18331_v31 = vrot.slane %v22846_v5, 10 }
 0xc26   : > { %v20928_v33 = vadd.f32 %v18324_v30, %v8437_v36  ;;  %19664 = vmatmul.mubr.f32.gmra.mrb[16].mxu1 %v22822_v15  ;;  %v8935_v45 = vsel %vm966_vm3, %v22846_v5, %v8451_v48  ;;  %v10309_v41 = vsel %vm966_vm3, %v18334_v39, %v8463_v27  ;;  %v9393_v18 = vsel %vm966_vm3, %v18328_v21, %v8455_v25 }
 0xc27   : > { %20705 = vmatpush3.bf16.msra.mxu1 %v22802_v13  ;;  %19674 = vmatprep.mubr.f32.mxu1 %v22817_v52  ;;  %v8470_v11 = vrot.slane %v22862_v14, 5  ;;  %v18327_v57 = vrot.slane %v22862_v14, 6  ;;  %v18330_v2 = vrot.slane %v22862_v14, 7  ;;  %v18336_v16 = vrot.slane %v22862_v14, 9 }
 0xc28   : > { %v8473_v54 = vrot.slane %v20928_v33, 6  ;;  %v18326_v55 = vrot.slane %v20928_v33, 7  ;;  %v18335_v6 = vrot.slane %v20928_v33, 10  ;;  %v9395_v7 = vsel %vm968_vm4, %v20928_v33, %v9393_v18  ;;  %19764 = vmatprep.subr.mxu1 %v21762_v0 }
 0xc29   : > { %v22884_v3 = vsel %vm970_vm5, %v18330_v2, %v9395_v7  ;;  %v11225_v13 = vsel %vm966_vm3, %v18339_v22, %v8471_v28  ;;  %v9851_v52 = vsel %vm966_vm3, %v18331_v31, %v8459_v60  ;;  %v18340_v47 = vrot.slane %v22862_v14, 11 }
 0xc2a   : > { %19675 = vmatmul.mubr.f32.vlgmr.msra.gmra.mrb[14].mxu1 %v22814_v56  ;;  %v8480_v4 = vsel %vm968_vm4, %v8473_v54, %v8479_v29  ;;  %v8937_v10 = vsel %vm968_vm4, %v18326_v55, %v8935_v45  ;;  %v10311_v63 = vsel %vm968_vm4, %v18335_v6, %v10309_v41  ;;  %v11226_v56 = vrot.slane %v8473_v54, 6 }
 0xc2b   : > { %19677 = vmatprep.mubr.f32.mxu1 %v22825_v53  ;;  %v22894_v19 = vsel %vm970_vm5, %v8470_v11, %v8480_v4  ;;  %v22897_v20 = vsel %vm970_vm5, %v18327_v57, %v8937_v10  ;;  %v22900_v12 = vsel %vm970_vm5, %v18336_v16, %v10311_v63  ;;  %v18332_v32 = vrot.slane %v20928_v33, 9 }
 0xc2c   : > { %8482 = vrot.lane.b32.xlu0 %v22894_v19, %s21764_s26  ;;  %8940 = vrot.lane.b32.xlu1 %v22897_v20, %s21764_s26  ;;  %v11227_v53 = vsel %vm968_vm4, %v11226_v56, %v11225_v13  ;;  %v8467_v44 = vrot.slane %v22848_v23, 5  ;;  %v18337_v24 = vrot.slane %v22846_v5, 12  ;;  %v18338_v30 = vrot.slane %v20928_v33, 11 }
 0xc2d   : > { %v22918_v1 = vsel %vm970_vm5, %v18340_v47, %v11227_v53  ;;  %v10770_v39 = vrot.slane %v8470_v11, 5  ;;  %v8475_v21 = vrot.slane %v22848_v23, 7  ;;  %v11682_v46 = vrot.slane %v8476_v9, 7 }
 0xc2e   : > { %19678 = vmatmul.mubr.f32.gmra.mrb[16].mxu1 %v22822_v15  ;;  %v9853_v15 = vsel %vm968_vm4, %v18332_v32, %v9851_v52  ;;  %v10767_v42 = vsel %vm966_vm3, %v18337_v24, %v8467_v44  ;;  %v18341_v48 = vrot.slane %v20928_v33, 13  ;;  %v18342_v28 = vrot.slane %v22862_v14, 12 }
 0xc2f   : > { %19766 = vmatprep.mubr.msk.f32.mxu1 %vm21761_vm1, %v21762_v0  ;;  %v22924_v62 = vsel %vm970_vm5, %v22862_v14, %v9853_v15  ;;  %v10769_v49 = vsel %vm968_vm4, %v18338_v30, %v10767_v42  ;;  %v11683_v27 = vsel %vm966_vm3, %v11682_v46, %v8475_v21  ;;  %v8484_v5 = vsel %vm1463_vm10, %v22894_v19, 0 }
 0xc30   : > { %10314 = vrot.lane.b32.xlu0 %v22900_v12, %s21764_s26  ;;  %9398 = vrot.lane.b32.xlu1 %v22884_v3, %s21764_s26  ;;  %v22933_v22 = vsel %vm970_vm5, %v10770_v39, %v10769_v49  ;;  %v11685_v25 = vsel %vm968_vm4, %v18341_v48, %v11683_v27  ;;  %v8942_v9 = vsel %vm1463_vm10, %v22897_v20, 0  ;;  %v22951_v36 = vand.u32 4294901760, %v8484_v5 }
 0xc31   : > { %v22943_v23 = vsel %vm970_vm5, %v18342_v28, %v11685_v25  ;;  %v22953_v29 = vand.u32 4294901760, %v8942_v9  ;;  %v9400_v44 = vsel %vm1463_vm10, %v22884_v3, 0  ;;  %v9858_v24 = vsel %vm1463_vm10, %v22924_v62, 0 }
 0xc32   : > { %v8555_v14 = vsub.f32 %v8484_v5, %v22951_v36  ;;  %v22997_v30 = vand.u32 4294901760, %v9400_v44  ;;  %v22999_v49 = vand.u32 4294901760, %v9858_v24 }
 0xc33   : > { %v9013_v60 = vsub.f32 %v8942_v9, %v22953_v29 }
 0xc34   : > { %11230 = vrot.lane.b32.xlu0 %v22918_v1, %s21764_s26  ;;  %9856 = vrot.lane.b32.xlu1 %v22924_v62, %s21764_s26  ;;  %v8556_v31 = vand.u32 4294901760, %v8555_v14  ;;  %v9471_v46 = vsub.f32 %v9400_v44, %v22997_v30  ;;  %v9929_v48 = vsub.f32 %v9858_v24, %v22999_v49 }
 0xc35   : > { %v9014_v33 = vand.u32 4294901760, %v9013_v60 }
 0xc36   : > { %v8557_v18 = vsub.f32 %v8555_v14, %v8556_v31  ;;  %v9472_v28 = vand.u32 4294901760, %v9471_v46  ;;  %v9930_v5 = vand.u32 4294901760, %v9929_v48 }
 0xc37   : > { %v9015_v11 = vsub.f32 %v9013_v60, %v9014_v33 }
 0xc38   : > { %10772 = vrot.lane.b32.xlu1 %v22933_v22, %s21764_s26  ;;  %v8558_v16 = vand.u32 4294901760, %v8557_v18 }
 0xc39   : > { %v9016_v13 = vand.u32 4294901760, %v9015_v11 }
 0xc3c   : > { %11688 = vrot.lane.b32.xlu1 %v22943_v23, %s21764_s26 }
 0xc9e   : > { %v8483_v45 = vpop.permute.xlu0 %8482  ;;  %v8941_v41 = vpop.permute.xlu1 %8940 }
 0xc9f   : > { %v8486_v57 = vsel %vm1463_vm10, %v8483_v45, 0  ;;  %v8944_v2 = vsel %vm1463_vm10, %v8941_v41, 0 }
 0xca0   : > { %v22959_v54 = vand.u32 4294901760, %v8486_v57  ;;  %v22961_v55 = vand.u32 4294901760, %v8944_v2 }
 0xca2   : > { %v8566_v6 = vsub.f32 %v8486_v57, %v22959_v54  ;;  %v9024_v7 = vsub.f32 %v8944_v2, %v22961_v55  ;;  %19795 = vmatpush3.xpose.msra.mxu0 %v22961_v55  ;;  %19765 = vmatpush3.xpose.msra.mxu1 %v22959_v54  ;;  %v9399_v53 = vpop.permute.xlu1 %9398  ;;  %v10316_v2 = vsel %vm1463_vm10, %v22900_v12, 0 }
 0xca3   : > { %19769 = vmatprep.subr.mxu1 %v21762_v0  ;;  %19799 = vmatprep.subr.mxu0 %v21762_v0  ;;  %v9402_v15 = vsel %vm1463_vm10, %v9399_v53, 0 }
 0xca4   : > { %v8567_v52 = vand.u32 4294901760, %v8566_v6  ;;  %v9025_v4 = vand.u32 4294901760, %v9024_v7  ;;  %v23004_v39 = vand.u32 4294901760, %v9402_v15 }
 0xca5   : > { %19767 = vmatmul.mubr.f32.vlgmr.msra.gmra.mrb[18].mxu1 %v8558_v16  ;;  %19797 = vmatmul.mubr.f32.vlgmr.msra.gmra.mrb[26].mxu0 %v9016_v13 }
 0xca6   : > { %v8568_v10 = vsub.f32 %v8566_v6, %v8567_v52  ;;  %v9026_v63 = vsub.f32 %v9024_v7, %v9025_v4  ;;  %19771 = vmatprep.mubr.msk.f32.mxu1 %vm21761_vm1, %v21762_v0  ;;  %19801 = vmatprep.mubr.msk.f32.mxu0 %vm21761_vm1, %v21762_v0  ;;  %v9857_v32 = vpop.permute.xlu1 %9856  ;;  %v9482_v27 = vsub.f32 %v9402_v15, %v23004_v39 }
 0xca7   : > { %v9860_v42 = vsel %vm1463_vm10, %v9857_v32, 0 }
 0xca8   : > { %v8569_v56 = vand.u32 4294901760, %v8568_v10  ;;  %v9027_v47 = vand.u32 4294901760, %v9026_v63  ;;  %v23006_v21 = vand.u32 4294901760, %v9860_v42  ;;  %v9483_v9 = vand.u32 4294901760, %v9482_v27 }
 0xcaa   : > { %19770 = vmatpush3.xpose.msra.mxu1 %v8569_v56  ;;  %19800 = vmatpush3.xpose.msra.mxu0 %v9027_v47  ;;  %v9940_v25 = vsub.f32 %v9860_v42, %v23006_v21 }
 0xcab   : > { %19774 = vmatprep.subr.mxu1 %v21762_v0  ;;  %19804 = vmatprep.subr.mxu0 %v21762_v0 }
 0xcad   : > { %19772 = vmatmul.mubr.f32.vlgmr.msra.gmra.mrb[18].mxu1 %v22951_v36  ;;  %19802 = vmatmul.mubr.f32.vlgmr.msra.gmra.mrb[26].mxu0 %v22953_v29 }
 0xcae   : > { %19775 = vmatpush3.xpose.msra.mxu1 %v8566_v6  ;;  %19805 = vmatpush3.xpose.msra.mxu0 %v9024_v7  ;;  %v23063_v7 = vand.u32 4294901760, %v10316_v2 }
 0xcaf   : > { %19776 = vmatprep.mubr.msk.f32.mxu1 %vm21761_vm1, %v21762_v0  ;;  %19779 = vmatprep.subr.mxu1 %v21762_v0 }
 0xcb0   : > { %19806 = vmatprep.mubr.msk.f32.mxu0 %vm21761_vm1, %v21762_v0  ;;  %19809 = vmatprep.subr.mxu0 %v21762_v0 }
 0xcb5   : > { %19777 = vmatmul.mubr.f32.vlgmr.msra.gmra.mrb[18].mxu1 %v8555_v14  ;;  %19807 = vmatmul.mubr.f32.vlgmr.msra.gmra.mrb[26].mxu0 %v9013_v60  ;;  %v9941_v14 = vand.u32 4294901760, %v9940_v25  ;;  %v9473_v60 = vsub.f32 %v9471_v46, %v9472_v28 }
 0xcb6   : > { %19780 = vmatpush3.xpose.msra.mxu1 %v22959_v54  ;;  %19810 = vmatpush3.xpose.msra.mxu0 %v22961_v55 }
 0xcb7   : > { %19781 = vmatprep.mubr.msk.f32.mxu1 %vm21761_vm1, %v21762_v0  ;;  %19784 = vmatprep.subr.mxu1 %v21762_v0  ;;  %v9942_v45 = vsub.f32 %v9940_v25, %v9941_v14  ;;  %v9474_v41 = vand.u32 4294901760, %v9473_v60 }
 0xcb8   : > { %19811 = vmatprep.mubr.msk.f32.mxu0 %vm21761_vm1, %v21762_v0  ;;  %19814 = vmatprep.subr.mxu0 %v21762_v0 }
 0xcb9   : > { %v9943_v57 = vand.u32 4294901760, %v9942_v45 }
 0xcbd   : > { %19782 = vmatmul.mubr.f32.vlgmr.msra.gmra.mrb[18].mxu1 %v8556_v31  ;;  %19812 = vmatmul.mubr.f32.vlgmr.msra.gmra.mrb[26].mxu0 %v9014_v33  ;;  %v9931_v31 = vsub.f32 %v9929_v48, %v9930_v5  ;;  %v9484_v33 = vsub.f32 %v9482_v27, %v9483_v9 }
 0xcbe   : > { %19785 = vmatpush3.xpose.msra.mxu1 %v8567_v52  ;;  %19815 = vmatpush3.xpose.msra.mxu0 %v9025_v4  ;;  %v23078_v4 = vsub.f32 %v10316_v2, %v23063_v7 }
 0xcbf   : > { %19786 = vmatprep.mubr.msk.f32.mxu1 %vm21761_vm1, %v21762_v0  ;;  %19789 = vmatprep.subr.mxu1 %v21762_v0  ;;  %v9932_v18 = vand.u32 4294901760, %v9931_v31  ;;  %v9485_v11 = vand.u32 4294901760, %v9484_v33  ;;  %v11232_v31 = vsel %vm1463_vm10, %v22918_v1, 0  ;;  %v11690_v33 = vsel %vm1463_vm10, %v22943_v23, 0 }
 0xcc0   : > { %19816 = vmatprep.mubr.msk.f32.mxu0 %vm21761_vm1, %v21762_v0  ;;  %19819 = vmatprep.subr.mxu0 %v21762_v0  ;;  %v10388_v47 = vand.u32 4294901760, %v23078_v4 }
 0xcc2   : > { %v10389_v24 = vsub.f32 %v23078_v4, %v10388_v47 }
 0xcc5   : > { %19787 = vmatmul.mubr.f32.vlgmr.msra.gmra.mrb[18].mxu1 %v22951_v36  ;;  %19817 = vmatmul.mubr.f32.vlgmr.msra.gmra.mrb[26].mxu0 %v22953_v29 }
 0xcc6   : > { %19790 = vmatpush3.xpose.msra.mxu1 %v22959_v54  ;;  %19820 = vmatpush3.xpose.msra.mxu0 %v22961_v55  ;;  %v10774_v54 = vsel %vm1463_vm10, %v22933_v22, 0 }
 0xcc7   : > { %19791 = vmatprep.mubr.msk.f32.mxu1 %vm21761_vm1, %v21762_v0  ;;  %19821 = vmatprep.mubr.msk.f32.mxu0 %vm21761_vm1, %v21762_v0  ;;  %v23065_v16 = vand.u32 4294901760, %v10774_v54 }
 0xcc8   : > { %19824 = vmatprep.subr.mxu1 %v21762_v0  ;;  %19854 = vmatprep.subr.mxu0 %v21762_v0 }
 0xcc9   : > { %v23081_v10 = vsub.f32 %v10774_v54, %v23065_v16 }
 0xccb   : > { %v10846_v53 = vand.u32 4294901760, %v23081_v10 }
 0xccd   : > { %19792 = vmatmul.mubr.f32.vlgmr.msra.gmra.mrb[18].mxu1 %v22951_v36  ;;  %19822 = vmatmul.mubr.f32.vlgmr.msra.gmra.mrb[26].mxu0 %v22953_v29  ;;  %v10315_v36 = vpop.permute.xlu0 %10314  ;;  %v10773_v29 = vpop.permute.xlu1 %10772  ;;  %v10847_v15 = vsub.f32 %v23081_v10, %v10846_v53 }
 0xcce   : > { %19825 = vmatpush3.xpose.msra.mxu1 %v23004_v39  ;;  %19855 = vmatpush3.xpose.msra.mxu0 %v23006_v21  ;;  %v10318_v55 = vsel %vm1463_vm10, %v10315_v36, 0  ;;  %v10776_v6 = vsel %vm1463_vm10, %v10773_v29, 0 }
 0xccf   : > { %19826 = vmatprep.mubr.msk.f32.mxu1 %vm21761_vm1, %v21762_v0  ;;  %19829 = vmatprep.subr.mxu1 %v21762_v0  ;;  %v23070_v13 = vand.u32 4294901760, %v10318_v55  ;;  %v23072_v52 = vand.u32 4294901760, %v10776_v6 }
 0xcd0   : > { %19856 = vmatprep.mubr.msk.f32.mxu0 %vm21761_vm1, %v21762_v0  ;;  %19859 = vmatprep.subr.mxu0 %v21762_v0 }
 0xcd1   : > { %19827 = vmatmul.mubr.f32.vlgmr.msra.gmra.mrb[20].mxu1 %v9474_v41  ;;  %19857 = vmatmul.mubr.f32.vlgmr.msra.gmra.mrb[28].mxu0 %v9932_v18  ;;  %v23084_v63 = vsub.f32 %v10318_v55, %v23070_v13  ;;  %v23087_v56 = vsub.f32 %v10776_v6, %v23072_v52  ;;  %v11689_v60 = vpop.permute.xlu1 %11688  ;;  %v23160_v18 = vand.u32 4294901760, %v11232_v31 }
 0xcd2   : > { %19830 = vmatpush3.xpose.msra.mxu1 %v9485_v11  ;;  %19860 = vmatpush3.xpose.msra.mxu0 %v9943_v57  ;;  %v11692_v41 = vsel %vm1463_vm10, %v11689_v60, 0  ;;  %v23162_v11 = vand.u32 4294901760, %v11690_v33 }
 0xcd3   : > { %19831 = vmatprep.mubr.msk.f32.mxu1 %vm21761_vm1, %v21762_v0  ;;  %19834 = vmatprep.subr.mxu1 %v21762_v0  ;;  %v10399_v32 = vand.u32 4294901760, %v23084_v63  ;;  %v10857_v44 = vand.u32 4294901760, %v23087_v56  ;;  %v23169_v36 = vand.u32 4294901760, %v11692_v41  ;;  %v11303_v29 = vsub.f32 %v11232_v31, %v23160_v18 }
 0xcd4   : > { %19861 = vmatprep.mubr.msk.f32.mxu0 %vm21761_vm1, %v21762_v0  ;;  %19864 = vmatprep.subr.mxu0 %v21762_v0  ;;  %v11761_v2 = vsub.f32 %v11690_v33, %v23162_v11 }
 0xcd5   : > { %v10400_v42 = vsub.f32 %v23084_v63, %v10399_v32  ;;  %v11772_v55 = vsub.f32 %v11692_v41, %v23169_v36  ;;  %v11304_v6 = vand.u32 4294901760, %v11303_v29 }
 0xcd9   : > { %19832 = vmatmul.mubr.f32.vlgmr.msra.gmra.mrb[20].mxu1 %v22997_v30  ;;  %19862 = vmatmul.mubr.f32.vlgmr.msra.gmra.mrb[28].mxu0 %v22999_v49 }
 0xcda   : > { %19835 = vmatpush3.xpose.msra.mxu1 %v9482_v27  ;;  %19865 = vmatpush3.xpose.msra.mxu0 %v9940_v25  ;;  %v18322_v25 = vld [vmem:[%s23929_s1] ss:$0 sm:$0xff] }
 0xcdb   : > { %19836 = vmatprep.mubr.msk.f32.mxu1 %vm21761_vm1, %v21762_v0  ;;  %19839 = vmatprep.subr.mxu1 %v21762_v0 }
 0xcdc   : > { %19866 = vmatprep.mubr.msk.f32.mxu0 %vm21761_vm1, %v21762_v0  ;;  %19869 = vmatprep.subr.mxu0 %v21762_v0 }
 0xce1   : > { %19837 = vmatmul.mubr.f32.vlgmr.msra.gmra.mrb[20].mxu1 %v9471_v46  ;;  %19867 = vmatmul.mubr.f32.vlgmr.msra.gmra.mrb[28].mxu0 %v9929_v48  ;;  %v10848_v46 = vand.u32 4294901760, %v10847_v15  ;;  %v10401_v48 = vand.u32 4294901760, %v10400_v42 }
 0xce2   : > { %19840 = vmatpush3.xpose.msra.mxu1 %v23004_v39  ;;  %19870 = vmatpush3.xpose.msra.mxu0 %v23006_v21 }
 0xce3   : > { %19841 = vmatprep.mubr.msk.f32.mxu1 %vm21761_vm1, %v21762_v0  ;;  %19844 = vmatprep.subr.mxu1 %v21762_v0 }
 0xce4   : > { %19871 = vmatprep.mubr.msk.f32.mxu0 %vm21761_vm1, %v21762_v0  ;;  %19874 = vmatprep.subr.mxu0 %v21762_v0 }
 0xce9   : > { %19842 = vmatmul.mubr.f32.vlgmr.msra.gmra.mrb[20].mxu1 %v9472_v28  ;;  %19872 = vmatmul.mubr.f32.vlgmr.msra.gmra.mrb[28].mxu0 %v9930_v5 }
 0xcea   : > { %19845 = vmatpush3.xpose.msra.mxu1 %v9483_v9  ;;  %19875 = vmatpush3.xpose.msra.mxu0 %v9941_v14  ;;  %v11231_v14 = vpop.permute.xlu0 %11230 }
 0xceb   : > { %19846 = vmatprep.mubr.msk.f32.mxu1 %vm21761_vm1, %v21762_v0  ;;  %19849 = vmatprep.subr.mxu1 %v21762_v0  ;;  %v11234_v45 = vsel %vm1463_vm10, %v11231_v14, 0 }
 0xcec   : > { %19876 = vmatprep.mubr.msk.f32.mxu0 %vm21761_vm1, %v21762_v0  ;;  %19879 = vmatprep.subr.mxu0 %v21762_v0  ;;  %v23167_v57 = vand.u32 4294901760, %v11234_v45 }
 0xcee   : > { %v11314_v54 = vsub.f32 %v11234_v45, %v23167_v57 }
 0xcf1   : > { %19847 = vmatmul.mubr.f32.vlgmr.msra.gmra.mrb[20].mxu1 %v22997_v30  ;;  %19877 = vmatmul.mubr.f32.vlgmr.msra.gmra.mrb[28].mxu0 %v22999_v49 }
 0xcf2   : > { %19850 = vmatpush3.xpose.msra.mxu1 %v23004_v39  ;;  %19880 = vmatpush3.xpose.msra.mxu0 %v23006_v21  ;;  %v10858_v39 = vsub.f32 %v23087_v56, %v10857_v44  ;;  %v10390_v21 = vand.u32 4294901760, %v10389_v24 }
 0xcf3   : > { %19851 = vmatprep.mubr.msk.f32.mxu1 %vm21761_vm1, %v21762_v0  ;;  %19881 = vmatprep.mubr.msk.f32.mxu0 %vm21761_vm1, %v21762_v0 }
 0xcf4   : > { %19884 = vmatprep.subr.mxu1 %v21762_v0  ;;  %19914 = vmatprep.subr.mxu0 %v21762_v0  ;;  %v10859_v27 = vand.u32 4294901760, %v10858_v39 }
 0xcf9   : > { %19852 = vmatmul.mubr.f32.vlgmr.msra.gmra.mrb[20].mxu1 %v22997_v30  ;;  %19882 = vmatmul.mubr.f32.vlgmr.msra.gmra.mrb[28].mxu0 %v22999_v49 }
 0xcfa   : > { %19885 = vmatpush3.xpose.msra.mxu1 %v23070_v13  ;;  %19915 = vmatpush3.xpose.msra.mxu0 %v23072_v52 }
 0xcfb   : > { %19886 = vmatprep.mubr.msk.f32.mxu1 %vm21761_vm1, %v21762_v0  ;;  %19889 = vmatprep.subr.mxu1 %v21762_v0 }
 0xcfc   : > { %19916 = vmatprep.mubr.msk.f32.mxu0 %vm21761_vm1, %v21762_v0  ;;  %19919 = vmatprep.subr.mxu0 %v21762_v0 }
 0xcfd   : > { %v23117_v30 = vpop.f32.mrb[14].mxu1  ;;  %19887 = vmatmul.mubr.f32.vlgmr.msra.gmra.mrb[22].mxu1 %v10390_v21  ;;  %19917 = vmatmul.mubr.f32.vlgmr.msra.gmra.mrb[30].mxu0 %v10848_v46 }
 0xcfe   : > { %19890 = vmatpush3.xpose.msra.mxu1 %v10401_v48  ;;  %19920 = vmatpush3.xpose.msra.mxu0 %v10859_v27  ;;  %v23119_v49 = vpop.f32.mrb[15].mxu1 }
 0xcff   : > { %19891 = vmatprep.mubr.msk.f32.mxu1 %vm21761_vm1, %v21762_v0  ;;  %19894 = vmatprep.subr.mxu1 %v21762_v0 }
 0xd00   : > { %19921 = vmatprep.mubr.msk.f32.mxu0 %vm21761_vm1, %v21762_v0  ;;  %19924 = vmatprep.subr.mxu0 %v21762_v0 }
 0xd01   : > { %v19679_v28 = vpop.f32.mrb[16].mxu1 }
 0xd02   : > { %v23130_v5 = vadd.f32 %v19679_v28, %v18322_v25  ;;  %v23132_v9 = vpop.f32.mrb[17].mxu1 }
 0xd05   : > { %19892 = vmatmul.mubr.f32.vlgmr.msra.gmra.mrb[22].mxu1 %v23063_v7  ;;  %19922 = vmatmul.mubr.f32.vlgmr.msra.gmra.mrb[30].mxu0 %v23065_v16 }
 0xd06   : > { %19895 = vmatpush3.xpose.msra.mxu1 %v23084_v63  ;;  %19925 = vmatpush3.xpose.msra.mxu0 %v23087_v56  ;;  %v11773_v63 = vand.u32 4294901760, %v11772_v55  ;;  %v11305_v56 = vsub.f32 %v11303_v29, %v11304_v6 }
 0xd07   : > { %19896 = vmatprep.mubr.msk.f32.mxu1 %vm21761_vm1, %v21762_v0  ;;  %19899 = vmatprep.subr.mxu1 %v21762_v0 }
 0xd08   : > { %19926 = vmatprep.mubr.msk.f32.mxu0 %vm21761_vm1, %v21762_v0  ;;  %19929 = vmatprep.subr.mxu0 %v21762_v0 }
 0xd0d   : > { %19897 = vmatmul.mubr.f32.vlgmr.msra.gmra.mrb[22].mxu1 %v23078_v4  ;;  %19927 = vmatmul.mubr.f32.vlgmr.msra.gmra.mrb[30].mxu0 %v23081_v10  ;;  %v11762_v4 = vand.u32 4294901760, %v11761_v2  ;;  %v11315_v10 = vand.u32 4294901760, %v11314_v54 }
 0xd0e   : > { %19900 = vmatpush3.xpose.msra.mxu1 %v23070_v13  ;;  %19930 = vmatpush3.xpose.msra.mxu0 %v23072_v52 }
 0xd0f   : > { %19901 = vmatprep.mubr.msk.f32.mxu1 %vm21761_vm1, %v21762_v0  ;;  %19904 = vmatprep.subr.mxu1 %v21762_v0 }
 0xd10   : > { %19931 = vmatprep.mubr.msk.f32.mxu0 %vm21761_vm1, %v21762_v0  ;;  %19934 = vmatprep.subr.mxu0 %v21762_v0 }
 0xd15   : > { %19902 = vmatmul.mubr.f32.vlgmr.msra.gmra.mrb[22].mxu1 %v10388_v47  ;;  %19932 = vmatmul.mubr.f32.vlgmr.msra.gmra.mrb[30].mxu0 %v10846_v53  ;;  %v11763_v47 = vsub.f32 %v11761_v2, %v11762_v4  ;;  %v11316_v53 = vsub.f32 %v11314_v54, %v11315_v10 }
 0xd16   : > { %19905 = vmatpush3.xpose.msra.mxu1 %v10399_v32  ;;  %19935 = vmatpush3.xpose.msra.mxu0 %v10857_v44 }
 0xd17   : > { %19906 = vmatprep.mubr.msk.f32.mxu1 %vm21761_vm1, %v21762_v0  ;;  %19909 = vmatprep.subr.mxu1 %v21762_v0  ;;  %v11764_v32 = vand.u32 4294901760, %v11763_v47  ;;  %v11317_v44 = vand.u32 4294901760, %v11316_v53 }
 0xd18   : > { %19936 = vmatprep.mubr.msk.f32.mxu0 %vm21761_vm1, %v21762_v0  ;;  %19939 = vmatprep.subr.mxu0 %v21762_v0 }
 0xd1d   : > { %19907 = vmatmul.mubr.f32.vlgmr.msra.gmra.mrb[22].mxu1 %v23063_v7  ;;  %19937 = vmatmul.mubr.f32.vlgmr.msra.gmra.mrb[30].mxu0 %v23065_v16 }
 0xd1e   : > { %19910 = vmatpush3.xpose.msra.mxu1 %v23070_v13  ;;  %19940 = vmatpush3.xpose.msra.mxu0 %v23072_v52  ;;  %v11774_v13 = vsub.f32 %v11772_v55, %v11773_v63  ;;  %v11306_v52 = vand.u32 4294901760, %v11305_v56 }
 0xd1f   : > { %19911 = vmatprep.mubr.msk.f32.mxu1 %vm21761_vm1, %v21762_v0  ;;  %19941 = vmatprep.mubr.msk.f32.mxu0 %vm21761_vm1, %v21762_v0 }
 0xd20   : > { %19944 = vmatprep.subr.mxu1 %v21762_v0  ;;  %19974 = vmatprep.subr.mxu0 %v21762_v0  ;;  %v11775_v24 = vand.u32 4294901760, %v11774_v13 }
 0xd25   : > { %19912 = vmatmul.mubr.f32.vlgmr.msra.gmra.mrb[22].mxu1 %v23063_v7  ;;  %19942 = vmatmul.mubr.f32.vlgmr.msra.gmra.mrb[30].mxu0 %v23065_v16 }
 0xd26   : > { %19945 = vmatpush3.xpose.msra.mxu1 %v23167_v57  ;;  %19975 = vmatpush3.xpose.msra.mxu0 %v23169_v36 }
 0xd27   : > { %19946 = vmatprep.mubr.msk.f32.mxu1 %vm21761_vm1, %v21762_v0  ;;  %19949 = vmatprep.subr.mxu1 %v21762_v0 }
 0xd28   : > { %19976 = vmatprep.mubr.msk.f32.mxu0 %vm21761_vm1, %v21762_v0  ;;  %19979 = vmatprep.subr.mxu0 %v21762_v0 }
 0xd29   : > { %19947 = vmatmul.mubr.f32.vlgmr.msra.gmra.mrb[24].mxu1 %v11306_v52  ;;  %19977 = vmatmul.mubr.f32.vlgmr.msra.gmra.mrb[32].mxu0 %v11764_v32 }
 0xd2a   : > { %19950 = vmatpush3.xpose.msra.mxu1 %v11317_v44  ;;  %19980 = vmatpush3.xpose.msra.mxu0 %v11775_v24 }
 0xd2b   : > { %19951 = vmatprep.mubr.msk.f32.mxu1 %vm21761_vm1, %v21762_v0  ;;  %19954 = vmatprep.subr.mxu1 %v21762_v0 }
 0xd2c   : > { %19981 = vmatprep.mubr.msk.f32.mxu0 %vm21761_vm1, %v21762_v0  ;;  %19984 = vmatprep.subr.mxu0 %v21762_v0 }
 0xd31   : > { %19952 = vmatmul.mubr.f32.vlgmr.msra.gmra.mrb[24].mxu1 %v23160_v18  ;;  %19982 = vmatmul.mubr.f32.vlgmr.msra.gmra.mrb[32].mxu0 %v23162_v11 }
 0xd32   : > { %19955 = vmatpush3.xpose.msra.mxu1 %v11314_v54  ;;  %19985 = vmatpush3.xpose.msra.mxu0 %v11772_v55 }
 0xd33   : > { %19956 = vmatprep.mubr.msk.f32.mxu1 %vm21761_vm1, %v21762_v0  ;;  %19959 = vmatprep.subr.mxu1 %v21762_v0 }
 0xd34   : > { %19986 = vmatprep.mubr.msk.f32.mxu0 %vm21761_vm1, %v21762_v0  ;;  %19989 = vmatprep.subr.mxu0 %v21762_v0 }
 0xd39   : > { %19957 = vmatmul.mubr.f32.vlgmr.msra.gmra.mrb[24].mxu1 %v11303_v29  ;;  %19987 = vmatmul.mubr.f32.vlgmr.msra.gmra.mrb[32].mxu0 %v11761_v2 }
 0xd3a   : > { %19960 = vmatpush3.xpose.msra.mxu1 %v23167_v57  ;;  %19990 = vmatpush3.xpose.msra.mxu0 %v23169_v36 }
 0xd3b   : > { %19961 = vmatprep.mubr.msk.f32.mxu1 %vm21761_vm1, %v21762_v0  ;;  %19964 = vmatprep.subr.mxu1 %v21762_v0 }
 0xd3c   : > { %19991 = vmatprep.mubr.msk.f32.mxu0 %vm21761_vm1, %v21762_v0  ;;  %19994 = vmatprep.subr.mxu0 %v21762_v0 }
 0xd41   : > { %19962 = vmatmul.mubr.f32.vlgmr.msra.gmra.mrb[24].mxu1 %v11304_v6  ;;  %19992 = vmatmul.mubr.f32.vlgmr.msra.gmra.mrb[32].mxu0 %v11762_v4 }
 0xd42   : > { %19965 = vmatpush3.xpose.msra.mxu1 %v11315_v10  ;;  %19995 = vmatpush3.xpose.msra.mxu0 %v11773_v63 }
 0xd43   : > { %19966 = vmatprep.mubr.msk.f32.mxu1 %vm21761_vm1, %v21762_v0  ;;  %19969 = vmatprep.subr.mxu1 %v21762_v0 }
 0xd44   : > { %19996 = vmatprep.mubr.msk.f32.mxu0 %vm21761_vm1, %v21762_v0  ;;  %19999 = vmatprep.subr.mxu0 %v21762_v0 }
 0xd49   : > { %19967 = vmatmul.mubr.f32.vlgmr.msra.gmra.mrb[24].mxu1 %v23160_v18  ;;  %19997 = vmatmul.mubr.f32.vlgmr.msra.gmra.mrb[32].mxu0 %v23162_v11 }
 0xd4a   : > { %19970 = vmatpush3.xpose.msra.mxu1 %v23167_v57  ;;  %20000 = vmatpush3.xpose.msra.mxu0 %v23169_v36 }
 0xd4b   : > { %19971 = vmatprep.mubr.msk.f32.mxu1 %vm21761_vm1, %v21762_v0  ;;  %20001 = vmatprep.mubr.msk.f32.mxu0 %vm21761_vm1, %v21762_v0 }
 0xd4c   : > { %20004 = vmatprep.subr.mxu1 %v21762_v0  ;;  %20034 = vmatprep.subr.mxu0 %v21762_v0 }
 0xd51   : > { %19972 = vmatmul.mubr.f32.vlgmr.msra.gmra.mrb[24].mxu1 %v23160_v18  ;;  %20002 = vmatmul.mubr.f32.vlgmr.msra.gmra.mrb[32].mxu0 %v23162_v11 }
 0xd52   : > { %20006 = vmatprep.mubr.msk.f32.mxu1 %vm21761_vm1, %v21762_v0  ;;  %20036 = vmatprep.mubr.msk.f32.mxu0 %vm21761_vm1, %v21762_v0 }
 0xda0   : > { %v8930_v7 = vpop.f32.mrb[18].mxu1  ;;  %v9388_v16 = vpop.f32.mrb[26].mxu0 }
 0xda1   : > { %v12140_v15 = vmul.f32 0.17677669, %v8930_v7  ;;  %v12141_v42 = vmul.f32 0.17677669, %v9388_v16  ;;  %v19793_v39 = vpop.f32.mrb[19].mxu1  ;;  %v19823_v21 = vpop.f32.mrb[27].mxu0 }
 0xda3   : > { %v12152_v46 = vsel %vm12148_vm12, %v12141_v42, -inf  ;;  %v12149_v48 = vsel %vm12148_vm12, %v12140_v15, -inf }
 0xda4   : > { %12153 = vmax.xlane.f32.xlu1 %v12152_v46  ;;  %12150 = vmax.xlane.f32.xlu0 %v12149_v48 }
 0xdcc   : > { %v9846_v27 = vpop.f32.mrb[20].mxu1  ;;  %v10304_v25 = vpop.f32.mrb[28].mxu0 }
 0xdcd   : > { %v12142_v28 = vmul.f32 0.17677669, %v9846_v27  ;;  %v19853_v14 = vpop.f32.mrb[21].mxu1  ;;  %v19883_v60 = vpop.f32.mrb[29].mxu0  ;;  %v12143_v31 = vmul.f32 0.17677669, %v10304_v25 }
 0xdcf   : > { %v12155_v33 = vsel %vm12148_vm12, %v12142_v28, -inf  ;;  %v12158_v45 = vsel %vm12148_vm12, %v12143_v31, -inf }
 0xdd0   : > { %12156 = vmax.xlane.f32.xlu0 %v12155_v33 }
 0xdd4   : > { %12159 = vmax.xlane.f32.xlu0 %v12158_v45 }
 0xdf8   : > { %v10762_v41 = vpop.f32.mrb[22].mxu1  ;;  %v11220_v18 = vpop.f32.mrb[30].mxu0 }
 0xdf9   : > { %v12144_v11 = vmul.f32 0.17677669, %v10762_v41  ;;  %v12145_v57 = vmul.f32 0.17677669, %v11220_v18  ;;  %v19913_v36 = vpop.f32.mrb[23].mxu1  ;;  %v19943_v29 = vpop.f32.mrb[31].mxu0 }
 0xdfb   : > { %v12164_v2 = vsel %vm12148_vm12, %v12145_v57, -inf  ;;  %v12161_v54 = vsel %vm12148_vm12, %v12144_v11, -inf }
 0xdfc   : > { %12165 = vmax.xlane.f32.xlu1 %v12164_v2  ;;  %12162 = vmax.xlane.f32.xlu0 %v12161_v54 }
 0xe24   : > { %v11678_v55 = vpop.f32.mrb[24].mxu1  ;;  %v12136_v6 = vpop.f32.mrb[32].mxu0 }
 0xe25   : > { %v19973_v4 = vpop.f32.mrb[25].mxu1  ;;  %v20003_v10 = vpop.f32.mrb[33].mxu0  ;;  %v23260_v48 = vmul.f32 0.17677669, %v11678_v55  ;;  %v23262_v27 = vmul.f32 0.17677669, %v12136_v6 }
 0xe27   : > { %v12167_v25 = vsel %vm12148_vm12, %v23260_v48, -inf }
 0xe31   : > { %v12154_v63 = vpop.xlane.xlu1 %12153  ;;  %v12151_v56 = vpop.xlane.xlu0 %12150 }
 0xe32   : > { %v12174_v47 = vsub.f32 %v12141_v42, %v12154_v63  ;;  %v12173_v53 = vsub.f32 %v12140_v15, %v12151_v56 }
 0xe34   : > { %v12183_v13 = vmul.f32 1.442695, %v12174_v47  ;;  %v12181_v52 = vmul.f32 1.442695, %v12173_v53 }
 0xe36   : > { %21471 = vpow2.f32 %v12183_v13 }
 0xe37   : > { %21473 = vpow2.f32 %v12181_v52 }
 0xe40   : > { %v23248_v32 = vpop.eup %21471 }
 0xe41   : > { %v23250_v44 = vpop.eup %21473  ;;  %v12200_v24 = vsel %vm12148_vm12, %v23248_v32, 0.0 }
 0xe42   : > { %12201 = vadd.xlane.f32.xlu1 %v12200_v24  ;;  %v12197_v7 = vsel %vm12148_vm12, %v23250_v44, 0.0 }
 0xe43   : > { %12198 = vadd.xlane.f32.xlu0 %v12197_v7 }
 0xe53   : > { %12692 = vrot.lane.b32.xlu1 %v22897_v20, %s21763_s15 }
 0xe59   : > { %12237 = vrot.lane.b32.xlu0 %v22894_v19, %s21763_s15  ;;  %v12170_v19 = vsel %vm12148_vm12, %v23262_v27, -inf }
 0xe5d   : > { %v12157_v16 = vpop.xlane.xlu0 %12156 }
 0xe5e   : > { %v12175_v39 = vsub.f32 %v12142_v28, %v12157_v16 }
 0xe60   : > { %v12185_v46 = vmul.f32 1.442695, %v12175_v39 }
 0xe61   : > { %v12160_v15 = vpop.xlane.xlu0 %12159 }
 0xe62   : > { %v12176_v42 = vsub.f32 %v12143_v31, %v12160_v15 }
 0xe64   : > { %v12187_v21 = vmul.f32 1.442695, %v12176_v42 }
 0xe66   : > { %21475 = vpow2.f32 %v12187_v21 }
 0xe67   : > { %21477 = vpow2.f32 %v12185_v46 }
 0xe70   : > { %v23266_v14 = vpop.eup %21475 }
 0xe71   : > { %v23270_v20 = vpop.eup %21477  ;;  %v12206_v28 = vsel %vm12148_vm12, %v23266_v14, 0.0 }
 0xe72   : > { %v12203_v60 = vsel %vm12148_vm12, %v23270_v20, 0.0 }
 0xe77   : > { %12168 = vmax.xlane.f32.xlu1 %v12167_v25 }
 0xe78   : > { %12171 = vmax.xlane.f32.xlu0 %v12170_v19 }
 0xe7b   : > { %12207 = vadd.xlane.f32.xlu1 %v12206_v28 }
 0xe7c   : > { %12204 = vadd.xlane.f32.xlu0 %v12203_v60 }
 0xe89   : > { %v12163_v31 = vpop.xlane.xlu0 %12162  ;;  %v12166_v33 = vpop.xlane.xlu1 %12165 }
 0xe8a   : > { %v12177_v45 = vsub.f32 %v12144_v11, %v12163_v31  ;;  %v12178_v41 = vsub.f32 %v12145_v57, %v12166_v33 }
 0xe8c   : > { %13598 = vrot.lane.b32.xlu1 %v22924_v62, %s21763_s15  ;;  %v12189_v18 = vmul.f32 1.442695, %v12177_v45  ;;  %v12191_v36 = vmul.f32 1.442695, %v12178_v41 }
 0xe8e   : > { %21479 = vpow2.f32 %v12189_v18 }
 0xe8f   : > { %21481 = vpow2.f32 %v12191_v36 }
 0xe92   : > { %13145 = vrot.lane.b32.xlu0 %v22884_v3, %s21763_s15 }
 0xe98   : > { %v23280_v29 = vpop.eup %21479 }
 0xe99   : > { %v23282_v2 = vpop.eup %21481  ;;  %v12209_v54 = vsel %vm12148_vm12, %v23280_v29, 0.0 }
 0xe9a   : > { %v12212_v62 = vsel %vm12148_vm12, %v23282_v2, 0.0 }
 0xeb0   : > { %12210 = vadd.xlane.f32.xlu1 %v12209_v54 }
 0xeb1   : > { %12213 = vadd.xlane.f32.xlu0 %v12212_v62 }
 0xec1   : > { %14504 = vrot.lane.b32.xlu1 %v22933_v22, %s21763_s15 }
 0xec7   : > { %14051 = vrot.lane.b32.xlu0 %v22900_v12, %s21763_s15 }
 0xecf   : > { %v12202_v3 = vpop.xlane.xlu1 %12201 }
 0xed0   : > { %21483 = vrcp.f32 %v12202_v3  ;;  %v12199_v11 = vpop.xlane.xlu0 %12198 }
 0xed1   : > { %21485 = vrcp.f32 %v12199_v11 }
 0xed3   : > { %v12693_v57 = vpop.permute.xlu1 %12692 }
 0xed4   : > { %v12697_v55 = vsel %vm12243_vm13, %v12693_v57, 0  ;;  %v12238_v6 = vpop.permute.xlu0 %12237 }
 0xed5   : > { %v23293_v4 = vand.u32 4294901760, %v12697_v55  ;;  %v12244_v10 = vsel %vm12243_vm13, %v12238_v6, 0 }
 0xed6   : > { %v23296_v63 = vand.u32 4294901760, %v12244_v10 }
 0xed7   : > { %20035 = vmatpush3.msra.mxu0 %v23293_v4  ;;  %v12777_v47 = vsub.f32 %v12697_v55, %v23293_v4 }
 0xed8   : > { %20005 = vmatpush3.msra.mxu1 %v23296_v63  ;;  %20039 = vmatprep.subr.mxu0 %v21762_v0  ;;  %v12324_v13 = vsub.f32 %v12244_v10, %v23296_v63 }
 0xed9   : > { %20009 = vmatprep.subr.mxu1 %v21762_v0  ;;  %v12778_v16 = vand.u32 4294901760, %v12777_v47 }
 0xeda   : > { %v21484_v12 = vpop.eup %21483  ;;  %v12325_v42 = vand.u32 4294901760, %v12324_v13 }
 0xedb   : > { %v21486_v22 = vpop.eup %21485  ;;  %v12230_v56 = vmul.f32 %v21484_v12, %v23248_v32  ;;  %v12779_v46 = vsub.f32 %v12777_v47, %v12778_v16 }
 0xedc   : > { %v12229_v53 = vmul.f32 %v21486_v22, %v23250_v44  ;;  %v12326_v44 = vsub.f32 %v12324_v13, %v12325_v42 }
 0xedd   : > { %v12695_v52 = vsel %vm12239_vm14, %v12230_v56, 0  ;;  %v12780_v31 = vand.u32 4294901760, %v12779_v46 }
 0xede   : > { %v12241_v24 = vsel %vm12239_vm14, %v12229_v53, 0  ;;  %v23308_v7 = vand.u32 4294901760, %v12695_v52  ;;  %v12327_v45 = vand.u32 4294901760, %v12326_v44 }
 0xedf   : > { %v23310_v15 = vand.u32 4294901760, %v12241_v24 }
 0xee0   : > { %v12766_v39 = vsub.f32 %v12695_v52, %v23308_v7 }
 0xee1   : > { %v12313_v32 = vsub.f32 %v12241_v24, %v23310_v15 }
 0xee2   : > { %v12767_v21 = vand.u32 4294901760, %v12766_v39 }
 0xee3   : > { %v12314_v25 = vand.u32 4294901760, %v12313_v32 }
 0xee4   : > { %v12768_v19 = vsub.f32 %v12766_v39, %v12767_v21 }
 0xee5   : > { %v12315_v28 = vsub.f32 %v12313_v32, %v12314_v25 }
 0xee6   : > { %v12769_v60 = vand.u32 4294901760, %v12768_v19 }
 0xee7   : > { %v12316_v33 = vand.u32 4294901760, %v12315_v28 }
 0xee8   : > { %20037 = vmatmul.mubr.f32.vlgmr.msra.gmra.mrb[34].mxu0 %v12769_v60 }
 0xee9   : > { %20007 = vmatmul.mubr.f32.vlgmr.msra.gmra.mrb[26].mxu1 %v12316_v33  ;;  %20040 = vmatpush3.msra.mxu0 %v12780_v31 }
 0xeea   : > { %20010 = vmatpush3.msra.mxu1 %v12327_v45  ;;  %20011 = vmatprep.mubr.msk.f32.mxu1 %vm21761_vm1, %v21762_v0 }
 0xeeb   : > { %20014 = vmatprep.subr.mxu1 %v21762_v0  ;;  %20041 = vmatprep.mubr.msk.f32.mxu0 %vm21761_vm1, %v21762_v0 }
 0xeec   : > { %20044 = vmatprep.subr.mxu0 %v21762_v0 }
 0xef0   : > { %20042 = vmatmul.mubr.f32.vlgmr.msra.gmra.mrb[34].mxu0 %v23308_v7 }
 0xef1   : > { %20012 = vmatmul.mubr.f32.vlgmr.msra.gmra.mrb[26].mxu1 %v23310_v15  ;;  %20045 = vmatpush3.msra.mxu0 %v12777_v47 }
 0xef2   : > { %20015 = vmatpush3.msra.mxu1 %v12324_v13  ;;  %20016 = vmatprep.mubr.msk.f32.mxu1 %vm21761_vm1, %v21762_v0 }
 0xef3   : > { %20019 = vmatprep.subr.mxu1 %v21762_v0  ;;  %20046 = vmatprep.mubr.msk.f32.mxu0 %vm21761_vm1, %v21762_v0 }
 0xef4   : > { %20049 = vmatprep.subr.mxu0 %v21762_v0 }
 0xef8   : > { %20047 = vmatmul.mubr.f32.vlgmr.msra.gmra.mrb[34].mxu0 %v12766_v39 }
 0xef9   : > { %20017 = vmatmul.mubr.f32.vlgmr.msra.gmra.mrb[26].mxu1 %v12313_v32  ;;  %20050 = vmatpush3.msra.mxu0 %v23293_v4 }
 0xefa   : > { %20020 = vmatpush3.msra.mxu1 %v23296_v63  ;;  %20021 = vmatprep.mubr.msk.f32.mxu1 %vm21761_vm1, %v21762_v0 }
 0xefb   : > { %20024 = vmatprep.subr.mxu1 %v21762_v0  ;;  %20051 = vmatprep.mubr.msk.f32.mxu0 %vm21761_vm1, %v21762_v0 }
 0xefc   : > { %20054 = vmatprep.subr.mxu0 %v21762_v0 }
 0xf00   : > { %20052 = vmatmul.mubr.f32.vlgmr.msra.gmra.mrb[34].mxu0 %v12767_v21 }
 0xf01   : > { %20022 = vmatmul.mubr.f32.vlgmr.msra.gmra.mrb[26].mxu1 %v12314_v25  ;;  %20055 = vmatpush3.msra.mxu0 %v12778_v16 }
 0xf02   : > { %20025 = vmatpush3.msra.mxu1 %v12325_v42  ;;  %20026 = vmatprep.mubr.msk.f32.mxu1 %vm21761_vm1, %v21762_v0 }
 0xf03   : > { %20029 = vmatprep.subr.mxu1 %v21762_v0  ;;  %20056 = vmatprep.mubr.msk.f32.mxu0 %vm21761_vm1, %v21762_v0 }
 0xf04   : > { %v12169_v41 = vpop.xlane.xlu1 %12168  ;;  %20059 = vmatprep.subr.mxu0 %v21762_v0 }
 0xf05   : > { %v12172_v18 = vpop.xlane.xlu0 %12171  ;;  %v12179_v36 = vsub.f32 %v23260_v48, %v12169_v41 }
 0xf06   : > { %v12180_v54 = vsub.f32 %v23262_v27, %v12172_v18 }
 0xf07   : > { %v12193_v62 = vmul.f32 1.442695, %v12179_v36 }
 0xf08   : > { %v12195_v3 = vmul.f32 1.442695, %v12180_v54  ;;  %20057 = vmatmul.mubr.f32.vlgmr.msra.gmra.mrb[34].mxu0 %v23308_v7  ;;  %v12208_v11 = vpop.xlane.xlu1 %12207 }
 0xf09   : > { %21487 = vpow2.f32 %v12193_v62  ;;  %20027 = vmatmul.mubr.f32.vlgmr.msra.gmra.mrb[26].mxu1 %v23310_v15  ;;  %20060 = vmatpush3.msra.mxu0 %v23293_v4  ;;  %v12205_v57 = vpop.xlane.xlu0 %12204 }
 0xf0a   : > { %21489 = vpow2.f32 %v12195_v3  ;;  %20030 = vmatpush3.msra.mxu1 %v23296_v63  ;;  %20031 = vmatprep.mubr.msk.f32.mxu1 %vm21761_vm1, %v21762_v0 }
 0xf0b   : > { %21491 = vrcp.f32 %v12205_v57  ;;  %20061 = vmatprep.mubr.msk.f32.mxu0 %vm21761_vm1, %v21762_v0  ;;  %20064 = vmatprep.subr.mxu1 %v21762_v0 }
 0xf0c   : > { %21493 = vrcp.f32 %v12208_v11  ;;  %v13599_v48 = vpop.permute.xlu1 %13598  ;;  %20094 = vmatprep.subr.mxu0 %v21762_v0 }
 0xf0d   : > { %v13146_v27 = vpop.permute.xlu0 %13145  ;;  %v13603_v55 = vsel %vm12243_vm13, %v13599_v48, 0 }
 0xf0e   : > { %v13150_v6 = vsel %vm12243_vm13, %v13146_v27, 0  ;;  %v23356_v4 = vand.u32 4294901760, %v13603_v55 }
 0xf0f   : > { %v23358_v10 = vand.u32 4294901760, %v13150_v6 }
 0xf10   : > { %20062 = vmatmul.mubr.f32.vlgmr.msra.gmra.mrb[34].mxu0 %v23308_v7  ;;  %v13683_v7 = vsub.f32 %v13603_v55, %v23356_v4 }
 0xf11   : > { %20032 = vmatmul.mubr.f32.vlgmr.msra.gmra.mrb[26].mxu1 %v23310_v15  ;;  %20095 = vmatpush3.msra.mxu0 %v23356_v4  ;;  %v13230_v52 = vsub.f32 %v13150_v6, %v23358_v10 }
 0xf12   : > { %20065 = vmatpush3.msra.mxu1 %v23358_v10  ;;  %20066 = vmatprep.mubr.msk.f32.mxu1 %vm21761_vm1, %v21762_v0  ;;  %v13684_v21 = vand.u32 4294901760, %v13683_v7 }
 0xf13   : > { %v23366_v63 = vpop.eup %21487  ;;  %20069 = vmatprep.subr.mxu1 %v21762_v0  ;;  %20096 = vmatprep.mubr.msk.f32.mxu0 %vm21761_vm1, %v21762_v0  ;;  %v13231_v39 = vand.u32 4294901760, %v13230_v52 }
 0xf14   : > { %v23371_v12 = vpop.eup %21489  ;;  %v12215_v22 = vsel %vm12148_vm12, %v23366_v63, 0.0  ;;  %20099 = vmatprep.subr.mxu0 %v21762_v0 }
 0xf15   : > { %v21492_v56 = vpop.eup %21491  ;;  %v12218_v47 = vsel %vm12148_vm12, %v23371_v12, 0.0  ;;  %12216 = vadd.xlane.f32.xlu1 %v12215_v22  ;;  %v13232_v44 = vsub.f32 %v13230_v52, %v13231_v39 }
 0xf16   : > { %v21494_v53 = vpop.eup %21493  ;;  %v12231_v13 = vmul.f32 %v21492_v56, %v23270_v20  ;;  %12219 = vadd.xlane.f32.xlu0 %v12218_v47 }
 0xf17   : > { %v12232_v24 = vmul.f32 %v21494_v53, %v23266_v14  ;;  %v13685_v14 = vsub.f32 %v13683_v7, %v13684_v21  ;;  %v13233_v33 = vand.u32 4294901760, %v13232_v44 }
 0xf18   : > { %v13148_v16 = vsel %vm12239_vm14, %v12231_v13, 0 }
 0xf19   : > { %v23383_v15 = vand.u32 4294901760, %v13148_v16  ;;  %v13601_v42 = vsel %vm12239_vm14, %v12232_v24, 0  ;;  %v13686_v41 = vand.u32 4294901760, %v13685_v14 }
 0xf1a   : > { %v23386_v32 = vand.u32 4294901760, %v13601_v42 }
 0xf1b   : > { %v13219_v46 = vsub.f32 %v13148_v16, %v23383_v15 }
 0xf1c   : > { %v13672_v20 = vsub.f32 %v13601_v42, %v23386_v32 }
 0xf1d   : > { %v13220_v25 = vand.u32 4294901760, %v13219_v46 }
 0xf1e   : > { %v13673_v19 = vand.u32 4294901760, %v13672_v20 }
 0xf1f   : > { %v13221_v28 = vsub.f32 %v13219_v46, %v13220_v25 }
 0xf20   : > { %v13674_v60 = vsub.f32 %v13672_v20, %v13673_v19 }
 0xf21   : > { %v13222_v31 = vand.u32 4294901760, %v13221_v28 }
 0xf22   : > { %v13675_v45 = vand.u32 4294901760, %v13674_v60 }
 0xf23   : > { %20067 = vmatmul.mubr.f32.vlgmr.msra.gmra.mrb[28].mxu1 %v13222_v31 }
 0xf24   : > { %20070 = vmatpush3.msra.mxu1 %v13233_v33  ;;  %20097 = vmatmul.mubr.f32.vlgmr.msra.gmra.mrb[36].mxu0 %v13675_v45 }
 0xf25   : > { %20100 = vmatpush3.msra.mxu0 %v13686_v41  ;;  %20071 = vmatprep.mubr.msk.f32.mxu1 %vm21761_vm1, %v21762_v0 }
 0xf26   : > { %15410 = vrot.lane.b32.xlu1 %v22943_v23, %s21763_s15  ;;  %20074 = vmatprep.subr.mxu1 %v21762_v0 }
 0xf27   : > { %20101 = vmatprep.mubr.msk.f32.mxu0 %vm21761_vm1, %v21762_v0  ;;  %20104 = vmatprep.subr.mxu0 %v21762_v0 }
 0xf2b   : > { %20072 = vmatmul.mubr.f32.vlgmr.msra.gmra.mrb[28].mxu1 %v23383_v15 }
 0xf2c   : > { %20075 = vmatpush3.msra.mxu1 %v13230_v52  ;;  %20102 = vmatmul.mubr.f32.vlgmr.msra.gmra.mrb[36].mxu0 %v23386_v32 }
 0xf2d   : > { %20105 = vmatpush3.msra.mxu0 %v13683_v7  ;;  %14957 = vrot.lane.b32.xlu0 %v22918_v1, %s21763_s15 }
 0xf2e   : > { %20076 = vmatprep.mubr.msk.f32.mxu1 %vm21761_vm1, %v21762_v0  ;;  %20079 = vmatprep.subr.mxu1 %v21762_v0 }
 0xf2f   : > { %20106 = vmatprep.mubr.msk.f32.mxu0 %vm21761_vm1, %v21762_v0  ;;  %20109 = vmatprep.subr.mxu0 %v21762_v0 }
 0xf33   : > { %20077 = vmatmul.mubr.f32.vlgmr.msra.gmra.mrb[28].mxu1 %v13219_v46 }
 0xf34   : > { %20080 = vmatpush3.msra.mxu1 %v23358_v10  ;;  %20107 = vmatmul.mubr.f32.vlgmr.msra.gmra.mrb[36].mxu0 %v13672_v20 }
 0xf35   : > { %20110 = vmatpush3.msra.mxu0 %v23356_v4  ;;  %20081 = vmatprep.mubr.msk.f32.mxu1 %vm21761_vm1, %v21762_v0 }
 0xf36   : > { %20084 = vmatprep.subr.mxu1 %v21762_v0  ;;  %20111 = vmatprep.mubr.msk.f32.mxu0 %vm21761_vm1, %v21762_v0 }
 0xf37   : > { %20114 = vmatprep.subr.mxu0 %v21762_v0 }
 0xf3b   : > { %20082 = vmatmul.mubr.f32.vlgmr.msra.gmra.mrb[28].mxu1 %v13220_v25 }
 0xf3c   : > { %20085 = vmatpush3.msra.mxu1 %v13231_v39  ;;  %20112 = vmatmul.mubr.f32.vlgmr.msra.gmra.mrb[36].mxu0 %v13673_v19 }
 0xf3d   : > { %20115 = vmatpush3.msra.mxu0 %v13684_v21  ;;  %v12211_v1 = vpop.xlane.xlu1 %12210  ;;  %20086 = vmatprep.mubr.msk.f32.mxu1 %vm21761_vm1, %v21762_v0 }
 0xf3e   : > { %v12214_v23 = vpop.xlane.xlu0 %12213  ;;  %21495 = vrcp.f32 %v12211_v1  ;;  %20089 = vmatprep.subr.mxu1 %v21762_v0  ;;  %20116 = vmatprep.mubr.msk.f32.mxu0 %vm21761_vm1, %v21762_v0 }
 0xf3f   : > { %21497 = vrcp.f32 %v12214_v23  ;;  %20119 = vmatprep.subr.mxu0 %v21762_v0 }
 0xf41   : > { %v14505_v18 = vpop.permute.xlu1 %14504 }
 0xf42   : > { %v14052_v36 = vpop.permute.xlu0 %14051  ;;  %v14509_v62 = vsel %vm12243_vm13, %v14505_v18, 0 }
 0xf43   : > { %20087 = vmatmul.mubr.f32.vlgmr.msra.gmra.mrb[28].mxu1 %v23383_v15  ;;  %v14056_v54 = vsel %vm12243_vm13, %v14052_v36, 0  ;;  %v23432_v11 = vand.u32 4294901760, %v14509_v62 }
 0xf44   : > { %20090 = vmatpush3.msra.mxu1 %v23358_v10  ;;  %20117 = vmatmul.mubr.f32.vlgmr.msra.gmra.mrb[36].mxu0 %v23386_v32  ;;  %v23427_v3 = vand.u32 4294901760, %v14056_v54 }
 0xf45   : > { %20120 = vmatpush3.msra.mxu0 %v23356_v4  ;;  %20091 = vmatprep.mubr.msk.f32.mxu1 %vm21761_vm1, %v21762_v0  ;;  %v14589_v4 = vsub.f32 %v14509_v62, %v23432_v11 }
 0xf46   : > { %20121 = vmatprep.mubr.msk.f32.mxu0 %vm21761_vm1, %v21762_v0  ;;  %20124 = vmatprep.subr.mxu1 %v21762_v0  ;;  %v14136_v55 = vsub.f32 %v14056_v54, %v23427_v3 }
 0xf47   : > { %20154 = vmatprep.subr.mxu0 %v21762_v0 }
 0xf48   : > { %v21496_v57 = vpop.eup %21495  ;;  %v14137_v47 = vand.u32 4294901760, %v14136_v55 }
 0xf49   : > { %v21498_v48 = vpop.eup %21497  ;;  %v12233_v27 = vmul.f32 %v21496_v57, %v23280_v29 }
 0xf4a   : > { %v12234_v6 = vmul.f32 %v21498_v48, %v23282_v2  ;;  %v14590_v2 = vand.u32 4294901760, %v14589_v4  ;;  %v14138_v24 = vsub.f32 %v14136_v55, %v14137_v47 }
 0xf4b   : > { %20092 = vmatmul.mubr.f32.vlgmr.msra.gmra.mrb[28].mxu1 %v23383_v15  ;;  %v14054_v10 = vsel %vm12239_vm14, %v12233_v27, 0 }
 0xf4c   : > { %20122 = vmatmul.mubr.f32.vlgmr.msra.gmra.mrb[36].mxu0 %v23386_v32  ;;  %20125 = vmatpush3.msra.mxu1 %v23427_v3  ;;  %v14124_v22 = vand.u32 4294901760, %v14054_v10  ;;  %v14507_v56 = vsel %vm12239_vm14, %v12234_v6, 0  ;;  %v14591_v16 = vsub.f32 %v14589_v4, %v14590_v2  ;;  %v14139_v32 = vand.u32 4294901760, %v14138_v24 }
 0xf4d   : > { %20155 = vmatpush3.msra.mxu0 %v23432_v11  ;;  %20126 = vmatprep.mubr.msk.f32.mxu1 %vm21761_vm1, %v21762_v0  ;;  %v14577_v29 = vand.u32 4294901760, %v14507_v56 }
 0xf4e   : > { %20129 = vmatprep.subr.mxu1 %v21762_v0  ;;  %20156 = vmatprep.mubr.msk.f32.mxu0 %vm21761_vm1, %v21762_v0  ;;  %v14125_v53 = vsub.f32 %v14054_v10, %v14124_v22  ;;  %v14592_v46 = vand.u32 4294901760, %v14591_v16 }
 0xf4f   : > { %20159 = vmatprep.subr.mxu0 %v21762_v0  ;;  %v14578_v13 = vsub.f32 %v14507_v56, %v14577_v29 }
 0xf50   : > { %v14126_v52 = vand.u32 4294901760, %v14125_v53 }
 0xf51   : > { %v14579_v7 = vand.u32 4294901760, %v14578_v13 }
 0xf52   : > { %v14127_v15 = vsub.f32 %v14125_v53, %v14126_v52 }
 0xf53   : > { %v14580_v42 = vsub.f32 %v14578_v13, %v14579_v7 }
 0xf54   : > { %v14128_v39 = vand.u32 4294901760, %v14127_v15 }
 0xf55   : > { %v14581_v21 = vand.u32 4294901760, %v14580_v42 }
 0xf56   : > { %20127 = vmatmul.mubr.f32.vlgmr.msra.gmra.mrb[30].mxu1 %v14128_v39 }
 0xf57   : > { %20130 = vmatpush3.msra.mxu1 %v14139_v32  ;;  %20157 = vmatmul.mubr.f32.vlgmr.msra.gmra.mrb[38].mxu0 %v14581_v21 }
 0xf58   : > { %20160 = vmatpush3.msra.mxu0 %v14592_v46  ;;  %20131 = vmatprep.mubr.msk.f32.mxu1 %vm21761_vm1, %v21762_v0 }
 0xf59   : > { %20134 = vmatprep.subr.mxu1 %v21762_v0  ;;  %20161 = vmatprep.mubr.msk.f32.mxu0 %vm21761_vm1, %v21762_v0 }
 0xf5a   : > { %20164 = vmatprep.subr.mxu0 %v21762_v0 }
 0xf5e   : > { %20132 = vmatmul.mubr.f32.vlgmr.msra.gmra.mrb[30].mxu1 %v14124_v22 }
 0xf5f   : > { %20135 = vmatpush3.msra.mxu1 %v14136_v55  ;;  %20162 = vmatmul.mubr.f32.vlgmr.msra.gmra.mrb[38].mxu0 %v14577_v29 }
 0xf60   : > { %20165 = vmatpush3.msra.mxu0 %v14589_v4  ;;  %20136 = vmatprep.mubr.msk.f32.mxu1 %vm21761_vm1, %v21762_v0 }
 0xf61   : > { %20139 = vmatprep.subr.mxu1 %v21762_v0  ;;  %20166 = vmatprep.mubr.msk.f32.mxu0 %vm21761_vm1, %v21762_v0 }
 0xf62   : > { %20169 = vmatprep.subr.mxu0 %v21762_v0 }
 0xf66   : > { %20137 = vmatmul.mubr.f32.vlgmr.msra.gmra.mrb[30].mxu1 %v14125_v53 }
 0xf67   : > { %20140 = vmatpush3.msra.mxu1 %v23427_v3  ;;  %20167 = vmatmul.mubr.f32.vlgmr.msra.gmra.mrb[38].mxu0 %v14578_v13 }
 0xf68   : > { %20170 = vmatpush3.msra.mxu0 %v23432_v11  ;;  %20141 = vmatprep.mubr.msk.f32.mxu1 %vm21761_vm1, %v21762_v0 }
 0xf69   : > { %20144 = vmatprep.subr.mxu1 %v21762_v0  ;;  %20171 = vmatprep.mubr.msk.f32.mxu0 %vm21761_vm1, %v21762_v0 }
 0xf6a   : > { %20174 = vmatprep.subr.mxu0 %v21762_v0 }
 0xf6e   : > { %20142 = vmatmul.mubr.f32.vlgmr.msra.gmra.mrb[30].mxu1 %v14126_v52 }
 0xf6f   : > { %20145 = vmatpush3.msra.mxu1 %v14137_v47  ;;  %20172 = vmatmul.mubr.f32.vlgmr.msra.gmra.mrb[38].mxu0 %v14579_v7 }
 0xf70   : > { %20175 = vmatpush3.msra.mxu0 %v14590_v2  ;;  %20146 = vmatprep.mubr.msk.f32.mxu1 %vm21761_vm1, %v21762_v0 }
 0xf71   : > { %20149 = vmatprep.subr.mxu1 %v21762_v0  ;;  %20176 = vmatprep.mubr.msk.f32.mxu0 %vm21761_vm1, %v21762_v0 }
 0xf72   : > { %20179 = vmatprep.subr.mxu0 %v21762_v0 }
 0xf76   : > { %20147 = vmatmul.mubr.f32.vlgmr.msra.gmra.mrb[30].mxu1 %v14124_v22 }
 0xf77   : > { %20150 = vmatpush3.msra.mxu1 %v23427_v3  ;;  %20177 = vmatmul.mubr.f32.vlgmr.msra.gmra.mrb[38].mxu0 %v14577_v29 }
 0xf78   : > { %20180 = vmatpush3.msra.mxu0 %v23432_v11  ;;  %20151 = vmatprep.mubr.msk.f32.mxu1 %vm21761_vm1, %v21762_v0 }
 0xf79   : > { %20181 = vmatprep.mubr.msk.f32.mxu0 %vm21761_vm1, %v21762_v0  ;;  %20184 = vmatprep.subr.mxu1 %v21762_v0 }
 0xf7a   : > { %20214 = vmatprep.subr.mxu0 %v21762_v0 }
 0xf7e   : > { %20152 = vmatmul.mubr.f32.vlgmr.msra.gmra.mrb[30].mxu1 %v14124_v22 }
 0xf7f   : > { %20182 = vmatmul.mubr.f32.vlgmr.msra.gmra.mrb[38].mxu0 %v14577_v29  ;;  %20186 = vmatprep.mubr.msk.f32.mxu1 %vm21761_vm1, %v21762_v0 }
 0xf80   : > { %20216 = vmatprep.mubr.msk.f32.mxu0 %vm21761_vm1, %v21762_v0 }
 0xfa2   : > { %v12217_v20 = vpop.xlane.xlu1 %12216 }
 0xfa3   : > { %v12220_v25 = vpop.xlane.xlu0 %12219  ;;  %21499 = vrcp.f32 %v12217_v20 }
 0xfa4   : > { %21501 = vrcp.f32 %v12220_v25 }
 0xfa6   : > { %v15411_v44 = vpop.permute.xlu1 %15410 }
 0xfa7   : > { %v14958_v19 = vpop.permute.xlu0 %14957  ;;  %v15415_v14 = vsel %vm12243_vm13, %v15411_v44, 0 }
 0xfa8   : > { %v14962_v28 = vsel %vm12243_vm13, %v14958_v19, 0  ;;  %v23494_v60 = vand.u32 4294901760, %v15415_v14 }
 0xfa9   : > { %v14965_v31 = vand.u32 4294901760, %v14962_v28 }
 0xfaa   : > { %20215 = vmatpush3.msra.mxu0 %v23494_v60  ;;  %v15495_v18 = vsub.f32 %v15415_v14, %v23494_v60 }
 0xfab   : > { %20185 = vmatpush3.msra.mxu1 %v14965_v31  ;;  %20219 = vmatprep.subr.mxu0 %v21762_v0  ;;  %v15042_v1 = vsub.f32 %v14962_v28, %v14965_v31 }
 0xfac   : > { %20189 = vmatprep.subr.mxu1 %v21762_v0  ;;  %v15496_v57 = vand.u32 4294901760, %v15495_v18 }
 0xfad   : > { %v21500_v33 = vpop.eup %21499  ;;  %v15043_v3 = vand.u32 4294901760, %v15042_v1 }
 0xfae   : > { %v21502_v45 = vpop.eup %21501  ;;  %v12235_v41 = vmul.f32 %v21500_v33, %v23366_v63  ;;  %v15497_v10 = vsub.f32 %v15495_v18, %v15496_v57 }
 0xfaf   : > { %v12236_v23 = vmul.f32 %v21502_v45, %v23371_v12  ;;  %v15044_v6 = vsub.f32 %v15042_v1, %v15043_v3 }
 0xfb0   : > { %v14960_v36 = vsel %vm12239_vm14, %v12235_v41, 0  ;;  %v15498_v29 = vand.u32 4294901760, %v15497_v10 }
 0xfb1   : > { %v15030_v54 = vand.u32 4294901760, %v14960_v36  ;;  %v15413_v62 = vsel %vm12239_vm14, %v12236_v23, 0  ;;  %v15045_v12 = vand.u32 4294901760, %v15044_v6  ;;  %v15899_v6 = vld [vmem:[#allocation8 + $0x38] sm:$0xff] }
 0xfb2   : > { %v15483_v11 = vand.u32 4294901760, %v15413_v62  ;;  %v15979_v10 = vand.u32 4294901760, %v15899_v6 }
 0xfb3   : > { %v15031_v48 = vsub.f32 %v14960_v36, %v15030_v54 }
 0xfb4   : > { %v15484_v27 = vsub.f32 %v15413_v62, %v15483_v11 }
 0xfb5   : > { %v15032_v55 = vand.u32 4294901760, %v15031_v48 }
 0xfb6   : > { %v15485_v4 = vand.u32 4294901760, %v15484_v27 }
 0xfb7   : > { %v15033_v63 = vsub.f32 %v15031_v48, %v15032_v55 }
 0xfb8   : > { %v15486_v22 = vsub.f32 %v15484_v27, %v15485_v4 }
 0xfb9   : > { %v15034_v56 = vand.u32 4294901760, %v15033_v63 }
 0xfba   : > { %v15487_v47 = vand.u32 4294901760, %v15486_v22 }
 0xfbb   : > { %20187 = vmatmul.mubr.f32.vlgmr.msra.gmra.mrb[32].mxu1 %v15034_v56 }
 0xfbc   : > { %20190 = vmatpush3.msra.mxu1 %v15045_v12  ;;  %20217 = vmatmul.mubr.f32.vlgmr.msra.gmra.mrb[40].mxu0 %v15487_v47 }
 0xfbd   : > { %20220 = vmatpush3.msra.mxu0 %v15498_v29  ;;  %20191 = vmatprep.mubr.msk.f32.mxu1 %vm21761_vm1, %v21762_v0 }
 0xfbe   : > { %20194 = vmatprep.subr.mxu1 %v21762_v0  ;;  %20221 = vmatprep.mubr.msk.f32.mxu0 %vm21761_vm1, %v21762_v0 }
 0xfbf   : > { %20224 = vmatprep.subr.mxu0 %v21762_v0 }
 0xfc3   : > { %20192 = vmatmul.mubr.f32.vlgmr.msra.gmra.mrb[32].mxu1 %v15030_v54 }
 0xfc4   : > { %20195 = vmatpush3.msra.mxu1 %v15042_v1  ;;  %20222 = vmatmul.mubr.f32.vlgmr.msra.gmra.mrb[40].mxu0 %v15483_v11 }
 0xfc5   : > { %20225 = vmatpush3.msra.mxu0 %v15495_v18  ;;  %20196 = vmatprep.mubr.msk.f32.mxu1 %vm21761_vm1, %v21762_v0 }
 0xfc6   : > { %20199 = vmatprep.subr.mxu1 %v21762_v0  ;;  %20226 = vmatprep.mubr.msk.f32.mxu0 %vm21761_vm1, %v21762_v0 }
 0xfc7   : > { %20229 = vmatprep.subr.mxu0 %v21762_v0 }
 0xfcb   : > { %20197 = vmatmul.mubr.f32.vlgmr.msra.gmra.mrb[32].mxu1 %v15031_v48  ;;  %v15898_v48 = vld [vmem:[#allocation8 + $0x30] sm:$0xff] }
 0xfcc   : > { %20200 = vmatpush3.msra.mxu1 %v14965_v31  ;;  %20227 = vmatmul.mubr.f32.vlgmr.msra.gmra.mrb[40].mxu0 %v15484_v27 }
 0xfcd   : > { %20230 = vmatpush3.msra.mxu0 %v23494_v60  ;;  %20201 = vmatprep.mubr.msk.f32.mxu1 %vm21761_vm1, %v21762_v0 }
 0xfce   : > { %20204 = vmatprep.subr.mxu1 %v21762_v0  ;;  %20231 = vmatprep.mubr.msk.f32.mxu0 %vm21761_vm1, %v21762_v0 }
 0xfcf   : > { %20234 = vmatprep.subr.mxu0 %v21762_v0 }
 0xfd3   : > { %20202 = vmatmul.mubr.f32.vlgmr.msra.gmra.mrb[32].mxu1 %v15032_v55 }
 0xfd4   : > { %20205 = vmatpush3.msra.mxu1 %v15043_v3  ;;  %20232 = vmatmul.mubr.f32.vlgmr.msra.gmra.mrb[40].mxu0 %v15485_v4  ;;  %v15976_v4 = vand.u32 4294901760, %v15898_v48 }
 0xfd5   : > { %20235 = vmatpush3.msra.mxu0 %v15496_v57  ;;  %20206 = vmatprep.mubr.msk.f32.mxu1 %vm21761_vm1, %v21762_v0  ;;  %v15897_v57 = vld [vmem:[#allocation8 + $0x28] sm:$0xff] }
 0xfd6   : > { %20209 = vmatprep.subr.mxu1 %v21762_v0  ;;  %20236 = vmatprep.mubr.msk.f32.mxu0 %vm21761_vm1, %v21762_v0  ;;  %v15973_v55 = vand.u32 4294901760, %v15897_v57  ;;  %v23548_v22 = vpack.c.bf16 %v15979_v10, %v15976_v4 }
 0xfd7   : > { %20239 = vmatprep.subr.mxu0 %v21762_v0 }
 0xfd8   : > { %v16087_v12 = vsub.f32 %v15897_v57, %v15973_v55 }
 0xfda   : > { %v16088_v29 = vand.u32 4294901760, %v16087_v12 }
 0xfdb   : > { %20207 = vmatmul.mubr.f32.vlgmr.msra.gmra.mrb[32].mxu1 %v15030_v54 }
 0xfdc   : > { %20210 = vmatpush3.msra.mxu1 %v14965_v31  ;;  %20237 = vmatmul.mubr.f32.vlgmr.msra.gmra.mrb[40].mxu0 %v15483_v11 }
 0xfdd   : > { %20240 = vmatpush3.msra.mxu0 %v23494_v60  ;;  %20211 = vmatprep.mubr.msk.f32.mxu1 %vm21761_vm1, %v21762_v0 }
 0xfde   : > { %20241 = vmatprep.mubr.msk.f32.mxu0 %vm21761_vm1, %v21762_v0 }
 0xfe3   : > { %v13141_v2 = vpop.f32.mrb[34].mxu0  ;;  %20212 = vmatmul.mubr.f32.vlgmr.msra.gmra.mrb[32].mxu1 %v15030_v54 }
 0xfe4   : > { %v12688_v53 = vpop.f32.mrb[26].mxu1  ;;  %v15908_v13 = vrot.slane %v13141_v2, 7  ;;  %v18351_v52 = vrot.slane %v13141_v2, 9  ;;  %v18357_v24 = vrot.slane %v13141_v2, 10  ;;  %20242 = vmatmul.mubr.f32.vlgmr.msra.gmra.mrb[40].mxu0 %v15483_v11  ;;  %v20063_v7 = vpop.f32.mrb[35].mxu0  ;;  %v15896_v11 = vld [vmem:[#allocation8 + $0x20] sm:$0xff] }
 0xfe5   : > { %v15871_v16 = vrot.slane %v12688_v53, 1  ;;  %v15879_v15 = vrot.slane %v12688_v53, 2  ;;  %v15887_v42 = vrot.slane %v12688_v53, 3  ;;  %v20033_v39 = vpop.f32.mrb[27].mxu1  ;;  %v15970_v27 = vand.u32 4294901760, %v15896_v11 }
 0xfe6   : > { %v15909_v32 = vsel %vm966_vm3, %v15908_v13, %v12688_v53  ;;  %v16089_v53 = vsub.f32 %v16087_v12, %v16088_v29  ;;  %v16094_v13 = vsub.f32 %v15898_v48, %v15976_v4 }
 0xfe7   : > { %v15920_v21 = vsel %vm966_vm3, %v13141_v2, %v15871_v16  ;;  %v15934_v46 = vsel %vm966_vm3, %v18351_v52, %v15879_v15  ;;  %v15948_v0 = vsel %vm966_vm3, %v18357_v24, %v15887_v42  ;;  %v23546_v63 = vpack.c.bf16 %v15973_v55, %v15970_v27 }
 0xfe8   : > { %v16080_v56 = vsub.f32 %v15896_v11, %v15970_v27  ;;  %v16101_v52 = vsub.f32 %v15899_v6, %v15979_v10  ;;  %v16090_v7 = vand.u32 4294901760, %v16089_v53  ;;  %v16095_v16 = vand.u32 4294901760, %v16094_v13 }
 0xfe9   : > { %20755 = vmatprep.subr.bf16.mxu1 %v23546_v63 }
 0xfea   : > { %20757 = vmatpush3.bf16.msra.mxu1 %v23546_v63  ;;  %v16081_v47 = vand.u32 4294901760, %v16080_v56  ;;  %v16102_v15 = vand.u32 4294901760, %v16101_v52  ;;  %v16096_v39 = vsub.f32 %v16094_v13, %v16095_v16  ;;  %v20774_v6 = vpack.c.bf16 %v16101_v52, %v16094_v13 }
 0xfeb   : > { %20759 = vmatprep.subr.bf16.mxu1 %v23548_v22 }
 0xfec   : > { %v16082_v2 = vsub.f32 %v16080_v56, %v16081_v47 }
 0xfee   : > { %20761 = vmatpush3.bf16.msra.mxu1 %v23548_v22  ;;  %v16083_v24 = vand.u32 4294901760, %v16082_v2 }
 0xff0   : > { %v23554_v42 = vpack.c.bf16 %v16090_v7, %v16083_v24 }
 0xff2   : > { %20763 = vmatprep.subr.bf16.mxu1 %v23554_v42 }
0x101e   : > { %v13594_v20 = vpop.f32.mrb[28].mxu1 }
0x101f   : > { %v15910_v25 = vrot.slane %v13594_v20, 6  ;;  %v18346_v44 = vrot.slane %v13594_v20, 7  ;;  %v15936_v19 = vsel %vm968_vm4, %v13594_v20, %v15934_v46  ;;  %v18358_v14 = vrot.slane %v13594_v20, 9  ;;  %v14047_v28 = vpop.f32.mrb[36].mxu0  ;;  %v20093_v60 = vpop.f32.mrb[29].mxu1 }
0x1020   : > { %v15912_v31 = vrot.slane %v14047_v28, 5  ;;  %v18347_v33 = vrot.slane %v14047_v28, 6  ;;  %v18353_v45 = vrot.slane %v14047_v28, 7  ;;  %v20123_v41 = vpop.f32.mrb[37].mxu0  ;;  %v16103_v46 = vsub.f32 %v16101_v52, %v16102_v15 }
0x1021   : > { %v15911_v1 = vsel %vm968_vm4, %v15910_v25, %v15909_v32  ;;  %v15922_v23 = vsel %vm968_vm4, %v18346_v44, %v15920_v21  ;;  %v15950_v18 = vsel %vm968_vm4, %v18358_v14, %v15948_v0  ;;  %v23556_v32 = vpack.c.bf16 %v16087_v12, %v16080_v56 }
0x1022   : > { %v15913_v36 = vsel %vm970_vm5, %v15912_v31, %v15911_v1  ;;  %v15924_v54 = vsel %vm970_vm5, %v18347_v33, %v15922_v23  ;;  %v15938_v62 = vsel %vm970_vm5, %v18353_v45, %v15936_v19  ;;  %v15952_v3 = vsel %vm970_vm5, %v14047_v28, %v15950_v18 }
0x1023   : > { %v16097_v45 = vand.u32 4294901760, %v16096_v39  ;;  %v16104_v55 = vand.u32 4294901760, %v16103_v46  ;;  %v23567_v56 = vpack.c.bf16 %v16088_v29, %v16081_v47 }
0x1025   : > { %v20766_v10 = vpack.c.bf16 %v16104_v55, %v16097_v45 }
0x1051   : > { %v14500_v21 = vpop.f32.mrb[30].mxu1 }
0x1052   : > { %v15914_v0 = vrot.slane %v14500_v21, 4  ;;  %v18348_v20 = vrot.slane %v14500_v21, 5  ;;  %v18354_v25 = vrot.slane %v14500_v21, 6  ;;  %v18360_v44 = vrot.slane %v14500_v21, 7  ;;  %v14953_v19 = vpop.f32.mrb[38].mxu0  ;;  %v20153_v14 = vpop.f32.mrb[31].mxu1 }
0x1053   : > { %v15892_v28 = vrot.slane %v14953_v19, 3  ;;  %v18349_v60 = vrot.slane %v14953_v19, 4  ;;  %v18355_v31 = vrot.slane %v14953_v19, 5  ;;  %v20183_v33 = vpop.f32.mrb[39].mxu0 }
0x1054   : > { %v15954_v41 = vsel %vm972_vm6, %v18360_v44, %v15952_v3  ;;  %v15915_v1 = vsel %vm972_vm6, %v15914_v0, %v15913_v36  ;;  %v15926_v23 = vsel %vm972_vm6, %v18348_v20, %v15924_v54  ;;  %v15940_v18 = vsel %vm972_vm6, %v18354_v25, %v15938_v62 }
0x1055   : > { %v15916_v11 = vsel %vm974_vm7, %v15892_v28, %v15915_v1  ;;  %v15928_v57 = vsel %vm974_vm7, %v18349_v60, %v15926_v23  ;;  %v15942_v48 = vsel %vm974_vm7, %v18355_v31, %v15940_v18  ;;  %v15955_v27 = vrot.slane %v15892_v28, 3 }
0x1056   : > { %v23569_v3 = vpack.c.bf16 %v16102_v15, %v16095_v16 }
0x1057   : > { %v15956_v4 = vsel %vm974_vm7, %v15955_v27, %v15954_v41 }
0x10b6   : > { %v15406_v36 = vpop.f32.mrb[32].mxu1 }
0x10b7   : > { %v15885_v54 = vrot.slane %v15406_v36, 2  ;;  %v18350_v12 = vrot.slane %v15406_v36, 3  ;;  %v18361_v62 = vrot.slane %v15406_v36, 5  ;;  %v15859_v2 = vpop.f32.mrb[40].mxu0  ;;  %v20213_v53 = vpop.f32.mrb[33].mxu1 }
0x10b8   : > { %v15878_v24 = vrot.slane %v15859_v2, 1  ;;  %v18362_v7 = vrot.slane %v15859_v2, 4  ;;  %v20243_v39 = vpop.f32.mrb[41].mxu0  ;;  %v18356_v16 = vrot.slane %v15859_v2, 3 }
0x10b9   : > { %v15917_v21 = vsel %vm976_vm8, %v15885_v54, %v15916_v11  ;;  %v15930_v13 = vsel %vm976_vm8, %v18350_v12, %v15928_v57  ;;  %v15943_v52 = vrot.slane %v15885_v54, 2  ;;  %v15958_v46 = vsel %vm976_vm8, %v18361_v62, %v15956_v4 }
0x10ba   : > { %v15918_v47 = vsel %vm978_vm9, %v15878_v24, %v15917_v21  ;;  %v15931_v29 = vrot.slane %v15878_v24, 1  ;;  %v15960_v15 = vsel %vm978_vm9, %v18362_v7, %v15958_v46 }
0x10bb   : > { %v15944_v0 = vsel %vm976_vm8, %v15943_v52, %v15942_v48  ;;  %v15961_v20 = vsel %vm1463_vm10, %v15918_v47, 0  ;;  %v15967_v25 = vsel %vm1463_vm10, %v15960_v15, 0 }
0x10bc   : > { %v15932_v44 = vsel %vm978_vm9, %v15931_v29, %v15930_v13  ;;  %v15946_v19 = vsel %vm978_vm9, %v18356_v16, %v15944_v0  ;;  %v16038_v14 = vand.u32 4294901760, %v15961_v20  ;;  %v16068_v28 = vand.u32 4294901760, %v15967_v25 }
0x10bd   : > { %v15963_v60 = vsel %vm1463_vm10, %v15932_v44, 0  ;;  %v15965_v31 = vsel %vm1463_vm10, %v15946_v19, 0 }
0x10be   : > { %v16048_v33 = vand.u32 4294901760, %v15963_v60  ;;  %v16058_v45 = vand.u32 4294901760, %v15965_v31  ;;  %v16039_v41 = vsub.f32 %v15961_v20, %v16038_v14  ;;  %v16069_v1 = vsub.f32 %v15967_v25, %v16068_v28 }
0x10c0   : > { %v16049_v23 = vsub.f32 %v15963_v60, %v16048_v33  ;;  %v16040_v18 = vand.u32 4294901760, %v16039_v41  ;;  %v16059_v11 = vsub.f32 %v15965_v31, %v16058_v45  ;;  %v16070_v55 = vand.u32 4294901760, %v16069_v1 }
0x10c2   : > { %v16041_v57 = vsub.f32 %v16039_v41, %v16040_v18  ;;  %v16050_v48 = vand.u32 4294901760, %v16049_v23  ;;  %v16060_v27 = vand.u32 4294901760, %v16059_v11  ;;  %v16071_v2 = vsub.f32 %v16069_v1, %v16070_v55 }
0x10c4   : > { %v16042_v4 = vand.u32 4294901760, %v16041_v57  ;;  %v16051_v36 = vsub.f32 %v16049_v23, %v16050_v48  ;;  %v16061_v54 = vsub.f32 %v16059_v11, %v16060_v27  ;;  %v16072_v53 = vand.u32 4294901760, %v16071_v2  ;;  %v16664_v2 = vld [vmem:[#allocation10 + $0x30] sm:$0xff] }
0x10c6   : > { %20252 = vmatprep.mubr.f32.mxu1 %v16042_v4  ;;  %v16052_v12 = vand.u32 4294901760, %v16051_v36  ;;  %v16062_v62 = vand.u32 4294901760, %v16061_v54 }
0x10c8   : > { %20253 = vmatmul.mubr.f32.vlgmr.msra.gmra.mrb[34].mxu1 %v16052_v12 }
0x10c9   : > { %20255 = vmatprep.mubr.f32.mxu1 %v16062_v62  ;;  %20765 = vmatpush3.bf16.msra.mxu1 %v23554_v42  ;;  %v18344_v42 = vld [vmem:[%s23891_s9 + $0x1] ss:$0 sm:$0xff]  ;;  %v16663_v62 = vld [vmem:[#allocation10 + $0x28] sm:$0xff] }
0x10ca   : > { %20767 = vmatprep.subr.bf16.mxu1 %v20766_v10 }
0x10cc   : > { %20256 = vmatmul.mubr.f32.gmra.mrb[36].mxu1 %v16072_v53 }
0x10cd   : > { %20769 = vmatpush3.bf16.msra.mxu1 %v20766_v10  ;;  %20266 = vmatprep.mubr.f32.mxu1 %v16038_v14 }
0x10ce   : > { %20771 = vmatprep.subr.bf16.mxu1 %v23556_v32 }
0x10d0   : > { %20267 = vmatmul.mubr.f32.vlgmr.msra.gmra.mrb[34].mxu1 %v16048_v33 }
0x10d1   : > { %20269 = vmatprep.mubr.f32.mxu1 %v16058_v45  ;;  %20773 = vmatpush3.bf16.msra.mxu1 %v23556_v32 }
0x10d2   : > { %20775 = vmatprep.subr.bf16.mxu1 %v20774_v6 }
0x10d4   : > { %20270 = vmatmul.mubr.f32.gmra.mrb[36].mxu1 %v16068_v28 }
0x10d5   : > { %20777 = vmatpush3.bf16.msra.mxu1 %v20774_v6  ;;  %20280 = vmatprep.mubr.f32.mxu1 %v16039_v41 }
0x10d6   : > { %20779 = vmatprep.subr.bf16.mxu1 %v23546_v63 }
0x10d8   : > { %20281 = vmatmul.mubr.f32.vlgmr.msra.gmra.mrb[34].mxu1 %v16049_v23 }
0x10d9   : > { %20283 = vmatprep.mubr.f32.mxu1 %v16059_v11  ;;  %20781 = vmatpush3.bf16.msra.mxu1 %v23546_v63 }
0x10da   : > { %20783 = vmatprep.subr.bf16.mxu1 %v23548_v22 }
0x10dc   : > { %20284 = vmatmul.mubr.f32.gmra.mrb[36].mxu1 %v16069_v1 }
0x10dd   : > { %20785 = vmatpush3.bf16.msra.mxu1 %v23548_v22  ;;  %20294 = vmatprep.mubr.f32.mxu1 %v16040_v18 }
0x10de   : > { %20787 = vmatprep.subr.bf16.mxu1 %v23567_v56 }
0x10e0   : > { %20295 = vmatmul.mubr.f32.vlgmr.msra.gmra.mrb[34].mxu1 %v16050_v48 }
0x10e1   : > { %20297 = vmatprep.mubr.f32.mxu1 %v16060_v27  ;;  %20789 = vmatpush3.bf16.msra.mxu1 %v23567_v56 }
0x10e2   : > { %20791 = vmatprep.subr.bf16.mxu1 %v23569_v3 }
0x10e4   : > { %20298 = vmatmul.mubr.f32.gmra.mrb[36].mxu1 %v16070_v55 }
0x10e5   : > { %20793 = vmatpush3.bf16.msra.mxu1 %v23569_v3  ;;  %20308 = vmatprep.mubr.f32.mxu1 %v16038_v14 }
0x10e6   : > { %20795 = vmatprep.subr.bf16.mxu1 %v23546_v63 }
0x10e8   : > { %20309 = vmatmul.mubr.f32.vlgmr.msra.gmra.mrb[34].mxu1 %v16048_v33 }
0x10e9   : > { %20311 = vmatprep.mubr.f32.mxu1 %v16058_v45  ;;  %20797 = vmatpush3.bf16.msra.mxu1 %v23546_v63 }
0x10ea   : > { %20799 = vmatprep.subr.bf16.mxu1 %v23548_v22 }
0x10ec   : > { %20312 = vmatmul.mubr.f32.gmra.mrb[36].mxu1 %v16068_v28 }
0x10ed   : > { %20801 = vmatpush3.bf16.msra.mxu1 %v23548_v22  ;;  %20322 = vmatprep.mubr.f32.mxu1 %v16038_v14 }
0x10f0   : > { %20323 = vmatmul.mubr.f32.vlgmr.msra.gmra.mrb[34].mxu1 %v16048_v33 }
0x10f1   : > { %20325 = vmatprep.mubr.f32.mxu1 %v16058_v45  ;;  %v21531_v45 = vld [vmem:[%s23929_s1] ss:$0 sm:$0xff] }
0x10f2   : > { %v20921_v41 = vadd.f32 %v21531_v45, %v23117_v30  ;;  %v20922_v23 = vadd.f32 %v21531_v45, %v23119_v49  ;;  %v20924_v49 = vadd.f32 %v21531_v45, %v23132_v9  ;;  %v16662_v9 = vld [vmem:[#allocation10 + $0x20] sm:$0xff] }
0x10f3   : > { %v16687_v53 = vand.u32 4294901760, %v16662_v9 }
0x10f4   : > { %20326 = vmatmul.mubr.f32.gmra.mrb[36].mxu1 %v16068_v28  ;;  %v23633_v30 = vadd.f32 %v20921_v41, %v22697_v37  ;;  %v23636_v55 = vadd.f32 %v20922_v23, %v22700_v50  ;;  %v23642_v54 = vadd.f32 %v20924_v49, %v22712_v61  ;;  %v16693_v61 = vand.u32 4294901760, %v16664_v2 }
0x10f6   : > { %v7755_v12 = vsel %vm1463_vm10, %v23633_v30, 0.0  ;;  %v7752_v37 = vsel %vm1463_vm10, %v23636_v55, 0.0  ;;  %v7758_v50 = vsel %vm1463_vm10, %v23642_v54, 0.0 }
0x11c3   : > { %v20324_v32 = vpop.f32.mrb[34].mxu1 }
0x11c4   : > { %v20929_v6 = vadd.f32 %v20324_v32, %v18344_v42  ;;  %v16561_v10 = vpop.f32.mrb[35].mxu1  ;;  %v16665_v32 = vld [vmem:[#allocation10 + $0x38] sm:$0xff] }
0x11c5   : > { %v20930_v56 = vadd.f32 %v18344_v42, %v16561_v10 }
0x11c6   : > { %v16584_v3 = vmax.f32 %v20929_v6, 0.0  ;;  %v16696_v6 = vand.u32 4294901760, %v16665_v32 }
0x11c7   : > { %v16583_v24 = vmax.f32 %v20930_v56, 0.0  ;;  %v20327_v63 = vpop.f32.mrb[36].mxu1 }
0x11c8   : > { %v16590_v7 = vadd.f32 %v16584_v3, %v22296_v59  ;;  %v20931_v39 = vadd.f32 %v20327_v63, %v18344_v42  ;;  %v16573_v21 = vpop.f32.mrb[37].mxu1  ;;  %v23652_v56 = vpack.c.bf16 %v16696_v6, %v16693_v61  ;;  %v16797_v3 = vsub.f32 %v16662_v9, %v16687_v53 }
0x11c9   : > { %v16589_v22 = vadd.f32 %v16583_v24, %v22271_v51  ;;  %v20932_v13 = vadd.f32 %v18344_v42, %v16573_v21  ;;  %v16690_v42 = vand.u32 4294901760, %v16663_v62 }
0x11ca   : > { %v16586_v52 = vmax.f32 %v20931_v39, 0.0  ;;  %v16596_v46 = vsel %vm1463_vm10, %v16590_v7, 0.0  ;;  %v16798_v63 = vand.u32 4294901760, %v16797_v3 }
0x11cb   : > { %v16585_v47 = vmax.f32 %v20932_v13, 0.0  ;;  %16597 = vadd.xlane.f32.xlu0 %v16596_v46  ;;  %v16593_v29 = vsel %vm1463_vm10, %v16589_v22, 0.0  ;;  %v23650_v10 = vpack.c.bf16 %v16690_v42, %v16687_v53  ;;  %v16804_v24 = vsub.f32 %v16663_v62, %v16690_v42 }
0x11cc   : > { %v16592_v16 = vadd.f32 %v16586_v52, %v22314_v8  ;;  %16594 = vadd.xlane.f32.xlu1 %v16593_v29  ;;  %v16799_v39 = vsub.f32 %v16797_v3, %v16798_v63  ;;  %v16818_v13 = vsub.f32 %v16665_v32, %v16696_v6 }
0x11cd   : > { %v16591_v15 = vadd.f32 %v16585_v47, %v22294_v58  ;;  %20803 = vmatprep.subr.bf16.mxu0 %v23650_v10 }
0x11ce   : > { %v16602_v0 = vsel %vm1463_vm10, %v16592_v16, 0.0  ;;  %20805 = vmatpush3.bf16.msra.mxu0 %v23650_v10  ;;  %v16800_v52 = vand.u32 4294901760, %v16799_v39  ;;  %v16819_v29 = vand.u32 4294901760, %v16818_v13 }
0x11cf   : > { %v16599_v59 = vsel %vm1463_vm10, %v16591_v15, 0.0  ;;  %20807 = vmatprep.subr.bf16.mxu0 %v23652_v56 }
0x11d0   : > { %16600 = vadd.xlane.f32.xlu0 %v16599_v59  ;;  %16603 = vadd.xlane.f32.xlu1 %v16602_v0  ;;  %v16820_v0 = vsub.f32 %v16818_v13, %v16819_v29  ;;  %v23660_v59 = vpack.c.bf16 %v16804_v24, %v16797_v3 }
0x11d2   : > { %20809 = vmatpush3.bf16.msra.mxu0 %v23652_v56 }
0x1258   : > { %v16598_v51 = vpop.xlane.xlu0 %16597 }
0x1259   : > { %v16606_v20 = vmul.f32 0.03125, %v16598_v51  ;;  %v16595_v25 = vpop.xlane.xlu1 %16594 }
0x125a   : > { %v16605_v44 = vmul.f32 0.03125, %v16595_v25 }
0x125b   : > { %v23609_v19 = vsub.f32 %v16590_v7, %v16606_v20  ;;  %v16805_v7 = vand.u32 4294901760, %v16804_v24  ;;  %v16821_v20 = vand.u32 4294901760, %v16820_v0 }
0x125c   : > { %v23611_v14 = vsub.f32 %v16589_v22, %v16605_v44  ;;  %v16811_v22 = vsub.f32 %v16664_v2, %v16693_v61 }
0x125d   : > { %v16601_v28 = vpop.xlane.xlu0 %16600  ;;  %v16604_v60 = vpop.xlane.xlu1 %16603  ;;  %v16614_v8 = vmul.f32 %v23609_v19, %v23609_v19  ;;  %v16806_v21 = vsub.f32 %v16804_v24, %v16805_v7 }
0x125e   : > { %v16607_v58 = vmul.f32 0.03125, %v16601_v28  ;;  %v16608_v31 = vmul.f32 0.03125, %v16604_v60  ;;  %v16613_v33 = vmul.f32 %v23611_v14, %v23611_v14  ;;  %v16812_v47 = vand.u32 4294901760, %v16811_v22 }
0x125f   : > { %v16620_v1 = vsel %vm1463_vm10, %v16614_v8, 0.0  ;;  %v16807_v46 = vand.u32 4294901760, %v16806_v21  ;;  %v23665_v44 = vpack.c.bf16 %v16818_v13, %v16811_v22  ;;  %v23667_v28 = vpack.c.bf16 %v16805_v7, %v16798_v63 }
0x1260   : > { %v23623_v18 = vsub.f32 %v16591_v15, %v16607_v58  ;;  %v23625_v11 = vsub.f32 %v16592_v16, %v16608_v31  ;;  %16621 = vadd.xlane.f32.xlu1 %v16620_v1  ;;  %v16617_v57 = vsel %vm1463_vm10, %v16613_v33, 0.0  ;;  %v16813_v15 = vsub.f32 %v16811_v22, %v16812_v47 }
0x1261   : > { %16618 = vadd.xlane.f32.xlu0 %v16617_v57  ;;  %v23658_v16 = vpack.c.bf16 %v16807_v46, %v16800_v52  ;;  %v23669_v60 = vpack.c.bf16 %v16819_v29, %v16812_v47 }
0x1262   : > { %v16615_v48 = vmul.f32 %v23623_v18, %v23623_v18  ;;  %v16616_v27 = vmul.f32 %v23625_v11, %v23625_v11  ;;  %v16814_v51 = vand.u32 4294901760, %v16813_v15 }
0x1263   : > { %20811 = vmatprep.subr.bf16.mxu0 %v23658_v16 }
0x1264   : > { %v16623_v4 = vsel %vm1463_vm10, %v16615_v48, 0.0  ;;  %v16626_v36 = vsel %vm1463_vm10, %v16616_v27, 0.0  ;;  %v23663_v25 = vpack.c.bf16 %v16821_v20, %v16814_v51 }
0x1265   : > { %16624 = vadd.xlane.f32.xlu0 %v16623_v4  ;;  %16627 = vadd.xlane.f32.xlu1 %v16626_v36  ;;  %v23674_v4 = vld [vmem:[%s23894_s12 + $0x4] sm:$0xf] }
0x1266   : > { %v16648_v36 = vrot.slane %v23674_v4, %v22137_v35 }
0x1269   : > { %7756 = vadd.xlane.f32.xlu1 %v7755_v12  ;;  %7753 = vadd.xlane.f32.xlu0 %v7752_v37 }
0x126d   : > { %7759 = vadd.xlane.f32.xlu0 %v7758_v50  ;;  %v16656_v50 = vrot.slane %v23674_v4, %v22141_v38 }
0x12ed   : > { %v16622_v8 = vpop.xlane.xlu1 %16621 }
0x12ee   : > { %v16630_v58 = vmul.f32 0.03125, %v16622_v8  ;;  %v16619_v31 = vpop.xlane.xlu0 %16618 }
0x12ef   : > { %v16629_v33 = vmul.f32 0.03125, %v16619_v31 }
0x12f0   : > { %v16634_v45 = vadd.f32 1e-05, %v16630_v58 }
0x12f1   : > { %v16633_v41 = vadd.f32 1e-05, %v16629_v33 }
0x12f2   : > { %21503 = vrsqrt.f32 %v16634_v45  ;;  %v16625_v1 = vpop.xlane.xlu0 %16624  ;;  %v16628_v23 = vpop.xlane.xlu1 %16627 }
0x12f3   : > { %21505 = vrsqrt.f32 %v16633_v41  ;;  %v16631_v57 = vmul.f32 0.03125, %v16625_v1  ;;  %v16632_v48 = vmul.f32 0.03125, %v16628_v23 }
0x12f5   : > { %v16635_v27 = vadd.f32 1e-05, %v16631_v57  ;;  %v16636_v49 = vadd.f32 1e-05, %v16632_v48 }
0x12f7   : > { %21507 = vrsqrt.f32 %v16635_v27 }
0x12f8   : > { %21509 = vrsqrt.f32 %v16636_v49 }
0x12fc   : > { %v21504_v12 = vpop.eup %21503 }
0x12fd   : > { %v21506_v37 = vpop.eup %21505  ;;  %v16642_v9 = vmul.f32 %v21504_v12, %v23609_v19 }
0x12fe   : > { %v16641_v62 = vmul.f32 %v21506_v37, %v23611_v14 }
0x12ff   : > { %v16650_v2 = vmul.f32 %v16648_v36, %v16642_v9 }
0x1300   : > { %v16649_v53 = vmul.f32 %v16648_v36, %v16641_v62 }
0x1301   : > { %v21508_v42 = vpop.eup %21507  ;;  %v23682_v32 = vadd.f32 %v16656_v50, %v16650_v2 }
0x1302   : > { %v21510_v61 = vpop.eup %21509  ;;  %v16643_v6 = vmul.f32 %v21508_v42, %v23623_v18  ;;  %v23685_v3 = vadd.f32 %v16656_v50, %v16649_v53 }
0x1303   : > { %v16644_v24 = vmul.f32 %v21510_v61, %v23625_v11  ;;  %v16678_v63 = vsel %vm1463_vm10, %v23682_v32, 0 }
0x1304   : > { %v16675_v19 = vsel %vm1463_vm10, %v23685_v3, 0  ;;  %v23692_v7 = vand.u32 4294901760, %v16678_v63  ;;  %v16651_v14 = vmul.f32 %v16648_v36, %v16643_v6 }
0x1305   : > { %v16755_v39 = vand.u32 4294901760, %v16675_v19  ;;  %v16652_v21 = vmul.f32 %v16648_v36, %v16644_v24 }
0x1306   : > { %v16766_v22 = vsub.f32 %v16678_v63, %v23692_v7  ;;  %v23695_v13 = vadd.f32 %v16656_v50, %v16651_v14 }
0x1307   : > { %v16756_v18 = vsub.f32 %v16675_v19, %v16755_v39  ;;  %v23697_v52 = vadd.f32 %v16656_v50, %v16652_v21 }
0x1308   : > { %v16767_v46 = vand.u32 4294901760, %v16766_v22  ;;  %v16681_v11 = vsel %vm1463_vm10, %v23695_v13, 0 }
0x1309   : > { %v16757_v47 = vand.u32 4294901760, %v16756_v18  ;;  %v16775_v29 = vand.u32 4294901760, %v16681_v11  ;;  %v16684_v15 = vsel %vm1463_vm10, %v23697_v52, 0 }
0x130a   : > { %v16768_v0 = vsub.f32 %v16766_v22, %v16767_v46  ;;  %v16785_v51 = vand.u32 4294901760, %v16684_v15 }
0x130b   : > { %v16758_v20 = vsub.f32 %v16756_v18, %v16757_v47  ;;  %v16776_v8 = vsub.f32 %v16681_v11, %v16775_v29 }
0x130c   : > { %v16786_v58 = vsub.f32 %v16684_v15, %v16785_v51  ;;  %v16769_v45 = vand.u32 4294901760, %v16768_v0 }
0x130d   : > { %v16759_v31 = vand.u32 4294901760, %v16758_v20  ;;  %v16777_v33 = vand.u32 4294901760, %v16776_v8 }
0x130e   : > { %v16787_v41 = vand.u32 4294901760, %v16786_v58 }
0x130f   : > { %20336 = vmatprep.mubr.f32.mxu0 %v16759_v31  ;;  %v16778_v1 = vsub.f32 %v16776_v8, %v16777_v33 }
0x1310   : > { %20337 = vmatmul.mubr.f32.vlgmr.msra.gmra.mrb[42].mxu0 %v16769_v45  ;;  %v16788_v23 = vsub.f32 %v16786_v58, %v16787_v41 }
0x1311   : > { %20813 = vmatpush3.bf16.msra.mxu0 %v23658_v16  ;;  %v16779_v57 = vand.u32 4294901760, %v16778_v1  ;;  %v17305_v16 = vld [vmem:[#allocation11 + $0x20] sm:$0xff] }
0x1312   : > { %v16789_v48 = vand.u32 4294901760, %v16788_v23  ;;  %20815 = vmatprep.subr.bf16.mxu0 %v23663_v25 }
0x1313   : > { %20339 = vmatprep.mubr.f32.mxu0 %v16779_v57 }
0x1314   : > { %20340 = vmatmul.mubr.f32.gmra.mrb[44].mxu0 %v16789_v48 }
0x1315   : > { %20817 = vmatpush3.bf16.msra.mxu0 %v23663_v25  ;;  %20350 = vmatprep.mubr.f32.mxu0 %v16755_v39  ;;  %v17307_v25 = vld [vmem:[#allocation11 + $0x30] sm:$0xff] }
0x1316   : > { %20819 = vmatprep.subr.bf16.mxu0 %v23660_v59  ;;  %v17336_v27 = vand.u32 4294901760, %v17307_v25 }
0x1318   : > { %20351 = vmatmul.mubr.f32.vlgmr.msra.gmra.mrb[42].mxu0 %v23692_v7  ;;  %v17454_v2 = vsub.f32 %v17307_v25, %v17336_v27 }
0x1319   : > { %20353 = vmatprep.mubr.f32.mxu0 %v16775_v29  ;;  %20821 = vmatpush3.bf16.msra.mxu0 %v23660_v59  ;;  %v17306_v59 = vld [vmem:[#allocation11 + $0x28] sm:$0xff] }
0x131a   : > { %20823 = vmatprep.subr.bf16.mxu0 %v23665_v44  ;;  %v17455_v6 = vand.u32 4294901760, %v17454_v2 }
0x131c   : > { %20354 = vmatmul.mubr.f32.gmra.mrb[44].mxu0 %v16785_v51  ;;  %v17456_v19 = vsub.f32 %v17454_v2, %v17455_v6 }
0x131d   : > { %20825 = vmatpush3.bf16.msra.mxu0 %v23665_v44  ;;  %20364 = vmatprep.mubr.f32.mxu0 %v16756_v18  ;;  %v17330_v44 = vand.u32 4294901760, %v17305_v16 }
0x131e   : > { %20827 = vmatprep.subr.bf16.mxu0 %v23650_v10 }
0x131f   : > { %v17440_v12 = vsub.f32 %v17305_v16, %v17330_v44 }
0x1320   : > { %20365 = vmatmul.mubr.f32.vlgmr.msra.gmra.mrb[42].mxu0 %v16766_v22 }
0x1321   : > { %20367 = vmatprep.mubr.f32.mxu0 %v16776_v8  ;;  %20829 = vmatpush3.bf16.msra.mxu0 %v23650_v10 }
0x1322   : > { %20831 = vmatprep.subr.bf16.mxu0 %v23652_v56 }
0x1324   : > { %20368 = vmatmul.mubr.f32.gmra.mrb[44].mxu0 %v16786_v58 }
0x1325   : > { %20833 = vmatpush3.bf16.msra.mxu0 %v23652_v56  ;;  %20378 = vmatprep.mubr.f32.mxu0 %v16757_v47  ;;  %v18365_v47 = vld [vmem:[%s23928_s29 + $0x1] ss:$0 sm:$0xff] }
0x1326   : > { %20835 = vmatprep.subr.bf16.mxu0 %v23667_v28 }
0x1328   : > { %20379 = vmatmul.mubr.f32.vlgmr.msra.gmra.mrb[42].mxu0 %v16767_v46 }
0x1329   : > { %20381 = vmatprep.mubr.f32.mxu0 %v16777_v33  ;;  %20837 = vmatpush3.bf16.msra.mxu0 %v23667_v28  ;;  %v17333_v28 = vand.u32 4294901760, %v17306_v59 }
0x132a   : > { %20839 = vmatprep.subr.bf16.mxu0 %v23669_v60 }
0x132b   : > { %v23725_v36 = vpack.c.bf16 %v17333_v28, %v17330_v44  ;;  %v17447_v37 = vsub.f32 %v17306_v59, %v17333_v28 }
0x132c   : > { %20382 = vmatmul.mubr.f32.gmra.mrb[44].mxu0 %v16787_v41 }
0x132d   : > { %20841 = vmatpush3.bf16.msra.mxu0 %v23669_v60  ;;  %20392 = vmatprep.mubr.f32.mxu0 %v16755_v39  ;;  %v17308_v60 = vld [vmem:[#allocation11 + $0x38] sm:$0xff]  ;;  %v17448_v50 = vand.u32 4294901760, %v17447_v37  ;;  %v20866_v14 = vpack.c.bf16 %v17447_v37, %v17440_v12 }
0x132e   : > { %20843 = vmatprep.subr.bf16.mxu0 %v23650_v10  ;;  %v17339_v49 = vand.u32 4294901760, %v17308_v60  ;;  %20851 = vmatprep.subr.bf16.mxu1 %v23725_v36 }
0x132f   : > { %20853 = vmatpush3.bf16.msra.mxu1 %v23725_v36  ;;  %v17449_v62 = vsub.f32 %v17447_v37, %v17448_v50 }
0x1330   : > { %20393 = vmatmul.mubr.f32.vlgmr.msra.gmra.mrb[42].mxu0 %v23692_v7  ;;  %v17461_v53 = vsub.f32 %v17308_v60, %v17339_v49 }
0x1331   : > { %20395 = vmatprep.mubr.f32.mxu0 %v16775_v29  ;;  %20845 = vmatpush3.bf16.msra.mxu0 %v23650_v10  ;;  %v23727_v10 = vpack.c.bf16 %v17339_v49, %v17336_v27  ;;  %v17450_v61 = vand.u32 4294901760, %v17449_v62 }
0x1332   : > { %20847 = vmatprep.subr.bf16.mxu0 %v23652_v56  ;;  %v17462_v24 = vand.u32 4294901760, %v17461_v53  ;;  %v20870_v18 = vpack.c.bf16 %v17461_v53, %v17454_v2 }
0x1333   : > { %20855 = vmatprep.subr.bf16.mxu1 %v23727_v10 }
0x1334   : > { %20396 = vmatmul.mubr.f32.gmra.mrb[44].mxu0 %v16785_v51  ;;  %20857 = vmatpush3.bf16.msra.mxu1 %v23727_v10  ;;  %v23735_v11 = vpack.c.bf16 %v17462_v24, %v17455_v6 }
0x1335   : > { %20849 = vmatpush3.bf16.msra.mxu0 %v23652_v56  ;;  %20406 = vmatprep.mubr.f32.mxu0 %v16755_v39  ;;  %v17441_v56 = vand.u32 4294901760, %v17440_v12  ;;  %v17457_v39 = vand.u32 4294901760, %v17456_v19 }
0x1337   : > { %v17442_v9 = vsub.f32 %v17440_v12, %v17441_v56  ;;  %v23733_v46 = vpack.c.bf16 %v17448_v50, %v17441_v56 }
0x1338   : > { %20407 = vmatmul.mubr.f32.vlgmr.msra.gmra.mrb[42].mxu0 %v23692_v7  ;;  %v17463_v7 = vsub.f32 %v17461_v53, %v17462_v24 }
0x1339   : > { %20409 = vmatprep.mubr.f32.mxu0 %v16775_v29  ;;  %v17443_v42 = vand.u32 4294901760, %v17442_v9 }
0x133a   : > { %v17464_v21 = vand.u32 4294901760, %v17463_v7  ;;  %v18367_v7 = vld [vmem:[%s23929_s1 + $0x1] ss:$0 sm:$0xff] }
0x133b   : > { %v20858_v63 = vpack.c.bf16 %v17450_v61, %v17443_v42 }
0x133c   : > { %20410 = vmatmul.mubr.f32.gmra.mrb[44].mxu0 %v16785_v51  ;;  %v20862_v22 = vpack.c.bf16 %v17464_v21, %v17457_v39 }
0x133d   : > { %20859 = vmatprep.subr.bf16.mxu1 %v20858_v63 }
0x140b   : > { %v20408_v29 = vpop.f32.mrb[42].mxu0 }
0x140c   : > { %v20933_v15 = vadd.f32 %v20408_v29, %v18365_v47  ;;  %v17278_v0 = vpop.f32.mrb[43].mxu0  ;;  %v7751_v29 = vadd.f32 %v23130_v5, %v22715_v17 }
0x140d   : > { %v20934_v51 = vadd.f32 %v18365_v47, %v17278_v0 }
0x140e   : > { %v17301_v20 = vmax.f32 %v20933_v15, 0.0  ;;  %v7761_v17 = vsel %vm1463_vm10, %v7751_v29, 0.0 }
0x140f   : > { %v17300_v8 = vmax.f32 %v20934_v51, 0.0  ;;  %v20411_v58 = vpop.f32.mrb[44].mxu0 }
0x1410   : > { %v17321_v31 = vsel %vm1463_vm10, %v17301_v20, 0  ;;  %v20935_v33 = vadd.f32 %v20411_v58, %v18365_v47  ;;  %v17290_v45 = vpop.f32.mrb[45].mxu0 }
0x1411   : > { %v23741_v41 = vand.u32 4294901760, %v17321_v31  ;;  %v17318_v1 = vsel %vm1463_vm10, %v17300_v8, 0  ;;  %v20936_v23 = vadd.f32 %v18365_v47, %v17290_v45 }
0x1412   : > { %v17398_v57 = vand.u32 4294901760, %v17318_v1  ;;  %v17303_v48 = vmax.f32 %v20935_v33, 0.0 }
0x1413   : > { %v17409_v16 = vsub.f32 %v17321_v31, %v23741_v41  ;;  %v17302_v59 = vmax.f32 %v20936_v23, 0.0 }
0x1414   : > { %v17399_v25 = vsub.f32 %v17318_v1, %v17398_v57  ;;  %v17327_v44 = vsel %vm1463_vm10, %v17303_v48, 0 }
0x1415   : > { %v17410_v28 = vand.u32 4294901760, %v17409_v16  ;;  %v17428_v60 = vand.u32 4294901760, %v17327_v44  ;;  %v17324_v27 = vsel %vm1463_vm10, %v17302_v59, 0 }
0x1416   : > { %v17418_v49 = vand.u32 4294901760, %v17324_v27  ;;  %v17400_v12 = vand.u32 4294901760, %v17399_v25 }
0x1417   : > { %v17411_v37 = vsub.f32 %v17409_v16, %v17410_v28  ;;  %v17429_v56 = vsub.f32 %v17327_v44, %v17428_v60 }
0x1418   : > { %v17419_v50 = vsub.f32 %v17324_v27, %v17418_v49  ;;  %v17401_v9 = vsub.f32 %v17399_v25, %v17400_v12 }
0x1419   : > { %v17430_v62 = vand.u32 4294901760, %v17429_v56  ;;  %v17412_v42 = vand.u32 4294901760, %v17411_v37 }
0x141a   : > { %v17402_v2 = vand.u32 4294901760, %v17401_v9  ;;  %v17420_v53 = vand.u32 4294901760, %v17419_v50 }
0x141b   : > { %v17431_v61 = vsub.f32 %v17429_v56, %v17430_v62 }
0x141c   : > { %20420 = vmatprep.mubr.f32.mxu1 %v17402_v2  ;;  %v17421_v6 = vsub.f32 %v17419_v50, %v17420_v53 }
0x141d   : > { %20421 = vmatmul.mubr.f32.vlgmr.msra.gmra.mrb[38].mxu1 %v17412_v42  ;;  %v17432_v19 = vand.u32 4294901760, %v17431_v61 }
0x141e   : > { %20861 = vmatpush3.bf16.msra.mxu1 %v20858_v63  ;;  %v17422_v24 = vand.u32 4294901760, %v17421_v6  ;;  %v7754_v63 = vpop.xlane.xlu0 %7753 }
0x141f   : > { %20863 = vmatprep.subr.bf16.mxu1 %v20862_v22  ;;  %v7764_v39 = vmul.f32 0.03125, %v7754_v63 }
0x1420   : > { %20423 = vmatprep.mubr.f32.mxu1 %v17422_v24 }
0x1421   : > { %20424 = vmatmul.mubr.f32.gmra.mrb[40].mxu1 %v17432_v19  ;;  %v23770_v0 = vsub.f32 %v23636_v55, %v7764_v39 }
0x1422   : > { %20865 = vmatpush3.bf16.msra.mxu1 %v20862_v22  ;;  %20434 = vmatprep.mubr.f32.mxu1 %v17398_v57 }
0x1423   : > { %20867 = vmatprep.subr.bf16.mxu1 %v20866_v14 }
0x1425   : > { %20435 = vmatmul.mubr.f32.vlgmr.msra.gmra.mrb[38].mxu1 %v23741_v41 }
0x1426   : > { %20437 = vmatprep.mubr.f32.mxu1 %v17418_v49  ;;  %20869 = vmatpush3.bf16.msra.mxu1 %v20866_v14 }
0x1427   : > { %20871 = vmatprep.subr.bf16.mxu1 %v20870_v18 }
0x1429   : > { %20438 = vmatmul.mubr.f32.gmra.mrb[40].mxu1 %v17428_v60 }
0x142a   : > { %20873 = vmatpush3.bf16.msra.mxu1 %v20870_v18  ;;  %20448 = vmatprep.mubr.f32.mxu1 %v17399_v25 }
0x142b   : > { %20875 = vmatprep.subr.bf16.mxu1 %v23725_v36 }
0x142d   : > { %20449 = vmatmul.mubr.f32.vlgmr.msra.gmra.mrb[38].mxu1 %v17409_v16 }
0x142e   : > { %20451 = vmatprep.mubr.f32.mxu1 %v17419_v50  ;;  %20877 = vmatpush3.bf16.msra.mxu1 %v23725_v36 }
0x142f   : > { %20879 = vmatprep.subr.bf16.mxu1 %v23727_v10 }
0x1431   : > { %20452 = vmatmul.mubr.f32.gmra.mrb[40].mxu1 %v17429_v56 }
0x1432   : > { %20881 = vmatpush3.bf16.msra.mxu1 %v23727_v10  ;;  %20462 = vmatprep.mubr.f32.mxu1 %v17400_v12 }
0x1433   : > { %20883 = vmatprep.subr.bf16.mxu1 %v23733_v46 }
0x1435   : > { %20463 = vmatmul.mubr.f32.vlgmr.msra.gmra.mrb[38].mxu1 %v17410_v28 }
0x1436   : > { %20465 = vmatprep.mubr.f32.mxu1 %v17420_v53  ;;  %20885 = vmatpush3.bf16.msra.mxu1 %v23733_v46  ;;  %v7760_v46 = vpop.xlane.xlu0 %7759 }
0x1437   : > { %20887 = vmatprep.subr.bf16.mxu1 %v23735_v11  ;;  %v7766_v8 = vmul.f32 0.03125, %v7760_v46 }
0x1439   : > { %20466 = vmatmul.mubr.f32.gmra.mrb[40].mxu1 %v17430_v62  ;;  %v23780_v5 = vsub.f32 %v23642_v54, %v7766_v8 }
0x143a   : > { %20889 = vmatpush3.bf16.msra.mxu1 %v23735_v11  ;;  %20476 = vmatprep.mubr.f32.mxu1 %v17398_v57 }
0x143b   : > { %20891 = vmatprep.subr.bf16.mxu1 %v23725_v36  ;;  %v7774_v54 = vmul.f32 %v23780_v5, %v23780_v5 }
0x143d   : > { %20477 = vmatmul.mubr.f32.vlgmr.msra.gmra.mrb[38].mxu1 %v23741_v41  ;;  %v7782_v23 = vsel %vm1463_vm10, %v7774_v54, 0.0 }
0x143e   : > { %20479 = vmatprep.mubr.f32.mxu1 %v17418_v49  ;;  %20893 = vmatpush3.bf16.msra.mxu1 %v23725_v36  ;;  %v7757_v36 = vpop.xlane.xlu1 %7756 }
0x143f   : > { %20895 = vmatprep.subr.bf16.mxu1 %v23727_v10  ;;  %v7765_v15 = vmul.f32 0.03125, %v7757_v36 }
0x1441   : > { %20480 = vmatmul.mubr.f32.gmra.mrb[40].mxu1 %v17428_v60 }
0x1442   : > { %20897 = vmatpush3.bf16.msra.mxu1 %v23727_v10  ;;  %20490 = vmatprep.mubr.f32.mxu1 %v17398_v57  ;;  %v18015_v57 = vld [vmem:[#allocation2] sm:$0x1] }
0x1443   : > { %v18016_v48 = vsub.f32 0.0, %v18015_v57 }
0x1445   : > { %20491 = vmatmul.mubr.f32.vlgmr.msra.gmra.mrb[38].mxu1 %v23741_v41  ;;  %v7772_v41 = vmul.f32 %v23770_v0, %v23770_v0  ;;  %v18017_v16 = vmul.f32 1.442695, %v18016_v48 }
0x1446   : > { %20493 = vmatprep.mubr.f32.mxu1 %v17418_v49 }
0x1447   : > { %21511 = vpow2.f32 %v18017_v16 }
0x1449   : > { %20494 = vmatmul.mubr.f32.gmra.mrb[40].mxu1 %v17428_v60 }
0x1451   : > { %v21512_v53 = vpop.eup %21511 }
0x1518   : > { %v20492_v14 = vpop.f32.mrb[38].mxu1 }
0x1519   : > { %v20937_v21 = vadd.f32 %v20492_v14, %v18367_v7  ;;  %v17921_v22 = vpop.f32.mrb[39].mxu1 }
0x151a   : > { %v20938_v18 = vadd.f32 %v18367_v7, %v17921_v22 }
0x151b   : > { %v17944_v11 = vadd.f32 %v20937_v21, %v23682_v32 }
0x151c   : > { %v17943_v10 = vadd.f32 %v20938_v18, %v23685_v3  ;;  %v20495_v47 = vpop.f32.mrb[40].mxu1  ;;  %v23776_v3 = vsub.f32 %v23633_v30, %v7765_v15 }
0x151d   : > { %v17933_v51 = vpop.f32.mrb[41].mxu1  ;;  %v17950_v20 = vsel %vm1463_vm10, %v17944_v11, 0.0  ;;  %v20939_v58 = vadd.f32 %v20495_v47, %v18367_v7 }
0x151e   : > { %v20940_v31 = vadd.f32 %v18367_v7, %v17933_v51  ;;  %17951 = vadd.xlane.f32.xlu1 %v17950_v20  ;;  %v17947_v33 = vsel %vm1463_vm10, %v17943_v10, 0.0  ;;  %v7773_v30 = vmul.f32 %v23776_v3, %v23776_v3  ;;  %v18019_v7 = vadd.f32 1.0, %v21512_v53 }
0x151f   : > { %17948 = vadd.xlane.f32.xlu0 %v17947_v33  ;;  %v17946_v55 = vadd.f32 %v20939_v58, %v23697_v52 }
0x1520   : > { %v17945_v32 = vadd.f32 %v20940_v31, %v23695_v13  ;;  %v7776_v13 = vsel %vm1463_vm10, %v7772_v41, 0.0  ;;  %v7779_v52 = vsel %vm1463_vm10, %v7773_v30, 0.0  ;;  %21513 = vrcp.f32 %v18019_v7 }
0x1521   : > { %v17956_v1 = vsel %vm1463_vm10, %v17946_v55, 0.0  ;;  %v21766_v41 = vmov 1966171168  }
0x1522   : > { %v17953_v45 = vsel %vm1463_vm10, %v17945_v32, 0.0 }
0x1523   : > { %17954 = vadd.xlane.f32.xlu1 %v17953_v45  ;;  %7762 = vadd.xlane.f32.xlu0 %v7761_v17 }
0x1527   : > { %17957 = vadd.xlane.f32.xlu1 %v17956_v1  ;;  %7777 = vadd.xlane.f32.xlu0 %v7776_v13  ;;  %v18064_v1 = vunpack.c.l.s4 %v21766_v41 }
0x1529   : > { %v18065_v16 = vunpack.c.0.s8 %v18064_v1 }
0x152a   : > { %v21514_v18 = vpop.eup %21513 }
0x152b   : > { %7780 = vadd.xlane.f32.xlu1 %v7779_v52  ;;  %7783 = vadd.xlane.f32.xlu0 %v7782_v23  ;;  %v18035_v46 = vsub.f32 1.0, %v21514_v18 }
0x15ab   : > { %v17952_v59 = vpop.xlane.xlu1 %17951 }
0x15ac   : > { %v17960_v25 = vmul.f32 0.03125, %v17952_v59  ;;  %v17949_v44 = vpop.xlane.xlu0 %17948  ;;  %v18368_v59 = vld.sshfl [vmem:[%s23930_s11] sm:$0x33 pattern:$0x75316420] }
0x15ad   : > { %v17959_v60 = vmul.f32 0.03125, %v17949_v44 }
0x15ae   : > { %v23794_v28 = vsub.f32 %v17944_v11, %v17960_v25  ;;  %v18040_v11 = vrot.slane %v18035_v46, %v22137_v35 }
0x15af   : > { %v23799_v50 = vsub.f32 %v17943_v10, %v17959_v60  ;;  %v18026_v10 = vrot.slane %v21514_v18, %v22137_v35 }
0x15b0   : > { %v17955_v27 = vpop.xlane.xlu1 %17954  ;;  %v7763_v49 = vpop.xlane.xlu0 %7762  ;;  %v17968_v12 = vmul.f32 %v23794_v28, %v23794_v28 }
0x15b1   : > { %v7767_v37 = vmul.f32 0.03125, %v7763_v49  ;;  %v17961_v9 = vmul.f32 0.03125, %v17955_v27  ;;  %v17967_v63 = vmul.f32 %v23799_v50, %v23799_v50  ;;  %v21532_v27 = vld [vmem:[%s23894_s12] sm:$0xf] }
0x15b2   : > { %v17974_v56 = vsel %vm1463_vm10, %v17968_v12, 0.0  ;;  %v7807_v49 = vrot.slane %v21532_v27, %v22145_v40  ;;  %v18002_v12 = vrot.slane %v23674_v4, %v22145_v40  ;;  %v7815_v7 = vrot.slane %v21532_v27, %v22149_v43 }
0x15b3   : > { %v23801_v62 = vsub.f32 %v7751_v29, %v7767_v37  ;;  %17975 = vadd.xlane.f32.xlu1 %v17974_v56  ;;  %v23805_v6 = vsub.f32 %v17945_v32, %v17961_v9  ;;  %v17971_v21 = vsel %vm1463_vm10, %v17967_v63, 0.0  ;;  %v18062_v9 = vcombine.high %v18368_v59, %v18368_v59 }
0x15b4   : > { %v17958_v2 = vpop.xlane.xlu1 %17957  ;;  %v7778_v15 = vpop.xlane.xlu0 %7777 }
0x15b5   : > { %v17962_v42 = vmul.f32 0.03125, %v17958_v2  ;;  %v7775_v61 = vmul.f32 %v23801_v62, %v23801_v62  ;;  %v17969_v22 = vmul.f32 %v23805_v6, %v23805_v6  ;;  %v7788_v8 = vmul.f32 0.03125, %v7778_v15 }
0x15b6   : > { %v18068_v2 = vsub.s32 %v18065_v16, %v22134_v34 }
0x15b7   : > { %v23807_v24 = vsub.f32 %v17946_v55, %v17962_v42  ;;  %v7785_v19 = vsel %vm1463_vm10, %v7775_v61, 0.0  ;;  %v17977_v36 = vsel %vm1463_vm10, %v17969_v22, 0.0  ;;  %v7792_v17 = vadd.f32 1e-05, %v7788_v8 }
0x15b8   : > { %7786 = vadd.xlane.f32.xlu0 %v7785_v19  ;;  %v7781_v47 = vpop.xlane.xlu1 %7780  ;;  %v7784_v58 = vpop.xlane.xlu0 %7783  ;;  %v18010_v61 = vrot.slane %v23674_v4, %v22149_v43  ;;  %v18069_v41 = vrot.slane %v18368_v59, %v18068_v2 }
0x15b9   : > { %v17970_v14 = vmul.f32 %v23807_v24, %v23807_v24  ;;  %v7789_v29 = vmul.f32 0.03125, %v7781_v47  ;;  %v7790_v32 = vmul.f32 0.03125, %v7784_v58 }
0x15bb   : > { %v17980_v39 = vsel %vm1463_vm10, %v17970_v14, 0.0  ;;  %v7793_v51 = vadd.f32 1e-05, %v7789_v29  ;;  %v7794_v13 = vadd.f32 1e-05, %v7790_v32  ;;  %v18076_v14 = vrot.slane %v18062_v9, %v18068_v2 }
0x15bc   : > { %17981 = vadd.xlane.f32.xlu1 %v17980_v39  ;;  %17972 = vadd.xlane.f32.xlu0 %v17971_v21 }
0x15bd   : > { %21515 = vrsqrt.f32 %v7793_v51  ;;  %v18086_v4 = vrot.slane %v18076_v14, %v22137_v35 }
0x15c0   : > { %17978 = vadd.xlane.f32.xlu1 %v17977_v36 }
0x15c7   : > { %v21516_v54 = vpop.eup %21515 }
0x15c8   : > { %v7801_v60 = vmul.f32 %v21516_v54, %v23776_v3 }
0x15ca   : > { %v7809_v19 = vmul.f32 %v7807_v49, %v7801_v60 }
0x15cc   : > { %v7817_v18 = vadd.f32 %v7815_v7, %v7809_v19  ;;  %v18115_v19 = vld [vmem:[%s23931_s18] sm:$0xf] }
0x15d1   : > { %18042 = vperm.xlu1 %21446, %v18040_v11  }
0x15d2   : > { %18028 = vperm.xlu0 %21445, %v18026_v10  }
0x1640   : > { %v17976_v20 = vpop.xlane.xlu1 %17975 }
0x1641   : > { %v17984_v31 = vmul.f32 0.03125, %v17976_v20 }
0x1643   : > { %v17988_v33 = vadd.f32 1e-05, %v17984_v31 }
0x1645   : > { %21517 = vrsqrt.f32 %v17988_v33  ;;  %v7787_v55 = vpop.xlane.xlu0 %7786 }
0x1646   : > { %v7791_v45 = vmul.f32 0.03125, %v7787_v55  ;;  %21519 = vrsqrt.f32 %v7792_v17 }
0x1648   : > { %v7795_v30 = vadd.f32 1e-05, %v7791_v45 }
0x1649   : > { %v17982_v52 = vpop.xlane.xlu1 %17981  ;;  %v17973_v23 = vpop.xlane.xlu0 %17972 }
0x164a   : > { %21521 = vrsqrt.f32 %v7795_v30  ;;  %v17986_v57 = vmul.f32 0.03125, %v17982_v52  ;;  %v17983_v48 = vmul.f32 0.03125, %v17973_v23  ;;  %v18078_v52 = vcombine.high %v18076_v14, %v18076_v14 }
0x164b   : > { %21523 = vrsqrt.f32 %v7794_v13 }
0x164c   : > { %v17990_v25 = vadd.f32 1e-05, %v17986_v57  ;;  %v17987_v44 = vadd.f32 1e-05, %v17983_v48 }
0x164d   : > { %v17979_v37 = vpop.xlane.xlu1 %17978 }
0x164e   : > { %21525 = vrsqrt.f32 %v17990_v25  ;;  %v17985_v56 = vmul.f32 0.03125, %v17979_v37  ;;  %v18082_v25 = vrot.slane %v18069_v41, %v22137_v35 }
0x164f   : > { %v21518_v53 = vpop.eup %21517  ;;  %21527 = vrsqrt.f32 %v17987_v44 }
0x1650   : > { %v17989_v42 = vadd.f32 1e-05, %v17985_v56  ;;  %v17996_v3 = vmul.f32 %v21518_v53, %v23794_v28  ;;  %v21520_v39 = vpop.eup %21519 }
0x1651   : > { %v18029_v21 = vpop.permute.xlu0 %18028  ;;  %v18043_v34 = vpop.permute.xlu1 %18042  ;;  %v7800_v28 = vmul.f32 %v21520_v39, %v23770_v0 }
0x1652   : > { %21529 = vrsqrt.f32 %v17989_v42  ;;  %v18004_v63 = vmul.f32 %v18002_v12, %v17996_v3  ;;  %v18032_v47 = vmul.f32 %v18029_v21, %v7817_v18 }
0x1653   : > { %v7808_v33 = vmul.f32 %v7807_v49, %v7800_v28 }
0x1654   : > { %v21522_v22 = vpop.eup %21521  ;;  %v18012_v36 = vadd.f32 %v18010_v61, %v18004_v63 }
0x1655   : > { %v7803_v46 = vmul.f32 %v21522_v22, %v23801_v62  ;;  %v21524_v11 = vpop.eup %21523 }
0x1656   : > { %v18046_v10 = vmul.f32 %v18043_v34, %v18012_v36  ;;  %v7802_v58 = vmul.f32 %v21524_v11, %v23780_v5 }
0x1657   : > { %v7811_v15 = vmul.f32 %v7807_v49, %v7803_v46 }
0x1658   : > { %v21526_v29 = vpop.eup %21525  ;;  %v18050_v51 = vadd.f32 %v18046_v10, %v18032_v47  ;;  %v7810_v30 = vmul.f32 %v7807_v49, %v7802_v58 }
0x1659   : > { %v21528_v20 = vpop.eup %21527  ;;  %v17998_v8 = vmul.f32 %v21526_v29, %v23807_v24  ;;  %v7819_v45 = vadd.f32 %v7815_v7, %v7811_v15  ;;  %v7816_v24 = vadd.f32 %v7815_v7, %v7808_v33 }
0x165a   : > { %v17995_v31 = vmul.f32 %v21528_v20, %v23799_v50  ;;  %v18100_v32 = vmul.f32 %v18086_v4, %v18050_v51  ;;  %v18077_v50 = vcombine.high %v18069_v41, %v18069_v41  ;;  %v7818_v60 = vadd.f32 %v7815_v7, %v7810_v30 }
0x165b   : > { %v18006_v62 = vmul.f32 %v18002_v12, %v17998_v8  ;;  %v18031_v48 = vmul.f32 %v18029_v21, %v7816_v24  ;;  %v18034_v16 = vmul.f32 %v18029_v21, %v7819_v45 }
0x165c   : > { %v21530_v17 = vpop.eup %21529  ;;  %v18003_v55 = vmul.f32 %v18002_v12, %v17995_v31  ;;  %v18106_v0 = vsel %vm1463_vm10, %v18100_v32, 0.0  ;;  %v18033_v49 = vmul.f32 %v18029_v21, %v7818_v60  ;;  %v18090_v56 = vrot.slane %v18077_v50, %v22137_v35 }
0x165d   : > { %v17997_v1 = vmul.f32 %v21530_v17, %v23805_v6  ;;  %v18014_v13 = vadd.f32 %v18010_v61, %v18006_v62  ;;  %18107 = vadd.xlane.f32.xlu0 %v18106_v0  ;;  %v18094_v6 = vrot.slane %v18078_v52, %v22137_v35 }
0x165e   : > { %v18011_v54 = vadd.f32 %v18010_v61, %v18003_v55 }
0x165f   : > { %v18005_v5 = vmul.f32 %v18002_v12, %v17997_v1  ;;  %v18048_v23 = vmul.f32 %v18043_v34, %v18014_v13 }
0x1660   : > { %v18045_v57 = vmul.f32 %v18043_v34, %v18011_v54 }
0x1661   : > { %v18013_v44 = vadd.f32 %v18010_v61, %v18005_v5  ;;  %v18052_v59 = vadd.f32 %v18048_v23, %v18034_v16 }
0x1662   : > { %v18049_v27 = vadd.f32 %v18045_v57, %v18031_v48 }
0x1663   : > { %v18047_v37 = vmul.f32 %v18043_v34, %v18013_v44  ;;  %v18102_v53 = vmul.f32 %v18094_v6, %v18052_v59 }
0x1664   : > { %v18099_v9 = vmul.f32 %v18082_v25, %v18049_v27 }
0x1665   : > { %v18051_v2 = vadd.f32 %v18047_v37, %v18033_v49  ;;  %v18112_v61 = vsel %vm1463_vm10, %v18102_v53, 0.0 }
0x1666   : > { %v18103_v12 = vsel %vm1463_vm10, %v18099_v9, 0.0 }
0x1667   : > { %18104 = vadd.xlane.f32.xlu1 %v18103_v12  ;;  %v18101_v42 = vmul.f32 %v18090_v56, %v18051_v2 }
0x1669   : > { %v18109_v3 = vsel %vm1463_vm10, %v18101_v42, 0.0 }
0x166a   : > { %18110 = vadd.xlane.f32.xlu0 %v18109_v3 }
0x166b   : > { %18113 = vadd.xlane.f32.xlu1 %v18112_v61 }
0x1680   : > { %18118 = vperm.xlu0 %21445, %v18115_v19  }
0x16ea   : > { %v18108_v63 = vpop.xlane.xlu0 %18107 }
0x16f4   : > { %v18105_v7 = vpop.xlane.xlu1 %18104 }
0x16f7   : > { %v18111_v14 = vpop.xlane.xlu0 %18110 }
0x16f8   : > { %v18114_v36 = vpop.xlane.xlu1 %18113 }
0x16ff   : > { %v18119_v39 = vpop.permute.xlu0 %18118 }
0x1700   : > { %v18127_v21 = vrot.slane %v18119_v39, %v22141_v38  ;;  %v18135_v22 = vrot.slane %v18119_v39, %v22149_v43  ;;  %v18123_v18 = vrot.slane %v18119_v39, %v22137_v35  ;;  %v18131_v11 = vrot.slane %v18119_v39, %v22145_v40 }
0x1702   : > { %v18141_v34 = vadd.f32 %v18127_v21, %v18108_v63  ;;  %v18143_v46 = vadd.f32 %v18135_v22, %v18114_v36  ;;  %v18140_v10 = vadd.f32 %v18123_v18, %v18105_v7  ;;  %v18142_v28 = vadd.f32 %v18131_v11, %v18111_v14 }
0x1704   : > { %18152 = vperm.xlu1 %21446, %v18141_v34   ;;  %18158 = vperm.xlu0 %21445, %v18143_v46  }
0x1708   : > { %18149 = vperm.xlu1 %21446, %v18140_v10  }
0x170c   : > { %18155 = vperm.xlu1 %21446, %v18142_v28  }
0x1783   : > { %v18153_v47 = vpop.permute.xlu1 %18152  ;;  %v18159_v43 = vpop.permute.xlu0 %18158 }
0x1784   : > { %v18167_v29 = vrot.slane %v18153_v47, %v22185_v26  ;;  %v18175_v51 = vrot.slane %v18159_v43, %v22185_v26 }
0x1787   : > { %v18150_v4 = vpop.permute.xlu1 %18149 }
0x1788   : > { %v18163_v38 = vrot.slane %v18150_v4, %v22185_v26 }
0x178a   : > { %v18176_v40 = vsel %vm966_vm3, %v18167_v29, %v18163_v38 }
0x178b   : > { %v18156_v35 = vpop.permute.xlu1 %18155 }
0x178c   : > { %v18171_v15 = vrot.slane %v18156_v35, %v22185_v26 }
0x178e   : > { %v18177_v20 = vsel %vm968_vm4, %v18171_v15, %v18176_v40 }
0x178f   : > { %v18178_v8 = vsel %vm970_vm5, %v18175_v51, %v18177_v20 }
0x1790   : > { %v18181_v58 = vsel %vm18180_vm15, %v18178_v8, -inf }
0x1791   : > { %18182 = vmax.xlane.f32.xlu1 %v18181_v58 }
0x181e   : > { %v18183_v31 = vpop.xlane.xlu1 %18182 }
0x181f   : > { %18185 = vst.msk [vmem:[%s612_s19] sm:$0xf] %vm18184_vm0, %v18183_v31 }
0x1820 PF: > { %p31_p11 = scmp.ge.s32.totalorder %s22016_s17, 4   ;;  %s23933_s23 = smov %s21741_s24 }
0x1821   : > { %s23934_s24 = smov %s21745_s25  ;;  %s23935_s25 = smov %s22027_s10 }
0x1822   : > { %s23936_s26 = smov %s22016_s17  ;;  %33 = sbr.rel (!%p31_p11) target bundleno = 15 (0xf), region = 153 }
0x1829   :  { %18205 = vsyncpa [#allocation4], 1 }
0x182a   :  { %18207 = vsyncpa [#allocation4 + $0x1], 1 }
0x182b   :  { %18208 = vsyncpa [#allocation6], 1 }
0x182c   :  { %18209 = vsyncpa [#allocation9], 1 }
0x182d   :  { %18210 = vsyncpa [#allocation12], 1 }

</bundles_post_ra>
